<compile_context>
chip_gen: v7x
topology: tpu7x:2x2x1
jax: 0.10.0
libtpu: 0.0.40
codegen_flags: <defaults>
</compile_context>

<pallas_src>
import functools

import jax
import jax.numpy as jnp
from jax import lax
from jax.experimental import pallas as pl
from jax.experimental.pallas import tpu as pltpu


def _make_divisible(v, divisor=8, min_value=None):
    min_value = min_value or divisor
    new_v = max(min_value, int(v + divisor / 2) // divisor * divisor)
    if new_v < 0.9 * v:
        new_v += divisor
    return new_v


def condconv_residual_kernel(x_ref, wrr_ref, brr_ref, eye_ref, bank_ref,
                             s1_ref, b1_ref, s2_ref, b2_ref, s3_ref, b3_ref,
                             out_ref, *, nb, cin, cmid, cout, height, width):
    # x_ref    : (nb*cin, H*W)      nb samples, channel-major, spatial on lanes (bf16)
    # wrr_ref  : (E*Cmax, cin)      routing weight, each expert row repeated Cmax times
    # brr_ref  : (E*Cmax, 1)        routing bias, repeated the same way
    # eye_ref  : (E*Cmax, Cmax)     E vertically-stacked identity matrices
    # bank_ref : (2*cmid+cout, E*Cmax)  [pw | dw | pwl] expert banks, per-expert
    #                                   column blocks of width Cmax (zero padded), bf16
    # s*/b*    : folded BN scale/bias, pre-tiled to (nb*C, 1)
    # out_ref  : (nb*cout, H*W)     bf16
    hw = height * width

    x = x_ref[...].astype(jnp.float32)                       # one upcast per tile
    bank = bank_ref[...].astype(jnp.float32)                 # (R, E*Cmax)
    eye_tile = eye_ref[...]                                   # (E*Cmax, Cmax)
    wrr = wrr_ref[...]                                        # (E*Cmax, cin)
    brr = brr_ref[...]                                        # (E*Cmax, 1)

    # --- CondConv routing + expert mixing (MXU, no in-kernel reshapes) --------
    # Pool first (one batched lane reduction), then a tiny per-sample matvec.
    pooled = jnp.mean(x, axis=1, keepdims=True)               # (nb*cin, 1)
    w_cats = []
    dw_parts = []
    for i in range(nb):                                       # short unrolled loop
        p_i = pooled[i * cin:(i + 1) * cin, :]                # (cin, 1)
        # r_rep[e*Cmax + a] == sigmoid(w_route[e] @ pooled + b_route[e]) for all a.
        r_rep = jax.nn.sigmoid(
            jnp.dot(wrr, p_i, preferred_element_type=jnp.float32) + brr)
        # kron(r_i, I_Cmax): selects & scales each expert's column block.
        s_mat = eye_tile * r_rep                              # (E*Cmax, Cmax)
        w_cat = jnp.dot(bank, s_mat, preferred_element_type=jnp.float32)  # (R, Cmax)
        w_cats.append(w_cat)
        dw_parts.append(w_cat[cmid:2 * cmid, 0:9])            # mixed dw weight (cmid, 9)
    w_dw_all = jnp.concatenate(dw_parts, axis=0)              # (nb*cmid, 9)

    # --- conv_pw (1x1) per sample + batched BN1 + ReLU -------------------------
    x1 = jnp.concatenate(
        [jnp.dot(w_cats[i][0:cmid, 0:cin], x[i * cin:(i + 1) * cin, :],
                 preferred_element_type=jnp.float32) for i in range(nb)],
        axis=0)                                               # (nb*cmid, hw)
    x1 = jnp.maximum(x1 * s1_ref[...] + b1_ref[...], 0.0)

    # --- conv_dw (3x3 depthwise, stride 1, 'same') + BN2 + ReLU ----------------
    # Spatial shift (dy, dx) == lane rotate by dy*W + dx (XLU, pltpu.roll);
    # out-of-image taps are zeroed by iota-derived boundary masks.
    lane = lax.broadcasted_iota(jnp.int32, (1, hw), 1).astype(jnp.float32)
    row = jnp.floor((lane + 0.5) * (1.0 / width))             # exact integer rows
    col = lane - row * width                                  # exact integer cols
    acc = w_dw_all[:, 4:5] * x1                               # center tap, mask == 1
    for dy in (-1, 0, 1):
        for dx in (-1, 0, 1):
            if dy == 0 and dx == 0:
                continue
            k = (dy + 1) * 3 + (dx + 1)
            shift = (-(dy * width + dx)) % hw
            shifted = pltpu.roll(x1, shift, axis=1)           # XLU lane rotate
            cond = None
            if dy == -1:
                cond = row >= 1.0
            elif dy == 1:
                cond = row < float(height - 1)
            if dx == -1:
                c2 = col >= 1.0
                cond = c2 if cond is None else jnp.logical_and(cond, c2)
            elif dx == 1:
                c2 = col < float(width - 1)
                cond = c2 if cond is None else jnp.logical_and(cond, c2)
            maskf = cond.astype(jnp.float32)                  # (1, hw)
            acc = acc + w_dw_all[:, k:k + 1] * (shifted * maskf)
    x2 = jnp.maximum(acc * s2_ref[...] + b2_ref[...], 0.0)

    # TODO(synk): SqueezeExcite branch not instantiated (se_ratio=0.0 default).

    # --- conv_pwl (1x1) per sample + batched BN3 + residual --------------------
    off = 2 * cmid
    x3 = jnp.concatenate(
        [jnp.dot(w_cats[i][off:off + cout, 0:cmid], x2[i * cmid:(i + 1) * cmid, :],
                 preferred_element_type=jnp.float32) for i in range(nb)],
        axis=0)                                               # (nb*cout, hw)
    x3 = x3 * s3_ref[...] + b3_ref[...]
    out_ref[...] = (x3 + x).astype(out_ref.dtype)             # in_chs == out_chs


@functools.partial(jax.jit, static_argnames=("nb",))
def condconv_residual_pallas(x_nchw, w_route, b_route, wpw_e, wdw_e, wpwl_e,
                             s1, b1, s2, b2, s3, b3, *, nb=4):
    """x_nchw: (N, Cin, H, W) f32.  Returns (N, Cout, H, W) f32."""
    N, Cin, H, W = x_nchw.shape
    E, Cmid, _ = wpw_e.shape
    Cout = wpwl_e.shape[1]
    assert Cin == Cout, "residual path requires in_chs == out_chs (stride == 1)"
    assert N % nb == 0, "batch must be divisible by samples-per-grid-step"
    HW = H * W
    Cmax = max(Cin, Cmid, 9)
    R = 2 * Cmid + Cout

    # bf16 HBM I/O for the large streams (x / expert bank / output).
    x2d = x_nchw.reshape(N * Cin, HW).astype(jnp.bfloat16)    # lane-dense, free reshape

    # Expert bank: rows [pw | dw | pwl]; per-expert column blocks of width Cmax.
    def bank_rows(w3):
        e, co, ci = w3.shape
        wp = jnp.pad(w3, ((0, 0), (0, 0), (0, Cmax - ci)))
        return wp.transpose(1, 0, 2).reshape(co, e * Cmax)

    bank = jnp.concatenate(
        [bank_rows(wpw_e), bank_rows(wdw_e), bank_rows(wpwl_e)],
        axis=0).astype(jnp.bfloat16)                          # (R, E*Cmax)

    wroute_rep = jnp.repeat(w_route, Cmax, axis=0)            # (E*Cmax, Cin)
    broute_rep = jnp.repeat(b_route.reshape(E, 1), Cmax, axis=0)   # (E*Cmax, 1)
    eye_tile = jnp.tile(jnp.eye(Cmax, dtype=jnp.float32), (E, 1))  # (E*Cmax, Cmax)

    # BN scale/bias tiled to match the nb-folded sublane axis.
    s1t, b1t = jnp.tile(s1.reshape(Cmid, 1), (nb, 1)), jnp.tile(b1.reshape(Cmid, 1), (nb, 1))
    s2t, b2t = jnp.tile(s2.reshape(Cmid, 1), (nb, 1)), jnp.tile(b2.reshape(Cmid, 1), (nb, 1))
    s3t, b3t = jnp.tile(s3.reshape(Cout, 1), (nb, 1)), jnp.tile(b3.reshape(Cout, 1), (nb, 1))

    kernel = functools.partial(condconv_residual_kernel, nb=nb, cin=Cin, cmid=Cmid,
                               cout=Cout, height=H, width=W)

    out2d = pl.pallas_call(
        kernel,
        out_shape=jax.ShapeDtypeStruct((N * Cout, HW), jnp.bfloat16),
        grid=(N // nb,),                                      # keep >= 2 steps (v7x 2 TCs)
        in_specs=[
            pl.BlockSpec((nb * Cin, HW), lambda n: (n, 0)),   # x: nb samples per step
            pl.BlockSpec((E * Cmax, Cin), lambda n: (0, 0)),  # routing weight (repeated)
            pl.BlockSpec((E * Cmax, 1), lambda n: (0, 0)),    # routing bias (repeated)
            pl.BlockSpec((E * Cmax, Cmax), lambda n: (0, 0)), # tiled identity
            pl.BlockSpec((R, E * Cmax), lambda n: (0, 0)),    # expert bank
            pl.BlockSpec((nb * Cmid, 1), lambda n: (0, 0)),   # bn1 scale
            pl.BlockSpec((nb * Cmid, 1), lambda n: (0, 0)),   # bn1 bias
            pl.BlockSpec((nb * Cmid, 1), lambda n: (0, 0)),   # bn2 scale
            pl.BlockSpec((nb * Cmid, 1), lambda n: (0, 0)),   # bn2 bias
            pl.BlockSpec((nb * Cout, 1), lambda n: (0, 0)),   # bn3 scale
            pl.BlockSpec((nb * Cout, 1), lambda n: (0, 0)),   # bn3 bias
        ],
        out_specs=pl.BlockSpec((nb * Cout, HW), lambda n: (n, 0)),
        input_output_aliases={0: 0},                          # reuse x's HBM buffer
        compiler_params=pltpu.CompilerParams(
            dimension_semantics=("parallel",),
            vmem_limit_bytes=32 * 1024 * 1024),
    )(x2d, wroute_rep, broute_rep, eye_tile, bank,
      s1t, b1t, s2t, b2t, s3t, b3t)

    return out2d.reshape(N, Cout, H, W).astype(jnp.float32)


def condconv_residual_reference(x, w_route, b_route, wpw_e, wdw_e, wpwl_e,
                                s1, b1, s2, b2, s3, b3):
    """Pure-JAX reference (NCHW) mirroring the PyTorch forward."""
    N, Cin, H, W = x.shape
    E, Cmid, _ = wpw_e.shape
    Cout = wpwl_e.shape[1]

    pooled = x.mean(axis=(2, 3))                                     # (N, Cin)
    r = jax.nn.sigmoid(pooled @ w_route.T + b_route[None, :])        # (N, E)
    wpw_n = jnp.einsum("ne,eoi->noi", r, wpw_e)                      # (N, Cmid, Cin)
    wdw_n = jnp.einsum("ne,eck->nck", r, wdw_e)                      # (N, Cmid, 9)
    wpwl_n = jnp.einsum("ne,eoi->noi", r, wpwl_e)                    # (N, Cout, Cmid)

    outs = []
    for n in range(N):
        xn = x[n:n + 1]
        y = lax.conv_general_dilated(
            xn, wpw_n[n][:, :, None, None], (1, 1), "VALID",
            dimension_numbers=("NCHW", "OIHW", "NCHW"))
        y = jnp.maximum(y * s1[None, :, None, None] + b1[None, :, None, None], 0.0)
        y = lax.conv_general_dilated(
            y, wdw_n[n].reshape(Cmid, 1, 3, 3), (1, 1), ((1, 1), (1, 1)),
            dimension_numbers=("NCHW", "OIHW", "NCHW"),
            feature_group_count=Cmid)
        y = jnp.maximum(y * s2[None, :, None, None] + b2[None, :, None, None], 0.0)
        y = lax.conv_general_dilated(
            y, wpwl_n[n][:, :, None, None], (1, 1), "VALID",
            dimension_numbers=("NCHW", "OIHW", "NCHW"))
        y = y * s3[None, :, None, None] + b3[None, :, None, None]
        outs.append(y + xn)
    return jnp.concatenate(outs, axis=0)


if __name__ == "__main__":
    # Small config: in_chs == out_chs == 8, exp_ratio=1.0 -> mid_chs=8, stride=1
    # -> residual active; 8 CondConv experts.  N=8 with nb=4 samples per grid step
    # -> a 2-step "parallel" grid (feeds both v7x TensorCores).
    N, H, W = 8, 16, 16
    in_chs = out_chs = 8
    exp_ratio = 1.0
    mid_chs = _make_divisible(in_chs * exp_ratio)   # 8
    num_experts = 8
    eps = 1e-5

    key = jax.random.PRNGKey(0)
    ks = jax.random.split(key, 20)

    x = jax.random.normal(ks[0], (N, in_chs, H, W), jnp.float32)

    # routing_fn: nn.Linear(in_chs, num_experts)
    w_route = 0.2 * jax.random.normal(ks[1], (num_experts, in_chs), jnp.float32)
    b_route = 0.1 * jax.random.normal(ks[2], (num_experts,), jnp.float32)

    # CondConv expert weight banks (bias=False as in timm CondConv2d defaults).
    wpw_e = 0.2 * jax.random.normal(ks[3], (num_experts, mid_chs, in_chs), jnp.float32)
    wdw_e = 0.2 * jax.random.normal(ks[4], (num_experts, mid_chs, 9), jnp.float32)
    wpwl_e = 0.2 * jax.random.normal(ks[5], (num_experts, out_chs, mid_chs), jnp.float32)

    # BatchNorm2d (inference) folded to per-channel scale / bias.
    def bn_fold(kg, kb, km, kv, c):
        gamma = 1.0 + 0.1 * jax.random.normal(kg, (c,), jnp.float32)
        beta = 0.1 * jax.random.normal(kb, (c,), jnp.float32)
        mean = 0.1 * jax.random.normal(km, (c,), jnp.float32)
        var = jnp.abs(jax.random.normal(kv, (c,), jnp.float32)) + 0.5
        scale = gamma / jnp.sqrt(var + eps)
        return scale, beta - mean * scale

    s1, b1 = bn_fold(ks[6], ks[7], ks[8], ks[9], mid_chs)
    s2, b2 = bn_fold(ks[10], ks[11], ks[12], ks[13], mid_chs)
    s3, b3 = bn_fold(ks[14], ks[15], ks[16], ks[17], out_chs)

    # The kernel streams x / expert banks / output through HBM in bf16; quantize
    # those once so kernel and reference see identical operands (only the final
    # bf16 output rounding then separates them).
    q = lambda a: a.astype(jnp.bfloat16).astype(jnp.float32)
    x_q, wpw_q, wdw_q, wpwl_q = q(x), q(wpw_e), q(wdw_e), q(wpwl_e)

    out = condconv_residual_pallas(x_q, w_route, b_route, wpw_q, wdw_q, wpwl_q,
                                   s1, b1, s2, b2, s3, b3, nb=4)
    out = jax.block_until_ready(out)

    ref = condconv_residual_reference(x_q, w_route, b_route, wpw_q, wdw_q, wpwl_q,
                                      s1, b1, s2, b2, s3, b3)
    assert out.shape == (N, out_chs, H, W)
    max_err = jnp.max(jnp.abs(out - ref))
    # Tolerance accounts for the bf16 output store (~2^-9 relative).
    assert jnp.allclose(out, ref, atol=2e-2, rtol=2e-2), f"max err {max_err}"

    print("KERNEL_OK")
</pallas_src>

<mosaic_0001>
module attributes {stable_mosaic.version = 11 : i64} {
  func.func @condconv_residual_kernel(%arg0: i32, %arg1: memref<32x256xbf16, #tpu.memory_space<vmem>>, %arg2: memref<72x8xf32, #tpu.memory_space<vmem>>, %arg3: memref<72x1xf32, #tpu.memory_space<vmem>>, %arg4: memref<72x9xf32, #tpu.memory_space<vmem>>, %arg5: memref<24x72xbf16, #tpu.memory_space<vmem>>, %arg6: memref<32x1xf32, #tpu.memory_space<vmem>>, %arg7: memref<32x1xf32, #tpu.memory_space<vmem>>, %arg8: memref<32x1xf32, #tpu.memory_space<vmem>>, %arg9: memref<32x1xf32, #tpu.memory_space<vmem>>, %arg10: memref<32x1xf32, #tpu.memory_space<vmem>>, %arg11: memref<32x1xf32, #tpu.memory_space<vmem>>, %arg12: memref<32x256xbf16, #tpu.memory_space<vmem>>) attributes {dimension_semantics = [#tpu.dimension_semantics<parallel>], iteration_bounds = array<i64: 2>, scalar_prefetch = 0 : i64, scratch_operands = 0 : i64, tpu.core_type = #tpu.core_type<tc>, window_params = [{transform_indices = @transform_0, window_bounds = array<i64: 32, 256>}, {pipeline_mode = #tpu.pipeline_mode<synchronous>, transform_indices = @transform_1, window_bounds = array<i64: 72, 8>}, {pipeline_mode = #tpu.pipeline_mode<synchronous>, transform_indices = @transform_2, window_bounds = array<i64: 72, 1>}, {pipeline_mode = #tpu.pipeline_mode<synchronous>, transform_indices = @transform_3, window_bounds = array<i64: 72, 9>}, {pipeline_mode = #tpu.pipeline_mode<synchronous>, transform_indices = @transform_4, window_bounds = array<i64: 24, 72>}, {pipeline_mode = #tpu.pipeline_mode<synchronous>, transform_indices = @transform_5, window_bounds = array<i64: 32, 1>}, {pipeline_mode = #tpu.pipeline_mode<synchronous>, transform_indices = @transform_6, window_bounds = array<i64: 32, 1>}, {pipeline_mode = #tpu.pipeline_mode<synchronous>, transform_indices = @transform_7, window_bounds = array<i64: 32, 1>}, {pipeline_mode = #tpu.pipeline_mode<synchronous>, transform_indices = @transform_8, window_bounds = array<i64: 32, 1>}, {pipeline_mode = #tpu.pipeline_mode<synchronous>, transform_indices = @transform_9, window_bounds = array<i64: 32, 1>}, {pipeline_mode = #tpu.pipeline_mode<synchronous>, transform_indices = @transform_10, window_bounds = array<i64: 32, 1>}, {transform_indices = @transform_11, window_bounds = array<i64: 32, 256>}]} {
    %c0 = arith.constant 0 : index
    %c0_0 = arith.constant 0 : index
    %0 = vector.load %arg1[%c0, %c0_0] : memref<32x256xbf16, #tpu.memory_space<vmem>>, vector<32x256xbf16>
    %1 = arith.extf %0 : vector<32x256xbf16> to vector<32x256xf32>
    %c0_1 = arith.constant 0 : index
    %c0_2 = arith.constant 0 : index
    %2 = vector.load %arg5[%c0_1, %c0_2] : memref<24x72xbf16, #tpu.memory_space<vmem>>, vector<24x72xbf16>
    %3 = arith.extf %2 : vector<24x72xbf16> to vector<24x72xf32>
    %c0_3 = arith.constant 0 : index
    %c0_4 = arith.constant 0 : index
    %4 = vector.load %arg4[%c0_3, %c0_4] : memref<72x9xf32, #tpu.memory_space<vmem>>, vector<72x9xf32>
    %c0_5 = arith.constant 0 : index
    %c0_6 = arith.constant 0 : index
    %5 = vector.load %arg2[%c0_5, %c0_6] : memref<72x8xf32, #tpu.memory_space<vmem>>, vector<72x8xf32>
    %c0_7 = arith.constant 0 : index
    %c0_8 = arith.constant 0 : index
    %6 = vector.load %arg3[%c0_7, %c0_8] : memref<72x1xf32, #tpu.memory_space<vmem>>, vector<72x1xf32>
    %cst = arith.constant dense<0.000000e+00> : vector<32xf32>
    %7 = vector.multi_reduction <add>, %1, %cst [1] : vector<32x256xf32> to vector<32xf32>
    %8 = vector.shape_cast %7 : vector<32xf32> to vector<32x1xf32>
    %cst_9 = arith.constant 2.560000e+02 : f32
    %9 = vector.broadcast %cst_9 : f32 to vector<32x1xf32>
    %10 = arith.divf %8, %9 : vector<32x1xf32>
    %11 = vector.extract_strided_slice %10 {offsets = [0, 0], sizes = [8, 1], strides = [1, 1]} : vector<32x1xf32> to vector<8x1xf32>
    %cst_10 = arith.constant dense<0.000000e+00> : vector<72x1xf32>
    %12 = tpu.matmul %5, %11, %cst_10 {dimension_numbers = #tpu.dot_dimension_numbers<[1], [0], [0], [1], [0, 0, 1, 1], [], []>} : vector<72x8xf32>, vector<8x1xf32>, vector<72x1xf32> -> vector<72x1xf32>
    %13 = arith.addf %12, %6 : vector<72x1xf32>
    %14 = arith.negf %13 : vector<72x1xf32>
    %15 = math.exp %14 : vector<72x1xf32>
    %cst_11 = arith.constant 1.000000e+00 : f32
    %16 = vector.broadcast %cst_11 : f32 to vector<72x1xf32>
    %17 = arith.addf %16, %15 : vector<72x1xf32>
    %18 = arith.divf %16, %17 : vector<72x1xf32>
    %19 = vector.broadcast %18 : vector<72x1xf32> to vector<72x9xf32>
    %20 = arith.mulf %4, %19 : vector<72x9xf32>
    %cst_12 = arith.constant dense<0.000000e+00> : vector<24x9xf32>
    %21 = tpu.matmul %3, %20, %cst_12 {dimension_numbers = #tpu.dot_dimension_numbers<[1], [0], [0], [1], [0, 0, 1, 1], [], []>} : vector<24x72xf32>, vector<72x9xf32>, vector<24x9xf32> -> vector<24x9xf32>
    %22 = vector.extract_strided_slice %21 {offsets = [8, 0], sizes = [8, 9], strides = [1, 1]} : vector<24x9xf32> to vector<8x9xf32>
    %23 = vector.extract_strided_slice %10 {offsets = [8, 0], sizes = [8, 1], strides = [1, 1]} : vector<32x1xf32> to vector<8x1xf32>
    %cst_13 = arith.constant dense<0.000000e+00> : vector<72x1xf32>
    %24 = tpu.matmul %5, %23, %cst_13 {dimension_numbers = #tpu.dot_dimension_numbers<[1], [0], [0], [1], [0, 0, 1, 1], [], []>} : vector<72x8xf32>, vector<8x1xf32>, vector<72x1xf32> -> vector<72x1xf32>
    %25 = arith.addf %24, %6 : vector<72x1xf32>
    %26 = arith.negf %25 : vector<72x1xf32>
    %27 = math.exp %26 : vector<72x1xf32>
    %cst_14 = arith.constant 1.000000e+00 : f32
    %28 = vector.broadcast %cst_14 : f32 to vector<72x1xf32>
    %29 = arith.addf %28, %27 : vector<72x1xf32>
    %30 = arith.divf %28, %29 : vector<72x1xf32>
    %31 = vector.broadcast %30 : vector<72x1xf32> to vector<72x9xf32>
    %32 = arith.mulf %4, %31 : vector<72x9xf32>
    %cst_15 = arith.constant dense<0.000000e+00> : vector<24x9xf32>
    %33 = tpu.matmul %3, %32, %cst_15 {dimension_numbers = #tpu.dot_dimension_numbers<[1], [0], [0], [1], [0, 0, 1, 1], [], []>} : vector<24x72xf32>, vector<72x9xf32>, vector<24x9xf32> -> vector<24x9xf32>
    %34 = vector.extract_strided_slice %33 {offsets = [8, 0], sizes = [8, 9], strides = [1, 1]} : vector<24x9xf32> to vector<8x9xf32>
    %35 = vector.extract_strided_slice %10 {offsets = [16, 0], sizes = [8, 1], strides = [1, 1]} : vector<32x1xf32> to vector<8x1xf32>
    %cst_16 = arith.constant dense<0.000000e+00> : vector<72x1xf32>
    %36 = tpu.matmul %5, %35, %cst_16 {dimension_numbers = #tpu.dot_dimension_numbers<[1], [0], [0], [1], [0, 0, 1, 1], [], []>} : vector<72x8xf32>, vector<8x1xf32>, vector<72x1xf32> -> vector<72x1xf32>
    %37 = arith.addf %36, %6 : vector<72x1xf32>
    %38 = arith.negf %37 : vector<72x1xf32>
    %39 = math.exp %38 : vector<72x1xf32>
    %cst_17 = arith.constant 1.000000e+00 : f32
    %40 = vector.broadcast %cst_17 : f32 to vector<72x1xf32>
    %41 = arith.addf %40, %39 : vector<72x1xf32>
    %42 = arith.divf %40, %41 : vector<72x1xf32>
    %43 = vector.broadcast %42 : vector<72x1xf32> to vector<72x9xf32>
    %44 = arith.mulf %4, %43 : vector<72x9xf32>
    %cst_18 = arith.constant dense<0.000000e+00> : vector<24x9xf32>
    %45 = tpu.matmul %3, %44, %cst_18 {dimension_numbers = #tpu.dot_dimension_numbers<[1], [0], [0], [1], [0, 0, 1, 1], [], []>} : vector<24x72xf32>, vector<72x9xf32>, vector<24x9xf32> -> vector<24x9xf32>
    %46 = vector.extract_strided_slice %45 {offsets = [8, 0], sizes = [8, 9], strides = [1, 1]} : vector<24x9xf32> to vector<8x9xf32>
    %47 = vector.extract_strided_slice %10 {offsets = [24, 0], sizes = [8, 1], strides = [1, 1]} : vector<32x1xf32> to vector<8x1xf32>
    %cst_19 = arith.constant dense<0.000000e+00> : vector<72x1xf32>
    %48 = tpu.matmul %5, %47, %cst_19 {dimension_numbers = #tpu.dot_dimension_numbers<[1], [0], [0], [1], [0, 0, 1, 1], [], []>} : vector<72x8xf32>, vector<8x1xf32>, vector<72x1xf32> -> vector<72x1xf32>
    %49 = arith.addf %48, %6 : vector<72x1xf32>
    %50 = arith.negf %49 : vector<72x1xf32>
    %51 = math.exp %50 : vector<72x1xf32>
    %cst_20 = arith.constant 1.000000e+00 : f32
    %52 = vector.broadcast %cst_20 : f32 to vector<72x1xf32>
    %53 = arith.addf %52, %51 : vector<72x1xf32>
    %54 = arith.divf %52, %53 : vector<72x1xf32>
    %55 = vector.broadcast %54 : vector<72x1xf32> to vector<72x9xf32>
    %56 = arith.mulf %4, %55 : vector<72x9xf32>
    %cst_21 = arith.constant dense<0.000000e+00> : vector<24x9xf32>
    %57 = tpu.matmul %3, %56, %cst_21 {dimension_numbers = #tpu.dot_dimension_numbers<[1], [0], [0], [1], [0, 0, 1, 1], [], []>} : vector<24x72xf32>, vector<72x9xf32>, vector<24x9xf32> -> vector<24x9xf32>
    %58 = vector.extract_strided_slice %57 {offsets = [8, 0], sizes = [8, 9], strides = [1, 1]} : vector<24x9xf32> to vector<8x9xf32>
    %59 = tpu.concatenate %22, %34, %46, %58 in 0 : vector<8x9xf32>, vector<8x9xf32>, vector<8x9xf32>, vector<8x9xf32> -> vector<32x9xf32>
    %60 = vector.extract_strided_slice %21 {offsets = [0, 0], sizes = [8, 8], strides = [1, 1]} : vector<24x9xf32> to vector<8x8xf32>
    %61 = vector.extract_strided_slice %1 {offsets = [0, 0], sizes = [8, 256], strides = [1, 1]} : vector<32x256xf32> to vector<8x256xf32>
    %cst_22 = arith.constant dense<0.000000e+00> : vector<8x256xf32>
    %62 = tpu.matmul %60, %61, %cst_22 {dimension_numbers = #tpu.dot_dimension_numbers<[1], [0], [0], [1], [0, 0, 1, 1], [], []>} : vector<8x8xf32>, vector<8x256xf32>, vector<8x256xf32> -> vector<8x256xf32>
    %63 = vector.extract_strided_slice %33 {offsets = [0, 0], sizes = [8, 8], strides = [1, 1]} : vector<24x9xf32> to vector<8x8xf32>
    %64 = vector.extract_strided_slice %1 {offsets = [8, 0], sizes = [8, 256], strides = [1, 1]} : vector<32x256xf32> to vector<8x256xf32>
    %cst_23 = arith.constant dense<0.000000e+00> : vector<8x256xf32>
    %65 = tpu.matmul %63, %64, %cst_23 {dimension_numbers = #tpu.dot_dimension_numbers<[1], [0], [0], [1], [0, 0, 1, 1], [], []>} : vector<8x8xf32>, vector<8x256xf32>, vector<8x256xf32> -> vector<8x256xf32>
    %66 = vector.extract_strided_slice %45 {offsets = [0, 0], sizes = [8, 8], strides = [1, 1]} : vector<24x9xf32> to vector<8x8xf32>
    %67 = vector.extract_strided_slice %1 {offsets = [16, 0], sizes = [8, 256], strides = [1, 1]} : vector<32x256xf32> to vector<8x256xf32>
    %cst_24 = arith.constant dense<0.000000e+00> : vector<8x256xf32>
    %68 = tpu.matmul %66, %67, %cst_24 {dimension_numbers = #tpu.dot_dimension_numbers<[1], [0], [0], [1], [0, 0, 1, 1], [], []>} : vector<8x8xf32>, vector<8x256xf32>, vector<8x256xf32> -> vector<8x256xf32>
    %69 = vector.extract_strided_slice %57 {offsets = [0, 0], sizes = [8, 8], strides = [1, 1]} : vector<24x9xf32> to vector<8x8xf32>
    %70 = vector.extract_strided_slice %1 {offsets = [24, 0], sizes = [8, 256], strides = [1, 1]} : vector<32x256xf32> to vector<8x256xf32>
    %cst_25 = arith.constant dense<0.000000e+00> : vector<8x256xf32>
    %71 = tpu.matmul %69, %70, %cst_25 {dimension_numbers = #tpu.dot_dimension_numbers<[1], [0], [0], [1], [0, 0, 1, 1], [], []>} : vector<8x8xf32>, vector<8x256xf32>, vector<8x256xf32> -> vector<8x256xf32>
    %72 = tpu.concatenate %62, %65, %68, %71 in 0 : vector<8x256xf32>, vector<8x256xf32>, vector<8x256xf32>, vector<8x256xf32> -> vector<32x256xf32>
    %c0_26 = arith.constant 0 : index
    %c0_27 = arith.constant 0 : index
    %73 = vector.load %arg6[%c0_26, %c0_27] : memref<32x1xf32, #tpu.memory_space<vmem>>, vector<32x1xf32>
    %74 = vector.broadcast %73 : vector<32x1xf32> to vector<32x256xf32>
    %75 = arith.mulf %72, %74 : vector<32x256xf32>
    %c0_28 = arith.constant 0 : index
    %c0_29 = arith.constant 0 : index
    %76 = vector.load %arg7[%c0_28, %c0_29] : memref<32x1xf32, #tpu.memory_space<vmem>>, vector<32x1xf32>
    %77 = vector.broadcast %76 : vector<32x1xf32> to vector<32x256xf32>
    %78 = arith.addf %75, %77 : vector<32x256xf32>
    %cst_30 = arith.constant 0.000000e+00 : f32
    %79 = vector.broadcast %cst_30 : f32 to vector<32x256xf32>
    %80 = arith.maximumf %78, %79 : vector<32x256xf32>
    %81 = tpu.iota {dimensions = array<i32: 1>} : vector<1x256xi32>
    %82 = arith.sitofp %81 : vector<1x256xi32> to vector<1x256xf32>
    %cst_31 = arith.constant 5.000000e-01 : f32
    %83 = vector.broadcast %cst_31 : f32 to vector<1x256xf32>
    %84 = arith.addf %82, %83 : vector<1x256xf32>
    %cst_32 = arith.constant 6.250000e-02 : f32
    %85 = vector.broadcast %cst_32 : f32 to vector<1x256xf32>
    %86 = arith.mulf %84, %85 : vector<1x256xf32>
    %87 = math.floor %86 : vector<1x256xf32>
    %cst_33 = arith.constant 1.600000e+01 : f32
    %88 = vector.broadcast %cst_33 : f32 to vector<1x256xf32>
    %89 = arith.mulf %87, %88 : vector<1x256xf32>
    %90 = arith.subf %82, %89 : vector<1x256xf32>
    %91 = vector.extract_strided_slice %59 {offsets = [0, 4], sizes = [32, 1], strides = [1, 1]} : vector<32x9xf32> to vector<32x1xf32>
    %92 = vector.broadcast %91 : vector<32x1xf32> to vector<32x256xf32>
    %93 = arith.mulf %92, %80 : vector<32x256xf32>
    %c17_i32 = arith.constant 17 : i32
    %94 = tpu.dynamic_rotate %80 by %c17_i32 dim 1 : vector<32x256xf32>, i32 -> vector<32x256xf32>
    %cst_34 = arith.constant 1.000000e+00 : f32
    %95 = vector.broadcast %cst_34 : f32 to vector<1x256xf32>
    %96 = arith.cmpf oge, %87, %95 : vector<1x256xf32>
    %cst_35 = arith.constant 1.000000e+00 : f32
    %97 = vector.broadcast %cst_35 : f32 to vector<1x256xf32>
    %98 = arith.cmpf oge, %90, %97 : vector<1x256xf32>
    %99 = arith.andi %96, %98 : vector<1x256xi1>
    %100 = arith.extui %99 : vector<1x256xi1> to vector<1x256xi32>
    %101 = arith.sitofp %100 : vector<1x256xi32> to vector<1x256xf32>
    %102 = vector.extract_strided_slice %59 {offsets = [0, 0], sizes = [32, 1], strides = [1, 1]} : vector<32x9xf32> to vector<32x1xf32>
    %103 = vector.broadcast %101 : vector<1x256xf32> to vector<32x256xf32>
    %104 = arith.mulf %94, %103 : vector<32x256xf32>
    %105 = vector.broadcast %102 : vector<32x1xf32> to vector<32x256xf32>
    %106 = arith.mulf %105, %104 : vector<32x256xf32>
    %107 = arith.addf %93, %106 : vector<32x256xf32>
    %c16_i32 = arith.constant 16 : i32
    %108 = tpu.dynamic_rotate %80 by %c16_i32 dim 1 : vector<32x256xf32>, i32 -> vector<32x256xf32>
    %cst_36 = arith.constant 1.000000e+00 : f32
    %109 = vector.broadcast %cst_36 : f32 to vector<1x256xf32>
    %110 = arith.cmpf oge, %87, %109 : vector<1x256xf32>
    %111 = arith.extui %110 : vector<1x256xi1> to vector<1x256xi32>
    %112 = arith.sitofp %111 : vector<1x256xi32> to vector<1x256xf32>
    %113 = vector.extract_strided_slice %59 {offsets = [0, 1], sizes = [32, 1], strides = [1, 1]} : vector<32x9xf32> to vector<32x1xf32>
    %114 = vector.broadcast %112 : vector<1x256xf32> to vector<32x256xf32>
    %115 = arith.mulf %108, %114 : vector<32x256xf32>
    %116 = vector.broadcast %113 : vector<32x1xf32> to vector<32x256xf32>
    %117 = arith.mulf %116, %115 : vector<32x256xf32>
    %118 = arith.addf %107, %117 : vector<32x256xf32>
    %c15_i32 = arith.constant 15 : i32
    %119 = tpu.dynamic_rotate %80 by %c15_i32 dim 1 : vector<32x256xf32>, i32 -> vector<32x256xf32>
    %cst_37 = arith.constant 1.000000e+00 : f32
    %120 = vector.broadcast %cst_37 : f32 to vector<1x256xf32>
    %121 = arith.cmpf oge, %87, %120 : vector<1x256xf32>
    %cst_38 = arith.constant 1.500000e+01 : f32
    %122 = vector.broadcast %cst_38 : f32 to vector<1x256xf32>
    %123 = arith.cmpf olt, %90, %122 : vector<1x256xf32>
    %124 = arith.andi %121, %123 : vector<1x256xi1>
    %125 = arith.extui %124 : vector<1x256xi1> to vector<1x256xi32>
    %126 = arith.sitofp %125 : vector<1x256xi32> to vector<1x256xf32>
    %127 = vector.extract_strided_slice %59 {offsets = [0, 2], sizes = [32, 1], strides = [1, 1]} : vector<32x9xf32> to vector<32x1xf32>
    %128 = vector.broadcast %126 : vector<1x256xf32> to vector<32x256xf32>
    %129 = arith.mulf %119, %128 : vector<32x256xf32>
    %130 = vector.broadcast %127 : vector<32x1xf32> to vector<32x256xf32>
    %131 = arith.mulf %130, %129 : vector<32x256xf32>
    %132 = arith.addf %118, %131 : vector<32x256xf32>
    %c1_i32 = arith.constant 1 : i32
    %133 = tpu.dynamic_rotate %80 by %c1_i32 dim 1 : vector<32x256xf32>, i32 -> vector<32x256xf32>
    %cst_39 = arith.constant 1.000000e+00 : f32
    %134 = vector.broadcast %cst_39 : f32 to vector<1x256xf32>
    %135 = arith.cmpf oge, %90, %134 : vector<1x256xf32>
    %136 = arith.extui %135 : vector<1x256xi1> to vector<1x256xi32>
    %137 = arith.sitofp %136 : vector<1x256xi32> to vector<1x256xf32>
    %138 = vector.extract_strided_slice %59 {offsets = [0, 3], sizes = [32, 1], strides = [1, 1]} : vector<32x9xf32> to vector<32x1xf32>
    %139 = vector.broadcast %137 : vector<1x256xf32> to vector<32x256xf32>
    %140 = arith.mulf %133, %139 : vector<32x256xf32>
    %141 = vector.broadcast %138 : vector<32x1xf32> to vector<32x256xf32>
    %142 = arith.mulf %141, %140 : vector<32x256xf32>
    %143 = arith.addf %132, %142 : vector<32x256xf32>
    %c255_i32 = arith.constant 255 : i32
    %144 = tpu.dynamic_rotate %80 by %c255_i32 dim 1 : vector<32x256xf32>, i32 -> vector<32x256xf32>
    %cst_40 = arith.constant 1.500000e+01 : f32
    %145 = vector.broadcast %cst_40 : f32 to vector<1x256xf32>
    %146 = arith.cmpf olt, %90, %145 : vector<1x256xf32>
    %147 = arith.extui %146 : vector<1x256xi1> to vector<1x256xi32>
    %148 = arith.sitofp %147 : vector<1x256xi32> to vector<1x256xf32>
    %149 = vector.extract_strided_slice %59 {offsets = [0, 5], sizes = [32, 1], strides = [1, 1]} : vector<32x9xf32> to vector<32x1xf32>
    %150 = vector.broadcast %148 : vector<1x256xf32> to vector<32x256xf32>
    %151 = arith.mulf %144, %150 : vector<32x256xf32>
    %152 = vector.broadcast %149 : vector<32x1xf32> to vector<32x256xf32>
    %153 = arith.mulf %152, %151 : vector<32x256xf32>
    %154 = arith.addf %143, %153 : vector<32x256xf32>
    %c241_i32 = arith.constant 241 : i32
    %155 = tpu.dynamic_rotate %80 by %c241_i32 dim 1 : vector<32x256xf32>, i32 -> vector<32x256xf32>
    %cst_41 = arith.constant 1.500000e+01 : f32
    %156 = vector.broadcast %cst_41 : f32 to vector<1x256xf32>
    %157 = arith.cmpf olt, %87, %156 : vector<1x256xf32>
    %cst_42 = arith.constant 1.000000e+00 : f32
    %158 = vector.broadcast %cst_42 : f32 to vector<1x256xf32>
    %159 = arith.cmpf oge, %90, %158 : vector<1x256xf32>
    %160 = arith.andi %157, %159 : vector<1x256xi1>
    %161 = arith.extui %160 : vector<1x256xi1> to vector<1x256xi32>
    %162 = arith.sitofp %161 : vector<1x256xi32> to vector<1x256xf32>
    %163 = vector.extract_strided_slice %59 {offsets = [0, 6], sizes = [32, 1], strides = [1, 1]} : vector<32x9xf32> to vector<32x1xf32>
    %164 = vector.broadcast %162 : vector<1x256xf32> to vector<32x256xf32>
    %165 = arith.mulf %155, %164 : vector<32x256xf32>
    %166 = vector.broadcast %163 : vector<32x1xf32> to vector<32x256xf32>
    %167 = arith.mulf %166, %165 : vector<32x256xf32>
    %168 = arith.addf %154, %167 : vector<32x256xf32>
    %c240_i32 = arith.constant 240 : i32
    %169 = tpu.dynamic_rotate %80 by %c240_i32 dim 1 : vector<32x256xf32>, i32 -> vector<32x256xf32>
    %cst_43 = arith.constant 1.500000e+01 : f32
    %170 = vector.broadcast %cst_43 : f32 to vector<1x256xf32>
    %171 = arith.cmpf olt, %87, %170 : vector<1x256xf32>
    %172 = arith.extui %171 : vector<1x256xi1> to vector<1x256xi32>
    %173 = arith.sitofp %172 : vector<1x256xi32> to vector<1x256xf32>
    %174 = vector.extract_strided_slice %59 {offsets = [0, 7], sizes = [32, 1], strides = [1, 1]} : vector<32x9xf32> to vector<32x1xf32>
    %175 = vector.broadcast %173 : vector<1x256xf32> to vector<32x256xf32>
    %176 = arith.mulf %169, %175 : vector<32x256xf32>
    %177 = vector.broadcast %174 : vector<32x1xf32> to vector<32x256xf32>
    %178 = arith.mulf %177, %176 : vector<32x256xf32>
    %179 = arith.addf %168, %178 : vector<32x256xf32>
    %c239_i32 = arith.constant 239 : i32
    %180 = tpu.dynamic_rotate %80 by %c239_i32 dim 1 : vector<32x256xf32>, i32 -> vector<32x256xf32>
    %cst_44 = arith.constant 1.500000e+01 : f32
    %181 = vector.broadcast %cst_44 : f32 to vector<1x256xf32>
    %182 = arith.cmpf olt, %87, %181 : vector<1x256xf32>
    %cst_45 = arith.constant 1.500000e+01 : f32
    %183 = vector.broadcast %cst_45 : f32 to vector<1x256xf32>
    %184 = arith.cmpf olt, %90, %183 : vector<1x256xf32>
    %185 = arith.andi %182, %184 : vector<1x256xi1>
    %186 = arith.extui %185 : vector<1x256xi1> to vector<1x256xi32>
    %187 = arith.sitofp %186 : vector<1x256xi32> to vector<1x256xf32>
    %188 = vector.extract_strided_slice %59 {offsets = [0, 8], sizes = [32, 1], strides = [1, 1]} : vector<32x9xf32> to vector<32x1xf32>
    %189 = vector.broadcast %187 : vector<1x256xf32> to vector<32x256xf32>
    %190 = arith.mulf %180, %189 : vector<32x256xf32>
    %191 = vector.broadcast %188 : vector<32x1xf32> to vector<32x256xf32>
    %192 = arith.mulf %191, %190 : vector<32x256xf32>
    %193 = arith.addf %179, %192 : vector<32x256xf32>
    %c0_46 = arith.constant 0 : index
    %c0_47 = arith.constant 0 : index
    %194 = vector.load %arg8[%c0_46, %c0_47] : memref<32x1xf32, #tpu.memory_space<vmem>>, vector<32x1xf32>
    %195 = vector.broadcast %194 : vector<32x1xf32> to vector<32x256xf32>
    %196 = arith.mulf %193, %195 : vector<32x256xf32>
    %c0_48 = arith.constant 0 : index
    %c0_49 = arith.constant 0 : index
    %197 = vector.load %arg9[%c0_48, %c0_49] : memref<32x1xf32, #tpu.memory_space<vmem>>, vector<32x1xf32>
    %198 = vector.broadcast %197 : vector<32x1xf32> to vector<32x256xf32>
    %199 = arith.addf %196, %198 : vector<32x256xf32>
    %cst_50 = arith.constant 0.000000e+00 : f32
    %200 = vector.broadcast %cst_50 : f32 to vector<32x256xf32>
    %201 = arith.maximumf %199, %200 : vector<32x256xf32>
    %202 = vector.extract_strided_slice %21 {offsets = [16, 0], sizes = [8, 8], strides = [1, 1]} : vector<24x9xf32> to vector<8x8xf32>
    %203 = vector.extract_strided_slice %201 {offsets = [0, 0], sizes = [8, 256], strides = [1, 1]} : vector<32x256xf32> to vector<8x256xf32>
    %cst_51 = arith.constant dense<0.000000e+00> : vector<8x256xf32>
    %204 = tpu.matmul %202, %203, %cst_51 {dimension_numbers = #tpu.dot_dimension_numbers<[1], [0], [0], [1], [0, 0, 1, 1], [], []>} : vector<8x8xf32>, vector<8x256xf32>, vector<8x256xf32> -> vector<8x256xf32>
    %205 = vector.extract_strided_slice %33 {offsets = [16, 0], sizes = [8, 8], strides = [1, 1]} : vector<24x9xf32> to vector<8x8xf32>
    %206 = vector.extract_strided_slice %201 {offsets = [8, 0], sizes = [8, 256], strides = [1, 1]} : vector<32x256xf32> to vector<8x256xf32>
    %cst_52 = arith.constant dense<0.000000e+00> : vector<8x256xf32>
    %207 = tpu.matmul %205, %206, %cst_52 {dimension_numbers = #tpu.dot_dimension_numbers<[1], [0], [0], [1], [0, 0, 1, 1], [], []>} : vector<8x8xf32>, vector<8x256xf32>, vector<8x256xf32> -> vector<8x256xf32>
    %208 = vector.extract_strided_slice %45 {offsets = [16, 0], sizes = [8, 8], strides = [1, 1]} : vector<24x9xf32> to vector<8x8xf32>
    %209 = vector.extract_strided_slice %201 {offsets = [16, 0], sizes = [8, 256], strides = [1, 1]} : vector<32x256xf32> to vector<8x256xf32>
    %cst_53 = arith.constant dense<0.000000e+00> : vector<8x256xf32>
    %210 = tpu.matmul %208, %209, %cst_53 {dimension_numbers = #tpu.dot_dimension_numbers<[1], [0], [0], [1], [0, 0, 1, 1], [], []>} : vector<8x8xf32>, vector<8x256xf32>, vector<8x256xf32> -> vector<8x256xf32>
    %211 = vector.extract_strided_slice %57 {offsets = [16, 0], sizes = [8, 8], strides = [1, 1]} : vector<24x9xf32> to vector<8x8xf32>
    %212 = vector.extract_strided_slice %201 {offsets = [24, 0], sizes = [8, 256], strides = [1, 1]} : vector<32x256xf32> to vector<8x256xf32>
    %cst_54 = arith.constant dense<0.000000e+00> : vector<8x256xf32>
    %213 = tpu.matmul %211, %212, %cst_54 {dimension_numbers = #tpu.dot_dimension_numbers<[1], [0], [0], [1], [0, 0, 1, 1], [], []>} : vector<8x8xf32>, vector<8x256xf32>, vector<8x256xf32> -> vector<8x256xf32>
    %214 = tpu.concatenate %204, %207, %210, %213 in 0 : vector<8x256xf32>, vector<8x256xf32>, vector<8x256xf32>, vector<8x256xf32> -> vector<32x256xf32>
    %c0_55 = arith.constant 0 : index
    %c0_56 = arith.constant 0 : index
    %215 = vector.load %arg10[%c0_55, %c0_56] : memref<32x1xf32, #tpu.memory_space<vmem>>, vector<32x1xf32>
    %216 = vector.broadcast %215 : vector<32x1xf32> to vector<32x256xf32>
    %217 = arith.mulf %214, %216 : vector<32x256xf32>
    %c0_57 = arith.constant 0 : index
    %c0_58 = arith.constant 0 : index
    %218 = vector.load %arg11[%c0_57, %c0_58] : memref<32x1xf32, #tpu.memory_space<vmem>>, vector<32x1xf32>
    %219 = vector.broadcast %218 : vector<32x1xf32> to vector<32x256xf32>
    %220 = arith.addf %217, %219 : vector<32x256xf32>
    %221 = arith.addf %220, %1 : vector<32x256xf32>
    %222 = arith.truncf %221 : vector<32x256xf32> to vector<32x256xbf16>
    %c0_59 = arith.constant 0 : index
    %c0_60 = arith.constant 0 : index
    %223 = vector.load %arg12[%c0_59, %c0_60] : memref<32x256xbf16, #tpu.memory_space<vmem>>, vector<32x256xbf16>
    tpu.vector_store %arg12[%c0_59, %c0_60], %222 {strides = array<i32>} : memref<32x256xbf16, #tpu.memory_space<vmem>>, vector<32x256xbf16>,
    return
  }
  func.func @transform_0(%arg0: i32) -> (i32, i32) {
    %c0_i32 = arith.constant 0 : i32
    %c0_i32_0 = arith.constant 0 : i32
    return %arg0, %c0_i32 : i32, i32
  }
  func.func @transform_1(%arg0: i32) -> (i32, i32) {
    %c0_i32 = arith.constant 0 : i32
    %c0_i32_0 = arith.constant 0 : i32
    %c0_i32_1 = arith.constant 0 : i32
    return %c0_i32, %c0_i32_0 : i32, i32
  }
  func.func @transform_2(%arg0: i32) -> (i32, i32) {
    %c0_i32 = arith.constant 0 : i32
    %c0_i32_0 = arith.constant 0 : i32
    %c0_i32_1 = arith.constant 0 : i32
    return %c0_i32, %c0_i32_0 : i32, i32
  }
  func.func @transform_3(%arg0: i32) -> (i32, i32) {
    %c0_i32 = arith.constant 0 : i32
    %c0_i32_0 = arith.constant 0 : i32
    %c0_i32_1 = arith.constant 0 : i32
    return %c0_i32, %c0_i32_0 : i32, i32
  }
  func.func @transform_4(%arg0: i32) -> (i32, i32) {
    %c0_i32 = arith.constant 0 : i32
    %c0_i32_0 = arith.constant 0 : i32
    %c0_i32_1 = arith.constant 0 : i32
    return %c0_i32, %c0_i32_0 : i32, i32
  }
  func.func @transform_5(%arg0: i32) -> (i32, i32) {
    %c0_i32 = arith.constant 0 : i32
    %c0_i32_0 = arith.constant 0 : i32
    %c0_i32_1 = arith.constant 0 : i32
    return %c0_i32, %c0_i32_0 : i32, i32
  }
  func.func @transform_6(%arg0: i32) -> (i32, i32) {
    %c0_i32 = arith.constant 0 : i32
    %c0_i32_0 = arith.constant 0 : i32
    %c0_i32_1 = arith.constant 0 : i32
    return %c0_i32, %c0_i32_0 : i32, i32
  }
  func.func @transform_7(%arg0: i32) -> (i32, i32) {
    %c0_i32 = arith.constant 0 : i32
    %c0_i32_0 = arith.constant 0 : i32
    %c0_i32_1 = arith.constant 0 : i32
    return %c0_i32, %c0_i32_0 : i32, i32
  }
  func.func @transform_8(%arg0: i32) -> (i32, i32) {
    %c0_i32 = arith.constant 0 : i32
    %c0_i32_0 = arith.constant 0 : i32
    %c0_i32_1 = arith.constant 0 : i32
    return %c0_i32, %c0_i32_0 : i32, i32
  }
  func.func @transform_9(%arg0: i32) -> (i32, i32) {
    %c0_i32 = arith.constant 0 : i32
    %c0_i32_0 = arith.constant 0 : i32
    %c0_i32_1 = arith.constant 0 : i32
    return %c0_i32, %c0_i32_0 : i32, i32
  }
  func.func @transform_10(%arg0: i32) -> (i32, i32) {
    %c0_i32 = arith.constant 0 : i32
    %c0_i32_0 = arith.constant 0 : i32
    %c0_i32_1 = arith.constant 0 : i32
    return %c0_i32, %c0_i32_0 : i32, i32
  }
  func.func @transform_11(%arg0: i32) -> (i32, i32) {
    %c0_i32 = arith.constant 0 : i32
    %c0_i32_0 = arith.constant 0 : i32
    return %arg0, %c0_i32 : i32, i32
  }
}

</mosaic_0001>

<bundles_post_ra>
// kernel: tile.33
= control target key start
LH: loop header
LB: loop body
LE: loop exit
PB: predicated region body
PF: predicated region fallthrough
CT: control target
= control target key end

     0   :  { %vm4_vm0 = vcmask 1047556   ;;  %s169_s14 = smov 54   ;;  %s170_s15 = smov 63   ;;  %vm6_vm1 = vcmask 72704   ;;  %vm21_vm2 = vcmask 589304   ;;  %vm38_vm3 = vcmask 515504   ;;  %s314_s0 = inlined_call_operand.vmem [shape: f32[8,9,9], index: 0, kind: input, shape index: {}]   ;;  %s315_s1 = inlined_call_operand.vmem [shape: f32[72,9], index: 1, kind: output, shape index: {}]  }
   0x1   :  { %v138_v0 = vld [vmem:[%s314_s0 + $0x6] ss:$8 sm:$0xf]   ;;  %v134_v3 = vld [vmem:[%s314_s0 + $0x7] ss:$8 sm:$0xf]  }
   0x2   :  { %v139_v1 = vld [vmem:[%s314_s0 + $0x6] ss:$8 sm:$0xf0]   ;;  %v135_v4 = vld [vmem:[%s314_s0 + $0x7] ss:$8 sm:$0xf0]  }
   0x3   :  { %v35_v2 = vsel %vm4_vm0, %v139_v1, %v138_v0  ;;  %v18_v5 = vsel %vm4_vm0, %v135_v4, %v134_v3  ;;  %v140_v6 = vld [vmem:[%s314_s0 + $0x46] sm:$0x1]   ;;  %v136_v7 = vld [vmem:[%s314_s0 + $0x47] sm:$0x1]   ;;  %v144_v10 = vld [vmem:[%s314_s0 + $0x45] sm:$0x1]  }
   0x4   :  { %36 = vrot.lane.b32.xlu1 %v35_v2, %s169_s14  ;;  %19 = vrot.lane.b32.xlu0 %v18_v5, %s170_s15  ;;  %v142_v8 = vld [vmem:[%s314_s0 + $0x5] ss:$8 sm:$0xf]   ;;  %v146_v12 = vld [vmem:[%s314_s0 + $0x4] ss:$8 sm:$0xf]  }
   0x5   :  { %v143_v9 = vld [vmem:[%s314_s0 + $0x5] ss:$8 sm:$0xf0]   ;;  %v147_v13 = vld [vmem:[%s314_s0 + $0x4] ss:$8 sm:$0xf0]  }
   0x6   :  { %v52_v11 = vsel %vm4_vm0, %v143_v9, %v142_v8  ;;  %s171_s30 = smov 45   ;;  %v148_v14 = vld [vmem:[%s314_s0 + $0x44] sm:$0x1]   ;;  %v2_v15 = vld [vmem:[%s314_s0] ss:$8 sm:$0xf]   ;;  %v69_v18 = vsel %vm4_vm0, %v147_v13, %v146_v12 }
   0x7   :  { %v3_v16 = vld [vmem:[%s314_s0] ss:$8 sm:$0xf0]   ;;  %v150_v20 = vld [vmem:[%s314_s0 + $0x3] ss:$8 sm:$0xf]  }
   0x8   :  { %42 = vrot.lane.b32.xlu1 %v140_v6, %s169_s14  ;;  %25 = vrot.lane.b32.xlu0 %v136_v7, %s170_s15  ;;  %v132_v17 = vld [vmem:[%s314_s0 + $0x40] sm:$0x1]   ;;  %v5_v19 = vsel %vm4_vm0, %v3_v16, %v2_v15  ;;  %v151_v21 = vld [vmem:[%s314_s0 + $0x3] ss:$8 sm:$0xf0]   ;;  %s172_s18 = smov 36  }
   0x9   :  { %133 = vst.msk [vmem:[%s315_s1 + $0x8] sm:$0x1] %vm6_vm1, %v132_v17   ;;  %7 = vst.msk [vmem:[%s315_s1] sm:$0xff] %vm6_vm1, %v5_v19   ;;  %v152_v22 = vld [vmem:[%s314_s0 + $0x43] sm:$0x1]   ;;  %v86_v23 = vsel %vm4_vm0, %v151_v21, %v150_v20  ;;  %s173_s25 = smov 27  }
   0xa   :  { %v154_v24 = vld [vmem:[%s314_s0 + $0x2] ss:$8 sm:$0xf]   ;;  %v158_v28 = vld [vmem:[%s314_s0 + $0x1] ss:$8 sm:$0xf]  }
   0xb   :  { %v155_v25 = vld [vmem:[%s314_s0 + $0x2] ss:$8 sm:$0xf0]   ;;  %v159_v29 = vld [vmem:[%s314_s0 + $0x1] ss:$8 sm:$0xf0]  }
   0xc   :  { %59 = vrot.lane.b32.xlu1 %v144_v10, %s171_s30  ;;  %53 = vrot.lane.b32.xlu0 %v52_v11, %s171_s30  ;;  %v156_v26 = vld [vmem:[%s314_s0 + $0x42] sm:$0x1]   ;;  %v103_v27 = vsel %vm4_vm0, %v155_v25, %v154_v24  ;;  %s174_s3 = smov 18   ;;  %v160_v30 = vld [vmem:[%s314_s0 + $0x41] sm:$0x1]   ;;  %v120_v31 = vsel %vm4_vm0, %v159_v29, %v158_v28  ;;  %s175_s0 = smov 9  }
   0xd   :  { %vm55_vm4 = vcmask 441704   ;;  %vm72_vm5 = vcmask 367904   ;;  %vm89_vm6 = vcmask 294104   ;;  %vm106_vm7 = vcmask 220304  }
   0xe   :  { %vm123_vm8 = vcmask 146504  }
  0x10   :  { %76 = vrot.lane.b32.xlu1 %v148_v14, %s172_s18  ;;  %70 = vrot.lane.b32.xlu0 %v69_v18, %s172_s18 }
  0x14   :  { %93 = vrot.lane.b32.xlu1 %v152_v22, %s173_s25  ;;  %87 = vrot.lane.b32.xlu0 %v86_v23, %s173_s25 }
  0x18   :  { %110 = vrot.lane.b32.xlu1 %v156_v26, %s174_s3  ;;  %104 = vrot.lane.b32.xlu0 %v103_v27, %s174_s3 }
  0x1c   :  { %127 = vrot.lane.b32.xlu1 %v160_v30, %s175_s0  ;;  %121 = vrot.lane.b32.xlu0 %v120_v31, %s175_s0 }
  0x76   :  { %v37_v32 = vpop.permute.xlu1 %36   ;;  %v20_v33 = vpop.permute.xlu0 %19  }
  0x77   :  { %22 = vst.msk [vmem:[%s315_s1] sm:$0xff] %vm21_vm2, %v20_v33  }
  0x78   :  { %39 = vst.msk [vmem:[%s315_s1] sm:$0xff] %vm38_vm3, %v37_v32  }
  0x7a   :  { %v43_v34 = vpop.permute.xlu1 %42   ;;  %v26_v35 = vpop.permute.xlu0 %25  }
  0x7b   :  { %137 = vst.msk [vmem:[%s315_s1 + $0x8] sm:$0x1] %vm21_vm2, %v26_v35  }
  0x7c   :  { %141 = vst.msk [vmem:[%s315_s1 + $0x8] sm:$0x1] %vm38_vm3, %v43_v34  }
  0x7e   :  { %v60_v36 = vpop.permute.xlu1 %59   ;;  %v54_v37 = vpop.permute.xlu0 %53  }
  0x7f   :  { %145 = vst.msk [vmem:[%s315_s1 + $0x8] sm:$0x1] %vm55_vm4, %v60_v36   ;;  %56 = vst.msk [vmem:[%s315_s1] sm:$0xff] %vm55_vm4, %v54_v37  }
  0x82   :  { %v77_v38 = vpop.permute.xlu1 %76   ;;  %v71_v39 = vpop.permute.xlu0 %70  }
  0x83   :  { %149 = vst.msk [vmem:[%s315_s1 + $0x8] sm:$0x1] %vm72_vm5, %v77_v38   ;;  %73 = vst.msk [vmem:[%s315_s1] sm:$0xff] %vm72_vm5, %v71_v39  }
  0x86   :  { %v94_v40 = vpop.permute.xlu1 %93   ;;  %v88_v41 = vpop.permute.xlu0 %87  }
  0x87   :  { %153 = vst.msk [vmem:[%s315_s1 + $0x8] sm:$0x1] %vm89_vm6, %v94_v40   ;;  %90 = vst.msk [vmem:[%s315_s1] sm:$0xff] %vm89_vm6, %v88_v41  }
  0x8a   :  { %v111_v42 = vpop.permute.xlu1 %110   ;;  %v105_v43 = vpop.permute.xlu0 %104  }
  0x8b   :  { %157 = vst.msk [vmem:[%s315_s1 + $0x8] sm:$0x1] %vm106_vm7, %v111_v42   ;;  %107 = vst.msk [vmem:[%s315_s1] sm:$0xff] %vm106_vm7, %v105_v43  }
  0x8e   :  { %v128_v44 = vpop.permute.xlu1 %127   ;;  %v122_v45 = vpop.permute.xlu0 %121  }
  0x8f   :  { %161 = vst.msk [vmem:[%s315_s1 + $0x8] sm:$0x1] %vm123_vm8, %v128_v44   ;;  %124 = vst.msk [vmem:[%s315_s1] sm:$0xff] %vm123_vm8, %v122_v45  }

// kernel: condconv_residual_pallas.1
= control target key start
LH: loop header
LB: loop body
LE: loop exit
PB: predicated region body
PF: predicated region fallthrough
CT: control target
= control target key end

     0   :  { %s3996_s17 = smov 0   ;;  %s5439_s0 = inlined_call_operand.vmem [shape: bf16[64,256], index: 0, kind: input, shape index: {}, may-alias: {0,11}]   ;;  %s5440_s1 = inlined_call_operand.vmem [shape: f32[72,8], index: 1, kind: input, shape index: {}]   ;;  %s5441_s2 = inlined_call_operand.vmem [shape: f32[72,1], index: 2, kind: input, shape index: {}]   ;;  %s5442_s3 = inlined_call_operand.vmem [shape: f32[72,9], index: 3, kind: input, shape index: {}]   ;;  %s5443_s4 = inlined_call_operand.vmem [shape: bf16[24,72], index: 4, kind: input, shape index: {}]   ;;  %s5444_s5 = inlined_call_operand.vmem [shape: f32[32,1], index: 5, kind: input, shape index: {}]   ;;  %s5445_s6 = inlined_call_operand.vmem [shape: f32[32,1], index: 6, kind: input, shape index: {}]   ;;  %s5446_s7 = inlined_call_operand.vmem [shape: f32[32,1], index: 7, kind: input, shape index: {}]   ;;  %s5447_s8 = inlined_call_operand.vmem [shape: f32[32,1], index: 8, kind: input, shape index: {}]   ;;  %s5448_s9 = inlined_call_operand.vmem [shape: f32[32,1], index: 9, kind: input, shape index: {}]   ;;  %s5449_s10 = inlined_call_operand.vmem [shape: f32[32,1], index: 10, kind: input, shape index: {}]   ;;  %s5450_s11 = inlined_call_operand.vmem [shape: bf16[64,256], index: 11, kind: output, shape index: {}, may-alias: {0,11}]  }
   0x1 LB: > { %s3192_s18 = sadd.s32 4294967295, %s3914_s17   ;;  %p3196_p0 = scmp.ge.s32.totalorder %s3914_s17, 1  ;;  %s3914_s17 = sphi %s3996_s17, %s21_s17  }
   0x2   : > { %p339_p1 = scmp.lt.s32.totalorder %s3914_s17, 3 }
   0x4   : > { %p340_p2 = pnand %p3196_p0, %p339_p1 }
   0x6   : > { %343 = sbr.rel (%p340_p2) target bundleno = 2766 (0xace), region = 64 }
   0xd   : > { %s3197_s19 = sshll.u32 %s3192_s18, 2  ;;  %v5451_v4 = vmov 0.0   ;;  %vm3917_vm0 = vmmov 0   ;;  %v4029_v7 = vld [vmem:[%s5440_s1] sm:$0xff]  ;;  %vm457_vm1 = vcmask 64512   ;;  %v4038_v8 = vld [vmem:[%s5440_s1 + $0x8] sm:$0xff] }
   0xe   : > { %p382_p3 = scmp.lt.s32.totalorder %s3197_s19, 7  ;;  %3415 = vmatprep.subr.mxu0 %v5451_v4  ;;  %3417 = vmatprep.mubr.msk.f32.mxu0 %vm3917_vm0, %v5451_v4  ;;  %v4047_v9 = vld [vmem:[%s5440_s1 + $0x10] sm:$0xff]  ;;  %v4056_v10 = vld [vmem:[%s5440_s1 + $0x18] sm:$0xff]  ;;  %v4065_v11 = vld [vmem:[%s5440_s1 + $0x20] sm:$0xff]  ;;  %v3918_v16 = vmov 0   ;;  %vm703_vm2 = vcmask 588800  }
   0xf   : > { %3462 = vmatprep.mubr.msk.f32.mxu1 %vm3917_vm0, %v5451_v4  ;;  %v4074_v12 = vld [vmem:[%s5440_s1 + $0x28] sm:$0xff]  ;;  %v4083_v13 = vld [vmem:[%s5440_s1 + $0x30] sm:$0xff]  ;;  %v4092_v14 = vld [vmem:[%s5440_s1 + $0x38] sm:$0xff]  ;;  %3715 = vset.pattern.permute.xlu0 %v3918_v16  ;;  %s3928_s25 = smov 17   ;;  %s3929_s26 = smov 16  }
  0x10   : > { %s5556_s19 = smov (!%p382_p3, %s3197_s19), 7  ;;  %v4101_v15 = vld [vmem:[%s5440_s1 + $0x40] sm:$0xff]  ;;  %3716 = vset.pattern.permute.xlu1 %v3918_v16  ;;  %v4118_v21 = vld [vmem:[%s5441_s2 + $0x8] sm:$0xff]  ;;  %v4124_v26 = vld [vmem:[%s5441_s2 + $0x10] sm:$0xff]  ;;  %s3930_s27 = smov 15  }
  0x11   : > { %s3317_s20 = sshll.u32 %s5556_s19, 3  ;;  %v4112_v17 = vld [vmem:[%s5441_s2] sm:$0xff]  ;;  %v4130_v31 = vld [vmem:[%s5441_s2 + $0x18] sm:$0xff]  ;;  %v4142_v43 = vld [vmem:[%s5441_s2 + $0x28] sm:$0xff]  ;;  %s3931_s28 = smov 1  }
  0x12   : > { %s4012_s23 = scalar_lea.vmem %s5439_s0, %s3317_s20  ;;  %v4136_v36 = vld [vmem:[%s5441_s2 + $0x20] sm:$0xff]  ;;  %v4148_v50 = vld [vmem:[%s5441_s2 + $0x30] sm:$0xff]  ;;  %v4154_v57 = vld [vmem:[%s5441_s2 + $0x38] sm:$0xff]  ;;  %s3932_s29 = smov 111  }
  0x13   : > { %v395_v0 = vld [vmem:[%s4012_s23] sm:$0xff]  ;;  %s3933_s30 = smov 127   ;;  %s3934_s12 = smov 113  }
  0x14   : > { %v4015_v1 = vunpack.c.l.bf16 %v395_v0  ;;  %v4017_v2 = vunpack.c.h.bf16 %v395_v0  ;;  %s3935_s13 = smov 112  }
  0x16   : > { %5484 = vst [vmem:[#allocation2_spill] sm:$0xff] %v4015_v1  ;;  %5485 = vst [vmem:[#allocation3_spill] sm:$0xff] %v4017_v2  ;;  %v440_v3 = vadd.f32 %v4017_v2, %v4015_v1 }
  0x18   : > { %441 = vadd.xlane.f32.xlu0 %v440_v3  ;;  %v4160_v3 = vld [vmem:[%s5441_s2 + $0x40] sm:$0xff] }
  0xa5   : > { %v442_v5 = vpop.xlane.xlu0 %441 }
  0xa6   : > { %v453_v6 = vmul.f32 0.00390625, %v442_v5 }
  0xa8   : > { %3416 = vmatpush3.msra.mxu0 %v453_v6 }
  0xa9   : > { %3418 = vmatmul.mubr.msk.f32.vlgmr.msra.gmra.mrb[0].mxu0 %vm457_vm1, %v4029_v7 }
  0xaa   : > { %3420 = vmatprep.mubr.msk.f32.mxu0 %vm3917_vm0, %v5451_v4 }
  0xad   : > { %3421 = vmatmul.mubr.msk.f32.gmra.mrb[2].mxu0 %vm457_vm1, %v4038_v8 }
  0xae   : > { %3423 = vmatprep.mubr.msk.f32.mxu0 %vm3917_vm0, %v5451_v4 }
  0xb1   : > { %3424 = vmatmul.mubr.msk.f32.gmra.mrb[4].mxu0 %vm457_vm1, %v4047_v9 }
  0xb2   : > { %3426 = vmatprep.mubr.msk.f32.mxu0 %vm3917_vm0, %v5451_v4 }
  0xb5   : > { %3427 = vmatmul.mubr.msk.f32.gmra.mrb[6].mxu0 %vm457_vm1, %v4056_v10 }
  0xb6   : > { %3429 = vmatprep.mubr.msk.f32.mxu0 %vm3917_vm0, %v5451_v4 }
  0xb9   : > { %3430 = vmatmul.mubr.msk.f32.gmra.mrb[8].mxu0 %vm457_vm1, %v4065_v11 }
  0xba   : > { %3432 = vmatprep.mubr.msk.f32.mxu0 %vm3917_vm0, %v5451_v4 }
  0xbd   : > { %3433 = vmatmul.mubr.msk.f32.gmra.mrb[10].mxu0 %vm457_vm1, %v4074_v12 }
  0xbe   : > { %3435 = vmatprep.mubr.msk.f32.mxu0 %vm3917_vm0, %v5451_v4 }
  0xc1   : > { %3436 = vmatmul.mubr.msk.f32.gmra.mrb[12].mxu0 %vm457_vm1, %v4083_v13 }
  0xc2   : > { %3438 = vmatprep.mubr.msk.f32.mxu0 %vm3917_vm0, %v5451_v4 }
  0xc5   : > { %3439 = vmatmul.mubr.msk.f32.gmra.mrb[14].mxu0 %vm457_vm1, %v4092_v14 }
  0xc6   : > { %3441 = vmatprep.mubr.msk.f32.mxu0 %vm3917_vm0, %v5451_v4 }
  0xc9   : > { %3442 = vmatmul.mubr.msk.f32.gmra.mrb[16].mxu0 %vm457_vm1, %v4101_v15 }
  0xca   : > { %3518 = vmatprep.mubr.msk.f32.mxu0 %vm3917_vm0, %v5451_v4 }
 0x17c   : > { %v551_v18 = vpop.f32.mrb[0].mxu0 }
 0x17d   : > { %v552_v19 = vadd.f32 %v551_v18, %v4112_v17  ;;  %v3419_v20 = vpop.f32.mrb[1].mxu0 }
 0x17f   : > { %v3212_v22 = vmul.f32 -1.442695, %v552_v19 }
 0x180   : > { %v556_v23 = vpop.f32.mrb[2].mxu0 }
 0x181   : > { %3751 = vpow2.f32 %v3212_v22  ;;  %v557_v24 = vadd.f32 %v556_v23, %v4118_v21  ;;  %v3422_v25 = vpop.f32.mrb[3].mxu0 }
 0x183   : > { %v3213_v27 = vmul.f32 -1.442695, %v557_v24  ;;  %v3919_v24 = vmov 0.0|0.0  }
 0x184   : > { %v561_v28 = vpop.f32.mrb[4].mxu0  ;;  %3639 = vmatprep.subr.bf16.mxu1 %v3919_v24  ;;  %3651 = vmatprep.subr.bf16.mxu0 %v3919_v24 }
 0x185   : > { %3753 = vpow2.f32 %v3213_v27  ;;  %v562_v29 = vadd.f32 %v561_v28, %v4124_v26  ;;  %v3425_v30 = vpop.f32.mrb[5].mxu0 }
 0x187   : > { %v3214_v32 = vmul.f32 -1.442695, %v562_v29 }
 0x188   : > { %v566_v33 = vpop.f32.mrb[6].mxu0 }
 0x189   : > { %3755 = vpow2.f32 %v3214_v32  ;;  %v567_v34 = vadd.f32 %v566_v33, %v4130_v31  ;;  %v3428_v35 = vpop.f32.mrb[7].mxu0 }
 0x18b   : > { %v3752_v37 = vpop.eup %3751  ;;  %v3215_v38 = vmul.f32 -1.442695, %v567_v34 }
 0x18c   : > { %v622_v39 = vadd.f32 1.0, %v3752_v37  ;;  %v571_v40 = vpop.f32.mrb[8].mxu0 }
 0x18d   : > { %3757 = vpow2.f32 %v3215_v38  ;;  %v572_v41 = vadd.f32 %v571_v40, %v4136_v36  ;;  %v3431_v42 = vpop.f32.mrb[9].mxu0 }
 0x18e   : > { %3759 = vrcp.f32 %v622_v39 }
 0x18f   : > { %v3754_v44 = vpop.eup %3753  ;;  %v3216_v45 = vmul.f32 -1.442695, %v572_v41 }
 0x190   : > { %v623_v46 = vadd.f32 1.0, %v3754_v44  ;;  %v576_v47 = vpop.f32.mrb[10].mxu0 }
 0x191   : > { %3761 = vpow2.f32 %v3216_v45  ;;  %v577_v48 = vadd.f32 %v576_v47, %v4142_v43  ;;  %v3434_v49 = vpop.f32.mrb[11].mxu0  ;;  %v396_v45 = vld [vmem:[%s4012_s23 + $0x8] sm:$0xff] }
 0x192   : > { %3763 = vrcp.f32 %v623_v46  ;;  %v4166_v46 = vunpack.c.l.bf16 %v396_v45  ;;  %v4168_v47 = vunpack.c.h.bf16 %v396_v45  ;;  %v4175_v49 = vld [vmem:[%s5442_s3] sm:$0xff] }
 0x193   : > { %v3756_v51 = vpop.eup %3755  ;;  %v3217_v52 = vmul.f32 -1.442695, %v577_v48 }
 0x194   : > { %v624_v53 = vadd.f32 1.0, %v3756_v51  ;;  %v581_v54 = vpop.f32.mrb[12].mxu0  ;;  %5486 = vst [vmem:[#allocation4_spill] sm:$0xff] %v4166_v46  ;;  %5487 = vst [vmem:[#allocation5_spill] sm:$0xff] %v4168_v47  ;;  %v443_v48 = vadd.f32 %v4168_v47, %v4166_v46 }
 0x195   : > { %3765 = vpow2.f32 %v3217_v52  ;;  %v582_v55 = vadd.f32 %v581_v54, %v4148_v50  ;;  %v3437_v56 = vpop.f32.mrb[13].mxu0  ;;  %v4180_v52 = vld [vmem:[%s5442_s3 + $0x8] sm:$0xff] }
 0x196   : > { %3767 = vrcp.f32 %v624_v53 }
 0x197   : > { %v3758_v58 = vpop.eup %3757  ;;  %v3218_v59 = vmul.f32 -1.442695, %v582_v55 }
 0x198   : > { %v3760_v60 = vpop.eup %3759  ;;  %v625_v61 = vadd.f32 1.0, %v3758_v58  ;;  %v586_v62 = vpop.f32.mrb[14].mxu0 }
 0x199   : > { %3769 = vpow2.f32 %v3218_v59  ;;  %v587_v63 = vadd.f32 %v586_v62, %v4154_v57  ;;  %651 = vperm.xlu0 %3715, %v3760_v60   ;;  %v3440_v0 = vpop.f32.mrb[15].mxu0  ;;  %v4187_v59 = vld [vmem:[%s5442_s3 + $0x10] sm:$0xff]  ;;  %v4192_v60 = vld [vmem:[%s5442_s3 + $0x18] sm:$0xff] }
 0x19a   : > { %3771 = vrcp.f32 %v625_v61 }
 0x19b   : > { %v3762_v5 = vpop.eup %3761  ;;  %v3219_v6 = vmul.f32 -1.442695, %v587_v63 }
 0x19c   : > { %v3764_v18 = vpop.eup %3763  ;;  %v626_v19 = vadd.f32 1.0, %v3762_v5  ;;  %v591_v20 = vpop.f32.mrb[16].mxu0 }
 0x19d   : > { %3773 = vpow2.f32 %v3219_v6  ;;  %v592_v22 = vadd.f32 %v591_v20, %v4160_v3  ;;  %656 = vperm.xlu1 %3716, %v3764_v18   ;;  %v3443_v23 = vpop.f32.mrb[17].mxu0  ;;  %v4200_v6 = vld [vmem:[%s5442_s3 + $0x20] sm:$0xff]  ;;  %v4205_v18 = vld [vmem:[%s5442_s3 + $0x28] sm:$0xff] }
 0x19e   : > { %3775 = vrcp.f32 %v626_v19 }
 0x19f   : > { %v3766_v25 = vpop.eup %3765  ;;  %v3220_v27 = vmul.f32 -1.442695, %v592_v22 }
 0x1a0   : > { %v3768_v28 = vpop.eup %3767  ;;  %v627_v29 = vadd.f32 1.0, %v3766_v25 }
 0x1a1   : > { %3777 = vpow2.f32 %v3220_v27  ;;  %661 = vperm.xlu1 %3716, %v3768_v28   ;;  %v4213_v27 = vld [vmem:[%s5442_s3 + $0x30] sm:$0xff]  ;;  %v4218_v28 = vld [vmem:[%s5442_s3 + $0x38] sm:$0xff] }
 0x1a2   : > { %3779 = vrcp.f32 %v627_v29 }
 0x1a3   : > { %v3770_v30 = vpop.eup %3769 }
 0x1a4   : > { %v3772_v32 = vpop.eup %3771  ;;  %v628_v33 = vadd.f32 1.0, %v3770_v30 }
 0x1a5   : > { %666 = vperm.xlu1 %3716, %v3772_v32  }
 0x1a6   : > { %3781 = vrcp.f32 %v628_v33 }
 0x1a7   : > { %v3774_v34 = vpop.eup %3773 }
 0x1a8   : > { %v3776_v35 = vpop.eup %3775  ;;  %v629_v37 = vadd.f32 1.0, %v3774_v34  ;;  %v3324_v34 = vld [vmem:[%s5443_s4] sm:$0xff]  }
 0x1a9   : > { %671 = vperm.xlu1 %3716, %v3776_v35   ;;  %v4229_v35 = vld [vmem:[%s5442_s3 + $0x40] sm:$0xff] }
 0x1aa   : > { %3783 = vrcp.f32 %v629_v37 }
 0x1ab   : > { %v3778_v38 = vpop.eup %3777 }
 0x1ac   : > { %v3780_v39 = vpop.eup %3779  ;;  %v630_v40 = vadd.f32 1.0, %v3778_v38  ;;  %v4232_v38 = vunpack.c.l.bf16 %v3324_v34 }
 0x1ad   : > { %676 = vperm.xlu1 %3716, %v3780_v39  }
 0x1ae   : > { %3785 = vrcp.f32 %v630_v40  ;;  %v4237_v40 = vunpack.c.h.bf16 %v3324_v34 }
 0x1b0   : > { %v3782_v41 = vpop.eup %3781 }
 0x1b1   : > { %681 = vperm.xlu1 %3716, %v3782_v41   ;;  %v409_v41 = vld [vmem:[%s5443_s4 + $0x8] sm:$0xf] }
 0x1b4   : > { %v3784_v42 = vpop.eup %3783 }
 0x1b5   : > { %686 = vperm.xlu1 %3716, %v3784_v42   ;;  %v4247_v42 = vunpack.c.l.bf16 %v409_v41 }
 0x1b8   : > { %v3786_v44 = vpop.eup %3785 }
 0x1b9   : > { %691 = vperm.xlu1 %3716, %v3786_v44  }
 0x1dd   : > { %444 = vadd.xlane.f32.xlu1 %v443_v48 }
 0x218   : > { %v652_v51 = vpop.permute.xlu0 %651 }
 0x219   : > { %v694_v54 = vmul.f32 %v652_v51, %v4175_v49 }
 0x21c   : > { %v657_v53 = vpop.permute.xlu1 %656 }
 0x21d   : > { %v695_v55 = vmul.f32 %v657_v53, %v4180_v52 }
 0x21f   : > { %v3640_v56 = vpack.c.bf16 %v695_v55, %v694_v54 }
 0x220   : > { %v662_v58 = vpop.permute.xlu1 %661 }
 0x221   : > { %3641 = vmatpush3.bf16.msra.mxu1 %v3640_v56  ;;  %v696_v62 = vmul.f32 %v662_v58, %v4187_v59 }
 0x222   : > { %3642 = vmatprep.subr.bf16.mxu1 %v3919_v24 }
 0x224   : > { %v667_v61 = vpop.permute.xlu1 %666 }
 0x225   : > { %v697_v63 = vmul.f32 %v667_v61, %v4192_v60 }
 0x227   : > { %v3643_v0 = vpack.c.bf16 %v697_v63, %v696_v62 }
 0x228   : > { %v672_v5 = vpop.permute.xlu1 %671 }
 0x229   : > { %3644 = vmatpush3.bf16.msra.mxu1 %v3643_v0  ;;  %v698_v20 = vmul.f32 %v672_v5, %v4200_v6 }
 0x22a   : > { %3645 = vmatprep.subr.bf16.mxu1 %v3919_v24 }
 0x22c   : > { %v677_v19 = vpop.permute.xlu1 %676 }
 0x22d   : > { %v699_v22 = vmul.f32 %v677_v19, %v4205_v18 }
 0x22f   : > { %v3646_v23 = vpack.c.bf16 %v699_v22, %v698_v20 }
 0x230   : > { %v682_v25 = vpop.permute.xlu1 %681 }
 0x231   : > { %3647 = vmatpush3.bf16.msra.mxu1 %v3646_v23  ;;  %v700_v30 = vmul.f32 %v682_v25, %v4213_v27 }
 0x232   : > { %3648 = vmatprep.subr.bf16.mxu1 %v3919_v24 }
 0x234   : > { %v687_v29 = vpop.permute.xlu1 %686 }
 0x235   : > { %v701_v32 = vmul.f32 %v687_v29, %v4218_v28 }
 0x237   : > { %v3649_v33 = vpack.c.bf16 %v701_v32, %v700_v30 }
 0x238   : > { %v692_v37 = vpop.permute.xlu1 %691 }
 0x239   : > { %3650 = vmatpush3.bf16.msra.mxu1 %v3649_v33  ;;  %v702_v39 = vmul.f32 %v692_v37, %v4229_v35 }
 0x23a   : > { %3460 = vmatprep.subr.mxu1 %v5451_v4 }
 0x23d   : > { %3461 = vmatpush3.msra.mxu1 %v702_v39 }
 0x23e   : > { %3463 = vmatmul.mubr.msk.f32.vlgmr.msra.gmra.mrb[0].mxu1 %vm703_vm2, %v4232_v38  ;;  %3471 = vmatprep.subr.mxu1 %v5451_v4 }
 0x23f   : > { %3465 = vmatprep.mubr.msk.f32.mxu1 %vm3917_vm0, %v5451_v4 }
 0x242   : > { %3466 = vmatmul.mubr.msk.f32.gmra.mrb[2].mxu1 %vm703_vm2, %v4237_v40 }
 0x243   : > { %3468 = vmatprep.mubr.msk.f32.mxu1 %vm3917_vm0, %v5451_v4 }
 0x246   : > { %3469 = vmatmul.mubr.msk.f32.gmra.mrb[4].mxu1 %vm703_vm2, %v4247_v42 }
 0x247   : > { %3473 = vmatprep.mubr.msk.f32.mxu1 %vm3917_vm0, %v5451_v4 }
 0x26a   : > { %v445_v44 = vpop.xlane.xlu1 %444 }
 0x26b   : > { %v454_v45 = vmul.f32 0.00390625, %v445_v44 }
 0x26d   : > { %3472 = vmatpush3.msra.mxu1 %v454_v45 }
 0x26e   : > { %3474 = vmatmul.mubr.msk.f32.vlgmr.msra.gmra.mrb[6].mxu1 %vm457_vm1, %v4029_v7  ;;  %3663 = vmatprep.subr.bf16.mxu1 %v3919_v24 }
 0x26f   : > { %3476 = vmatprep.mubr.msk.f32.mxu1 %vm3917_vm0, %v5451_v4 }
 0x272   : > { %3477 = vmatmul.mubr.msk.f32.gmra.mrb[8].mxu1 %vm457_vm1, %v4038_v8 }
 0x273   : > { %3479 = vmatprep.mubr.msk.f32.mxu1 %vm3917_vm0, %v5451_v4 }
 0x276   : > { %3480 = vmatmul.mubr.msk.f32.gmra.mrb[10].mxu1 %vm457_vm1, %v4047_v9 }
 0x277   : > { %3482 = vmatprep.mubr.msk.f32.mxu1 %vm3917_vm0, %v5451_v4 }
 0x27a   : > { %3483 = vmatmul.mubr.msk.f32.gmra.mrb[12].mxu1 %vm457_vm1, %v4056_v10 }
 0x27b   : > { %3485 = vmatprep.mubr.msk.f32.mxu1 %vm3917_vm0, %v5451_v4 }
 0x27e   : > { %3486 = vmatmul.mubr.msk.f32.gmra.mrb[14].mxu1 %vm457_vm1, %v4065_v11 }
 0x27f   : > { %3488 = vmatprep.mubr.msk.f32.mxu1 %vm3917_vm0, %v5451_v4 }
 0x282   : > { %3489 = vmatmul.mubr.msk.f32.gmra.mrb[16].mxu1 %vm457_vm1, %v4074_v12 }
 0x283   : > { %3491 = vmatprep.mubr.msk.f32.mxu1 %vm3917_vm0, %v5451_v4 }
 0x286   : > { %3492 = vmatmul.mubr.msk.f32.gmra.mrb[18].mxu1 %vm457_vm1, %v4083_v13 }
 0x287   : > { %3494 = vmatprep.mubr.msk.f32.mxu1 %vm3917_vm0, %v5451_v4 }
 0x28a   : > { %3495 = vmatmul.mubr.msk.f32.gmra.mrb[20].mxu1 %vm457_vm1, %v4092_v14 }
 0x28b   : > { %3497 = vmatprep.mubr.msk.f32.mxu1 %vm3917_vm0, %v5451_v4 }
 0x28e   : > { %3498 = vmatmul.mubr.msk.f32.gmra.mrb[22].mxu1 %vm457_vm1, %v4101_v15 }
 0x28f   : > { %3574 = vmatprep.mubr.msk.f32.mxu1 %vm3917_vm0, %v5451_v4 }
 0x311   : > { %v4292_v48 = vpop.f32.mrb[0].mxu1 }
 0x312   : > { %v3464_v51 = vpop.f32.mrb[1].mxu1 }
 0x315   : > { %v4294_v53 = vpop.f32.mrb[2].mxu1 }
 0x316   : > { %v3467_v54 = vpop.f32.mrb[3].mxu1 }
 0x319   : > { %v4296_v55 = vpop.f32.mrb[4].mxu1 }
 0x31a   : > { %v3470_v56 = vpop.f32.mrb[5].mxu1 }
 0x341   : > { %v859_v58 = vpop.f32.mrb[6].mxu1 }
 0x342   : > { %v860_v61 = vadd.f32 %v859_v58, %v4112_v17  ;;  %v3475_v62 = vpop.f32.mrb[7].mxu1 }
 0x344   : > { %v3233_v63 = vmul.f32 -1.442695, %v860_v61 }
 0x345   : > { %v864_v0 = vpop.f32.mrb[8].mxu1 }
 0x346   : > { %3787 = vpow2.f32 %v3233_v63  ;;  %v865_v5 = vadd.f32 %v864_v0, %v4118_v21  ;;  %v3478_v19 = vpop.f32.mrb[9].mxu1 }
 0x348   : > { %v3234_v20 = vmul.f32 -1.442695, %v865_v5 }
 0x349   : > { %v869_v22 = vpop.f32.mrb[10].mxu1 }
 0x34a   : > { %3789 = vpow2.f32 %v3234_v20  ;;  %v870_v23 = vadd.f32 %v869_v22, %v4124_v26  ;;  %v3481_v25 = vpop.f32.mrb[11].mxu1 }
 0x34c   : > { %v3235_v29 = vmul.f32 -1.442695, %v870_v23 }
 0x34d   : > { %v874_v30 = vpop.f32.mrb[12].mxu1 }
 0x34e   : > { %3791 = vpow2.f32 %v3235_v29  ;;  %v875_v32 = vadd.f32 %v874_v30, %v4130_v31  ;;  %v3484_v33 = vpop.f32.mrb[13].mxu1 }
 0x350   : > { %v3788_v34 = vpop.eup %3787  ;;  %v3236_v37 = vmul.f32 -1.442695, %v875_v32 }
 0x351   : > { %v930_v39 = vadd.f32 1.0, %v3788_v34  ;;  %v879_v41 = vpop.f32.mrb[14].mxu1 }
 0x352   : > { %3793 = vpow2.f32 %v3236_v37  ;;  %v880_v44 = vadd.f32 %v879_v41, %v4136_v36  ;;  %v3487_v45 = vpop.f32.mrb[15].mxu1 }
 0x353   : > { %3795 = vrcp.f32 %v930_v39 }
 0x354   : > { %v3790_v51 = vpop.eup %3789  ;;  %v3237_v54 = vmul.f32 -1.442695, %v880_v44 }
 0x355   : > { %v931_v56 = vadd.f32 1.0, %v3790_v51  ;;  %v884_v58 = vpop.f32.mrb[16].mxu1 }
 0x356   : > { %3797 = vpow2.f32 %v3237_v54  ;;  %v885_v61 = vadd.f32 %v884_v58, %v4142_v43  ;;  %v3490_v62 = vpop.f32.mrb[17].mxu1 }
 0x357   : > { %3799 = vrcp.f32 %v931_v56 }
 0x358   : > { %v3792_v63 = vpop.eup %3791  ;;  %v3238_v0 = vmul.f32 -1.442695, %v885_v61 }
 0x359   : > { %v932_v5 = vadd.f32 1.0, %v3792_v63  ;;  %v889_v19 = vpop.f32.mrb[18].mxu1 }
 0x35a   : > { %3801 = vpow2.f32 %v3238_v0  ;;  %v890_v20 = vadd.f32 %v889_v19, %v4148_v50  ;;  %v3493_v22 = vpop.f32.mrb[19].mxu1 }
 0x35b   : > { %3803 = vrcp.f32 %v932_v5 }
 0x35c   : > { %v3794_v23 = vpop.eup %3793  ;;  %v3239_v25 = vmul.f32 -1.442695, %v890_v20 }
 0x35d   : > { %v3796_v29 = vpop.eup %3795  ;;  %v933_v30 = vadd.f32 1.0, %v3794_v23  ;;  %v894_v32 = vpop.f32.mrb[20].mxu1 }
 0x35e   : > { %3805 = vpow2.f32 %v3239_v25  ;;  %v895_v33 = vadd.f32 %v894_v32, %v4154_v57  ;;  %959 = vperm.xlu0 %3715, %v3796_v29   ;;  %v3496_v34 = vpop.f32.mrb[21].mxu1 }
 0x35f   : > { %3807 = vrcp.f32 %v933_v30  ;;  %v397_v34 = vld [vmem:[%s4012_s23 + $0x10] sm:$0xff] }
 0x360   : > { %v3798_v37 = vpop.eup %3797  ;;  %v3240_v39 = vmul.f32 -1.442695, %v895_v33 }
 0x361   : > { %v3800_v41 = vpop.eup %3799  ;;  %v934_v44 = vadd.f32 1.0, %v3798_v37  ;;  %v899_v45 = vpop.f32.mrb[22].mxu1  ;;  %v4308_v37 = vunpack.c.l.bf16 %v397_v34 }
 0x362   : > { %3809 = vpow2.f32 %v3240_v39  ;;  %v900_v51 = vadd.f32 %v899_v45, %v4160_v3  ;;  %964 = vperm.xlu0 %3715, %v3800_v41   ;;  %v3499_v54 = vpop.f32.mrb[23].mxu1  ;;  %v4310_v39 = vunpack.c.h.bf16 %v397_v34 }
 0x363   : > { %3811 = vrcp.f32 %v934_v44  ;;  %5488 = vst [vmem:[#allocation6_spill] sm:$0xff] %v4308_v37 }
 0x364   : > { %v3802_v56 = vpop.eup %3801  ;;  %v3241_v58 = vmul.f32 -1.442695, %v900_v51  ;;  %5489 = vst [vmem:[#allocation7_spill] sm:$0xff] %v4310_v39  ;;  %v446_v41 = vadd.f32 %v4310_v39, %v4308_v37 }
 0x365   : > { %v3804_v61 = vpop.eup %3803  ;;  %v935_v62 = vadd.f32 1.0, %v3802_v56 }
 0x366   : > { %3813 = vpow2.f32 %v3241_v58  ;;  %969 = vperm.xlu0 %3715, %v3804_v61  }
 0x367   : > { %3815 = vrcp.f32 %v935_v62 }
 0x368   : > { %v3806_v63 = vpop.eup %3805 }
 0x369   : > { %v3808_v0 = vpop.eup %3807  ;;  %v936_v5 = vadd.f32 1.0, %v3806_v63 }
 0x36a   : > { %974 = vperm.xlu0 %3715, %v3808_v0  }
 0x36b   : > { %3817 = vrcp.f32 %v936_v5 }
 0x36c   : > { %v3810_v19 = vpop.eup %3809 }
 0x36d   : > { %v3812_v20 = vpop.eup %3811  ;;  %v937_v22 = vadd.f32 1.0, %v3810_v19 }
 0x36e   : > { %979 = vperm.xlu0 %3715, %v3812_v20  }
 0x36f   : > { %3819 = vrcp.f32 %v937_v22 }
 0x370   : > { %v3814_v23 = vpop.eup %3813 }
 0x371   : > { %v3816_v25 = vpop.eup %3815  ;;  %v938_v29 = vadd.f32 1.0, %v3814_v23 }
 0x372   : > { %984 = vperm.xlu0 %3715, %v3816_v25  }
 0x373   : > { %3821 = vrcp.f32 %v938_v29 }
 0x375   : > { %v3818_v30 = vpop.eup %3817 }
 0x376   : > { %989 = vperm.xlu1 %3716, %v3818_v30  }
 0x379   : > { %v3820_v32 = vpop.eup %3819 }
 0x37a   : > { %994 = vperm.xlu0 %3715, %v3820_v32  }
 0x37d   : > { %v3822_v33 = vpop.eup %3821 }
 0x37e   : > { %999 = vperm.xlu0 %3715, %v3822_v33  }
 0x39d   : > { %447 = vadd.xlane.f32.xlu0 %v446_v41 }
 0x3dd   : > { %v960_v44 = vpop.permute.xlu0 %959 }
 0x3de   : > { %v1002_v51 = vmul.f32 %v960_v44, %v4175_v49 }
 0x3e1   : > { %v965_v45 = vpop.permute.xlu0 %964 }
 0x3e2   : > { %v1003_v54 = vmul.f32 %v965_v45, %v4180_v52 }
 0x3e4   : > { %v3652_v56 = vpack.c.bf16 %v1003_v54, %v1002_v51 }
 0x3e5   : > { %v970_v58 = vpop.permute.xlu0 %969 }
 0x3e6   : > { %3653 = vmatpush3.bf16.msra.mxu0 %v3652_v56  ;;  %v1004_v62 = vmul.f32 %v970_v58, %v4187_v59 }
 0x3e7   : > { %3654 = vmatprep.subr.bf16.mxu0 %v3919_v24 }
 0x3e9   : > { %v975_v61 = vpop.permute.xlu0 %974 }
 0x3ea   : > { %v1005_v63 = vmul.f32 %v975_v61, %v4192_v60 }
 0x3ec   : > { %v3655_v0 = vpack.c.bf16 %v1005_v63, %v1004_v62 }
 0x3ed   : > { %v980_v5 = vpop.permute.xlu0 %979 }
 0x3ee   : > { %3656 = vmatpush3.bf16.msra.mxu0 %v3655_v0  ;;  %v1006_v20 = vmul.f32 %v980_v5, %v4200_v6 }
 0x3ef   : > { %3657 = vmatprep.subr.bf16.mxu0 %v3919_v24 }
 0x3f1   : > { %v985_v19 = vpop.permute.xlu0 %984 }
 0x3f2   : > { %v1007_v22 = vmul.f32 %v985_v19, %v4205_v18 }
 0x3f4   : > { %v3658_v23 = vpack.c.bf16 %v1007_v22, %v1006_v20 }
 0x3f5   : > { %v990_v25 = vpop.permute.xlu1 %989 }
 0x3f6   : > { %3659 = vmatpush3.bf16.msra.mxu0 %v3658_v23  ;;  %v1008_v30 = vmul.f32 %v990_v25, %v4213_v27 }
 0x3f7   : > { %3660 = vmatprep.subr.bf16.mxu0 %v3919_v24 }
 0x3f9   : > { %v995_v29 = vpop.permute.xlu0 %994 }
 0x3fa   : > { %v1009_v32 = vmul.f32 %v995_v29, %v4218_v28 }
 0x3fc   : > { %v3661_v33 = vpack.c.bf16 %v1009_v32, %v1008_v30 }
 0x3fd   : > { %v1000_v34 = vpop.permute.xlu0 %999 }
 0x3fe   : > { %3662 = vmatpush3.bf16.msra.mxu0 %v3661_v33  ;;  %v1010_v41 = vmul.f32 %v1000_v34, %v4229_v35 }
 0x3ff   : > { %3516 = vmatprep.subr.mxu0 %v5451_v4 }
 0x402   : > { %3517 = vmatpush3.msra.mxu0 %v1010_v41 }
 0x403   : > { %3519 = vmatmul.mubr.msk.f32.vlgmr.msra.gmra.mrb[18].mxu0 %vm703_vm2, %v4232_v38  ;;  %3527 = vmatprep.subr.mxu0 %v5451_v4 }
 0x404   : > { %3521 = vmatprep.mubr.msk.f32.mxu0 %vm3917_vm0, %v5451_v4 }
 0x407   : > { %3522 = vmatmul.mubr.msk.f32.gmra.mrb[20].mxu0 %vm703_vm2, %v4237_v40 }
 0x408   : > { %3524 = vmatprep.mubr.msk.f32.mxu0 %vm3917_vm0, %v5451_v4 }
 0x40b   : > { %3525 = vmatmul.mubr.msk.f32.gmra.mrb[22].mxu0 %vm703_vm2, %v4247_v42 }
 0x40c   : > { %3529 = vmatprep.mubr.msk.f32.mxu0 %vm3917_vm0, %v5451_v4 }
 0x42a   : > { %v448_v44 = vpop.xlane.xlu0 %447 }
 0x42b   : > { %v455_v45 = vmul.f32 0.00390625, %v448_v44 }
 0x42d   : > { %3528 = vmatpush3.msra.mxu0 %v455_v45 }
 0x42e   : > { %3530 = vmatmul.mubr.msk.f32.vlgmr.msra.gmra.mrb[24].mxu0 %vm457_vm1, %v4029_v7  ;;  %3675 = vmatprep.subr.bf16.mxu0 %v3919_v24 }
 0x42f   : > { %3532 = vmatprep.mubr.msk.f32.mxu0 %vm3917_vm0, %v5451_v4 }
 0x432   : > { %3533 = vmatmul.mubr.msk.f32.gmra.mrb[26].mxu0 %vm457_vm1, %v4038_v8 }
 0x433   : > { %3535 = vmatprep.mubr.msk.f32.mxu0 %vm3917_vm0, %v5451_v4 }
 0x436   : > { %3536 = vmatmul.mubr.msk.f32.gmra.mrb[28].mxu0 %vm457_vm1, %v4047_v9 }
 0x437   : > { %3538 = vmatprep.mubr.msk.f32.mxu0 %vm3917_vm0, %v5451_v4 }
 0x43a   : > { %3539 = vmatmul.mubr.msk.f32.gmra.mrb[30].mxu0 %vm457_vm1, %v4056_v10 }
 0x43b   : > { %3541 = vmatprep.mubr.msk.f32.mxu0 %vm3917_vm0, %v5451_v4 }
 0x43e   : > { %3542 = vmatmul.mubr.msk.f32.gmra.mrb[32].mxu0 %vm457_vm1, %v4065_v11 }
 0x43f   : > { %3544 = vmatprep.mubr.msk.f32.mxu0 %vm3917_vm0, %v5451_v4 }
 0x442   : > { %3545 = vmatmul.mubr.msk.f32.gmra.mrb[34].mxu0 %vm457_vm1, %v4074_v12 }
 0x443   : > { %3547 = vmatprep.mubr.msk.f32.mxu0 %vm3917_vm0, %v5451_v4 }
 0x446   : > { %3548 = vmatmul.mubr.msk.f32.gmra.mrb[36].mxu0 %vm457_vm1, %v4083_v13 }
 0x447   : > { %3550 = vmatprep.mubr.msk.f32.mxu0 %vm3917_vm0, %v5451_v4 }
 0x44a   : > { %3551 = vmatmul.mubr.msk.f32.gmra.mrb[38].mxu0 %vm457_vm1, %v4092_v14 }
 0x44b   : > { %3553 = vmatprep.mubr.msk.f32.mxu0 %vm3917_vm0, %v5451_v4 }
 0x44e   : > { %3554 = vmatmul.mubr.msk.f32.gmra.mrb[40].mxu0 %vm457_vm1, %v4101_v15 }
 0x44f   : > { %3630 = vmatprep.mubr.msk.f32.mxu0 %vm3917_vm0, %v5451_v4 }
 0x4d6   : > { %v4377_v7 = vpop.f32.mrb[18].mxu0 }
 0x4d7   : > { %v3520_v8 = vpop.f32.mrb[19].mxu0 }
 0x4da   : > { %v4379_v9 = vpop.f32.mrb[20].mxu0 }
 0x4db   : > { %v3523_v10 = vpop.f32.mrb[21].mxu0 }
 0x4de   : > { %v4381_v51 = vpop.f32.mrb[22].mxu0 }
 0x4df   : > { %5490 = vst [vmem:[#allocation8_spill] sm:$0xff] %v4381_v51  ;;  %v3526_v54 = vpop.f32.mrb[23].mxu0 }
 0x501   : > { %v1157_v56 = vpop.f32.mrb[24].mxu0 }
 0x502   : > { %v1158_v58 = vadd.f32 %v1157_v56, %v4112_v17  ;;  %v3531_v61 = vpop.f32.mrb[25].mxu0 }
 0x504   : > { %v3254_v62 = vmul.f32 -1.442695, %v1158_v58 }
 0x505   : > { %v1162_v63 = vpop.f32.mrb[26].mxu0 }
 0x506   : > { %3823 = vpow2.f32 %v3254_v62  ;;  %v1163_v0 = vadd.f32 %v1162_v63, %v4118_v21  ;;  %v3534_v5 = vpop.f32.mrb[27].mxu0 }
 0x508   : > { %v3255_v19 = vmul.f32 -1.442695, %v1163_v0 }
 0x509   : > { %v1167_v20 = vpop.f32.mrb[28].mxu0 }
 0x50a   : > { %3825 = vpow2.f32 %v3255_v19  ;;  %v1168_v22 = vadd.f32 %v1167_v20, %v4124_v26  ;;  %v3537_v23 = vpop.f32.mrb[29].mxu0 }
 0x50c   : > { %v3256_v25 = vmul.f32 -1.442695, %v1168_v22 }
 0x50d   : > { %v1172_v29 = vpop.f32.mrb[30].mxu0 }
 0x50e   : > { %3827 = vpow2.f32 %v3256_v25  ;;  %v1173_v30 = vadd.f32 %v1172_v29, %v4130_v31  ;;  %v3540_v32 = vpop.f32.mrb[31].mxu0 }
 0x510   : > { %v3824_v33 = vpop.eup %3823  ;;  %v3257_v34 = vmul.f32 -1.442695, %v1173_v30 }
 0x511   : > { %v1228_v41 = vadd.f32 1.0, %v3824_v33  ;;  %v1177_v44 = vpop.f32.mrb[32].mxu0 }
 0x512   : > { %3829 = vpow2.f32 %v3257_v34  ;;  %v1178_v45 = vadd.f32 %v1177_v44, %v4136_v36  ;;  %v3543_v8 = vpop.f32.mrb[33].mxu0 }
 0x513   : > { %3831 = vrcp.f32 %v1228_v41 }
 0x514   : > { %v3826_v10 = vpop.eup %3825  ;;  %v3258_v54 = vmul.f32 -1.442695, %v1178_v45 }
 0x515   : > { %v1229_v56 = vadd.f32 1.0, %v3826_v10  ;;  %v1182_v58 = vpop.f32.mrb[34].mxu0 }
 0x516   : > { %3833 = vpow2.f32 %v3258_v54  ;;  %v1183_v61 = vadd.f32 %v1182_v58, %v4142_v43  ;;  %v3546_v62 = vpop.f32.mrb[35].mxu0 }
 0x517   : > { %3835 = vrcp.f32 %v1229_v56 }
 0x518   : > { %v3828_v63 = vpop.eup %3827  ;;  %v3259_v0 = vmul.f32 -1.442695, %v1183_v61 }
 0x519   : > { %v1230_v5 = vadd.f32 1.0, %v3828_v63  ;;  %v1187_v19 = vpop.f32.mrb[36].mxu0 }
 0x51a   : > { %3837 = vpow2.f32 %v3259_v0  ;;  %v1188_v20 = vadd.f32 %v1187_v19, %v4148_v50  ;;  %v3549_v22 = vpop.f32.mrb[37].mxu0 }
 0x51b   : > { %3839 = vrcp.f32 %v1230_v5 }
 0x51c   : > { %v3830_v23 = vpop.eup %3829  ;;  %v3260_v25 = vmul.f32 -1.442695, %v1188_v20 }
 0x51d   : > { %v3832_v29 = vpop.eup %3831  ;;  %v1231_v30 = vadd.f32 1.0, %v3830_v23  ;;  %v1192_v32 = vpop.f32.mrb[38].mxu0 }
 0x51e   : > { %3841 = vpow2.f32 %v3260_v25  ;;  %v1193_v33 = vadd.f32 %v1192_v32, %v4154_v57  ;;  %1257 = vperm.xlu1 %3716, %v3832_v29   ;;  %v3552_v34 = vpop.f32.mrb[39].mxu0 }
 0x51f   : > { %3843 = vrcp.f32 %v1231_v30 }
 0x520   : > { %v3834_v41 = vpop.eup %3833  ;;  %v3261_v44 = vmul.f32 -1.442695, %v1193_v33 }
 0x521   : > { %v3836_v45 = vpop.eup %3835  ;;  %v1232_v8 = vadd.f32 1.0, %v3834_v41  ;;  %v1197_v10 = vpop.f32.mrb[40].mxu0  ;;  %v398_v41 = vld [vmem:[%s4012_s23 + $0x18] sm:$0xff] }
 0x522   : > { %3845 = vpow2.f32 %v3261_v44  ;;  %v1198_v54 = vadd.f32 %v1197_v10, %v4160_v3  ;;  %1262 = vperm.xlu1 %3716, %v3836_v45   ;;  %v3555_v56 = vpop.f32.mrb[41].mxu0  ;;  %v4393_v44 = vunpack.c.l.bf16 %v398_v41  ;;  %v4395_v45 = vunpack.c.h.bf16 %v398_v41 }
 0x523   : > { %3847 = vrcp.f32 %v1232_v8 }
 0x524   : > { %v3838_v58 = vpop.eup %3837  ;;  %v3262_v61 = vmul.f32 -1.442695, %v1198_v54  ;;  %5491 = vst [vmem:[#allocation9_spill] sm:$0xff] %v4393_v44  ;;  %5492 = vst [vmem:[#allocation10_spill] sm:$0xff] %v4395_v45  ;;  %v449_v8 = vadd.f32 %v4395_v45, %v4393_v44 }
 0x525   : > { %v3840_v62 = vpop.eup %3839  ;;  %v1233_v63 = vadd.f32 1.0, %v3838_v58 }
 0x526   : > { %3849 = vpow2.f32 %v3262_v61  ;;  %1267 = vperm.xlu1 %3716, %v3840_v62  }
 0x527   : > { %3851 = vrcp.f32 %v1233_v63 }
 0x528   : > { %v3842_v0 = vpop.eup %3841 }
 0x529   : > { %v3844_v5 = vpop.eup %3843  ;;  %v1234_v19 = vadd.f32 1.0, %v3842_v0 }
 0x52a   : > { %1272 = vperm.xlu1 %3716, %v3844_v5  }
 0x52b   : > { %3853 = vrcp.f32 %v1234_v19 }
 0x52c   : > { %v3846_v20 = vpop.eup %3845 }
 0x52d   : > { %v3848_v22 = vpop.eup %3847  ;;  %v1235_v23 = vadd.f32 1.0, %v3846_v20 }
 0x52e   : > { %1277 = vperm.xlu1 %3716, %v3848_v22  }
 0x52f   : > { %3855 = vrcp.f32 %v1235_v23 }
 0x530   : > { %v3850_v25 = vpop.eup %3849 }
 0x531   : > { %v3852_v29 = vpop.eup %3851  ;;  %v1236_v30 = vadd.f32 1.0, %v3850_v25 }
 0x532   : > { %1282 = vperm.xlu1 %3716, %v3852_v29  }
 0x533   : > { %3857 = vrcp.f32 %v1236_v30 }
 0x535   : > { %v3854_v32 = vpop.eup %3853 }
 0x536   : > { %1287 = vperm.xlu1 %3716, %v3854_v32  }
 0x539   : > { %v3856_v33 = vpop.eup %3855 }
 0x53a   : > { %1292 = vperm.xlu0 %3715, %v3856_v33  }
 0x53d   : > { %v3858_v34 = vpop.eup %3857 }
 0x53e   : > { %1297 = vperm.xlu1 %3716, %v3858_v34   ;;  %v3898_v34 = vld [vmem:[%s5440_s1 + $0x18] sm:$0xff] }
 0x562   : > { %450 = vadd.xlane.f32.xlu1 %v449_v8 }
 0x59d   : > { %v1258_v10 = vpop.permute.xlu1 %1257 }
 0x59e   : > { %v1300_v56 = vmul.f32 %v1258_v10, %v4175_v49 }
 0x5a1   : > { %v1263_v54 = vpop.permute.xlu1 %1262 }
 0x5a2   : > { %v1301_v58 = vmul.f32 %v1263_v54, %v4180_v52 }
 0x5a4   : > { %v3664_v61 = vpack.c.bf16 %v1301_v58, %v1300_v56 }
 0x5a5   : > { %v1268_v62 = vpop.permute.xlu1 %1267 }
 0x5a6   : > { %3665 = vmatpush3.bf16.msra.mxu1 %v3664_v61  ;;  %v1302_v0 = vmul.f32 %v1268_v62, %v4187_v59 }
 0x5a7   : > { %3666 = vmatprep.subr.bf16.mxu1 %v3919_v24 }
 0x5a9   : > { %v1273_v63 = vpop.permute.xlu1 %1272 }
 0x5aa   : > { %v1303_v5 = vmul.f32 %v1273_v63, %v4192_v60 }
 0x5ac   : > { %v3667_v19 = vpack.c.bf16 %v1303_v5, %v1302_v0 }
 0x5ad   : > { %v1278_v20 = vpop.permute.xlu1 %1277 }
 0x5ae   : > { %3668 = vmatpush3.bf16.msra.mxu1 %v3667_v19  ;;  %v1304_v49 = vmul.f32 %v1278_v20, %v4200_v6 }
 0x5af   : > { %3669 = vmatprep.subr.bf16.mxu1 %v3919_v24 }
 0x5b1   : > { %v1283_v22 = vpop.permute.xlu1 %1282 }
 0x5b2   : > { %v1305_v52 = vmul.f32 %v1283_v22, %v4205_v18 }
 0x5b4   : > { %v3670_v23 = vpack.c.bf16 %v1305_v52, %v1304_v49 }
 0x5b5   : > { %v1288_v25 = vpop.permute.xlu1 %1287 }
 0x5b6   : > { %3671 = vmatpush3.bf16.msra.mxu1 %v3670_v23  ;;  %v1306_v59 = vmul.f32 %v1288_v25, %v4213_v27  ;;  %v3895_v27 = vld [vmem:[%s5440_s1] sm:$0xff] }
 0x5b7   : > { %3672 = vmatprep.subr.bf16.mxu1 %v3919_v24 }
 0x5b9   : > { %v1293_v29 = vpop.permute.xlu0 %1292 }
 0x5ba   : > { %v1307_v60 = vmul.f32 %v1293_v29, %v4218_v28  ;;  %v3896_v28 = vld [vmem:[%s5440_s1 + $0x8] sm:$0xff] }
 0x5bc   : > { %v3673_v30 = vpack.c.bf16 %v1307_v60, %v1306_v59 }
 0x5bd   : > { %v1298_v32 = vpop.permute.xlu1 %1297 }
 0x5be   : > { %3674 = vmatpush3.bf16.msra.mxu1 %v3673_v30  ;;  %v1308_v33 = vmul.f32 %v1298_v32, %v4229_v35  ;;  %v3897_v35 = vld [vmem:[%s5440_s1 + $0x10] sm:$0xff] }
 0x5bf   : > { %3572 = vmatprep.subr.mxu1 %v5451_v4 }
 0x5c2   : > { %3573 = vmatpush3.msra.mxu1 %v1308_v33 }
 0x5c3   : > { %3575 = vmatmul.mubr.msk.f32.vlgmr.msra.gmra.mrb[24].mxu1 %vm703_vm2, %v4232_v38  ;;  %3583 = vmatprep.subr.mxu1 %v5451_v4 }
 0x5c4   : > { %3577 = vmatprep.mubr.msk.f32.mxu1 %vm3917_vm0, %v5451_v4 }
 0x5c7   : > { %3578 = vmatmul.mubr.msk.f32.gmra.mrb[26].mxu1 %vm703_vm2, %v4237_v40 }
 0x5c8   : > { %3580 = vmatprep.mubr.msk.f32.mxu1 %vm3917_vm0, %v5451_v4 }
 0x5cb   : > { %3581 = vmatmul.mubr.msk.f32.gmra.mrb[28].mxu1 %vm703_vm2, %v4247_v42 }
 0x5cc   : > { %3585 = vmatprep.mubr.msk.f32.mxu1 %vm3917_vm0, %v5451_v4 }
 0x5ef   : > { %v451_v6 = vpop.xlane.xlu1 %450 }
 0x5f0   : > { %v456_v18 = vmul.f32 0.00390625, %v451_v6 }
 0x5f2   : > { %3584 = vmatpush3.msra.mxu1 %v456_v18 }
 0x5f3   : > { %3586 = vmatmul.mubr.msk.f32.vlgmr.msra.gmra.mrb[30].mxu1 %vm457_vm1, %v3895_v27 }
 0x5f4   : > { %3588 = vmatprep.mubr.msk.f32.mxu1 %vm3917_vm0, %v5451_v4 }
 0x5f7   : > { %3589 = vmatmul.mubr.msk.f32.gmra.mrb[32].mxu1 %vm457_vm1, %v3896_v28 }
 0x5f8   : > { %3591 = vmatprep.mubr.msk.f32.mxu1 %vm3917_vm0, %v5451_v4 }
 0x5fb   : > { %3592 = vmatmul.mubr.msk.f32.gmra.mrb[34].mxu1 %vm457_vm1, %v3897_v35 }
 0x5fc   : > { %3594 = vmatprep.mubr.msk.f32.mxu1 %vm3917_vm0, %v5451_v4 }
 0x5ff   : > { %3595 = vmatmul.mubr.msk.f32.gmra.mrb[36].mxu1 %vm457_vm1, %v3898_v34 }
 0x600   : > { %3597 = vmatprep.mubr.msk.f32.mxu1 %vm3917_vm0, %v5451_v4 }
 0x603   : > { %3598 = vmatmul.mubr.msk.f32.gmra.mrb[38].mxu1 %vm457_vm1, %v4065_v11 }
 0x604   : > { %3600 = vmatprep.mubr.msk.f32.mxu1 %vm3917_vm0, %v5451_v4 }
 0x607   : > { %3601 = vmatmul.mubr.msk.f32.gmra.mrb[40].mxu1 %vm457_vm1, %v4074_v12 }
 0x608   : > { %3603 = vmatprep.mubr.msk.f32.mxu1 %vm3917_vm0, %v5451_v4 }
 0x60b   : > { %3604 = vmatmul.mubr.msk.f32.gmra.mrb[42].mxu1 %vm457_vm1, %v4083_v13 }
 0x60c   : > { %3606 = vmatprep.mubr.msk.f32.mxu1 %vm3917_vm0, %v5451_v4 }
 0x60f   : > { %3607 = vmatmul.mubr.msk.f32.gmra.mrb[44].mxu1 %vm457_vm1, %v4092_v14 }
 0x610   : > { %3609 = vmatprep.mubr.msk.f32.mxu1 %vm3917_vm0, %v5451_v4 }
 0x613   : > { %3610 = vmatmul.mubr.msk.f32.gmra.mrb[46].mxu1 %vm457_vm1, %v4101_v15 }
 0x614   : > { %2879 = vmatprep.mubr.f32.mxu1 %v5451_v4 }
 0x696   : > { %v4468_v11 = vpop.f32.mrb[24].mxu1 }
 0x697   : > { %v3576_v12 = vpop.f32.mrb[25].mxu1 }
 0x69a   : > { %v4470_v41 = vpop.f32.mrb[26].mxu1 }
 0x69b   : > { %v3579_v13 = vpop.f32.mrb[27].mxu1 }
 0x69e   : > { %v4472_v8 = vpop.f32.mrb[28].mxu1 }
 0x69f   : > { %5493 = vst [vmem:[#allocation11_spill] sm:$0xff] %v4472_v8  ;;  %v3582_v10 = vpop.f32.mrb[29].mxu1 }
 0x6c6   : > { %v1455_v54 = vpop.f32.mrb[30].mxu1 }
 0x6c7   : > { %v1456_v14 = vadd.f32 %v1455_v54, %v4112_v17  ;;  %v3587_v56 = vpop.f32.mrb[31].mxu1 }
 0x6c9   : > { %v3275_v58 = vmul.f32 -1.442695, %v1456_v14 }
 0x6ca   : > { %v1460_v61 = vpop.f32.mrb[32].mxu1 }
 0x6cb   : > { %3859 = vpow2.f32 %v3275_v58  ;;  %v1461_v15 = vadd.f32 %v1460_v61, %v4118_v21  ;;  %v3590_v62 = vpop.f32.mrb[33].mxu1 }
 0x6cd   : > { %v3276_v63 = vmul.f32 -1.442695, %v1461_v15 }
 0x6ce   : > { %v1465_v0 = vpop.f32.mrb[34].mxu1 }
 0x6cf   : > { %3861 = vpow2.f32 %v3276_v63  ;;  %v1466_v5 = vadd.f32 %v1465_v0, %v4124_v26  ;;  %v3593_v19 = vpop.f32.mrb[35].mxu1 }
 0x6d1   : > { %v3277_v20 = vmul.f32 -1.442695, %v1466_v5 }
 0x6d2   : > { %v1470_v22 = vpop.f32.mrb[36].mxu1 }
 0x6d3   : > { %3863 = vpow2.f32 %v3277_v20  ;;  %v1471_v49 = vadd.f32 %v1470_v22, %v4130_v31  ;;  %v3596_v52 = vpop.f32.mrb[37].mxu1 }
 0x6d5   : > { %v3860_v17 = vpop.eup %3859  ;;  %v3278_v23 = vmul.f32 -1.442695, %v1471_v49 }
 0x6d6   : > { %v1526_v25 = vadd.f32 1.0, %v3860_v17  ;;  %v1475_v29 = vpop.f32.mrb[38].mxu1 }
 0x6d7   : > { %3865 = vpow2.f32 %v3278_v23  ;;  %v1476_v21 = vadd.f32 %v1475_v29, %v4136_v36  ;;  %v3599_v59 = vpop.f32.mrb[39].mxu1 }
 0x6d8   : > { %3867 = vrcp.f32 %v1526_v25  ;;  %v2015_v59 = vld [vmem:[%s5445_s6] sm:$0xff] }
 0x6d9   : > { %v3862_v60 = vpop.eup %3861  ;;  %v3279_v30 = vmul.f32 -1.442695, %v1476_v21 }
 0x6da   : > { %v1527_v32 = vadd.f32 1.0, %v3862_v60  ;;  %v1480_v26 = vpop.f32.mrb[40].mxu1 }
 0x6db   : > { %3869 = vpow2.f32 %v3279_v30  ;;  %v1481_v33 = vadd.f32 %v1480_v26, %v4142_v43  ;;  %v3602_v6 = vpop.f32.mrb[41].mxu1  ;;  %v1985_v30 = vld [vmem:[%s5444_s5 + $0x10] sm:$0xff] }
 0x6dc   : > { %3871 = vrcp.f32 %v1527_v32  ;;  %v2017_v26 = vld [vmem:[%s5445_s6 + $0x10] sm:$0xff]  ;;  %v3921_v6 = vmov 4  }
 0x6dd   : > { %v3864_v31 = vpop.eup %3863  ;;  %v3280_v18 = vmul.f32 -1.442695, %v1481_v33  ;;  %v3920_v33 = vmov 2  }
 0x6de   : > { %v1528_v27 = vadd.f32 1.0, %v3864_v31  ;;  %v1485_v28 = vpop.f32.mrb[42].mxu1  ;;  %v3922_v31 = vmov 3  }
 0x6df   : > { %3873 = vpow2.f32 %v3280_v18  ;;  %v1486_v35 = vadd.f32 %v1485_v28, %v4148_v50  ;;  %v3605_v34 = vpop.f32.mrb[43].mxu1  ;;  %v3923_v18 = vmov 1   ;;  %v3925_v28 = vmov 6  }
 0x6e0   : > { %3875 = vrcp.f32 %v1528_v27  ;;  %v3924_v27 = vmov 5   ;;  %v3927_v34 = vmov 8  }
 0x6e1   : > { %v3866_v36 = vpop.eup %3865  ;;  %v3281_v12 = vmul.f32 -1.442695, %v1486_v35  ;;  %v3926_v35 = vmov 7  }
 0x6e2   : > { %v3868_v13 = vpop.eup %3867  ;;  %v1529_v10 = vadd.f32 1.0, %v3866_v36  ;;  %v1490_v54 = vpop.f32.mrb[44].mxu1  ;;  %v1983_v36 = vld [vmem:[%s5444_s5] sm:$0xff] }
 0x6e3   : > { %3877 = vpow2.f32 %v3281_v12  ;;  %v1491_v14 = vadd.f32 %v1490_v54, %v4154_v57  ;;  %1555 = vperm.xlu0 %3715, %v3868_v13   ;;  %v3608_v43 = vpop.f32.mrb[45].mxu1  ;;  %v1984_v12 = vld [vmem:[%s5444_s5 + $0x8] sm:$0xff]  ;;  %v2018_v54 = vld [vmem:[%s5445_s6 + $0x18] sm:$0xff] }
 0x6e4   : > { %3879 = vrcp.f32 %v1529_v10  ;;  %v2016_v13 = vld [vmem:[%s5445_s6 + $0x8] sm:$0xff]  ;;  %v1986_v10 = vld [vmem:[%s5444_s5 + $0x18] sm:$0xff]  ;;  %v2698_v43 = vld [vmem:[%s5447_s8] sm:$0xff] }
 0x6e5   : > { %v3870_v56 = vpop.eup %3869  ;;  %v3282_v58 = vmul.f32 -1.442695, %v1491_v14  ;;  %v2667_v14 = vld [vmem:[%s5446_s7 + $0x8] sm:$0xff] }
 0x6e6   : > { %v3872_v61 = vpop.eup %3871  ;;  %v1530_v15 = vadd.f32 1.0, %v3870_v56  ;;  %v1495_v62 = vpop.f32.mrb[46].mxu1  ;;  %v2666_v56 = vld [vmem:[%s5446_s7] sm:$0xff] }
 0x6e7   : > { %3881 = vpow2.f32 %v3282_v58  ;;  %v1496_v50 = vadd.f32 %v1495_v62, %v4160_v3  ;;  %1560 = vperm.xlu0 %3715, %v3872_v61   ;;  %v3611_v63 = vpop.f32.mrb[47].mxu1  ;;  %v2699_v58 = vld [vmem:[%s5447_s8 + $0x8] sm:$0xff] }
 0x6e8   : > { %3883 = vrcp.f32 %v1530_v15  ;;  %v3900_v62 = vld [vmem:[%s5442_s3 + $0x8] sm:$0xff] }
 0x6e9   : > { %v3874_v0 = vpop.eup %3873  ;;  %v3283_v5 = vmul.f32 -1.442695, %v1496_v50 }
 0x6ea   : > { %v3876_v19 = vpop.eup %3875  ;;  %v1531_v20 = vadd.f32 1.0, %v3874_v0 }
 0x6eb   : > { %3885 = vpow2.f32 %v3283_v5  ;;  %1565 = vperm.xlu0 %3715, %v3876_v19   ;;  %v3901_v19 = vld [vmem:[%s5442_s3 + $0x10] sm:$0xff] }
 0x6ec   : > { %3887 = vrcp.f32 %v1531_v20 }
 0x6ed   : > { %v3878_v57 = vpop.eup %3877 }
 0x6ee   : > { %v3880_v22 = vpop.eup %3879  ;;  %v1532_v49 = vadd.f32 1.0, %v3878_v57  ;;  %v3902_v57 = vld [vmem:[%s5442_s3 + $0x18] sm:$0xff] }
 0x6ef   : > { %1570 = vperm.xlu0 %3715, %v3880_v22  }
 0x6f0   : > { %3889 = vrcp.f32 %v1532_v49 }
 0x6f1   : > { %v3882_v52 = vpop.eup %3881 }
 0x6f2   : > { %v3884_v17 = vpop.eup %3883  ;;  %v1533_v23 = vadd.f32 1.0, %v3882_v52 }
 0x6f3   : > { %1575 = vperm.xlu0 %3715, %v3884_v17  }
 0x6f4   : > { %3891 = vrcp.f32 %v1533_v23  ;;  %v3903_v23 = vld [vmem:[%s5442_s3 + $0x20] sm:$0xff] }
 0x6f5   : > { %v3886_v3 = vpop.eup %3885 }
 0x6f6   : > { %v3888_v25 = vpop.eup %3887  ;;  %v1534_v29 = vadd.f32 1.0, %v3886_v3 }
 0x6f7   : > { %1580 = vperm.xlu0 %3715, %v3888_v25   ;;  %v3904_v25 = vld [vmem:[%s5442_s3 + $0x28] sm:$0xff] }
 0x6f8   : > { %3893 = vrcp.f32 %v1534_v29 }
 0x6fa   : > { %v3890_v21 = vpop.eup %3889 }
 0x6fb   : > { %1585 = vperm.xlu1 %3716, %v3890_v21  }
 0x6fe   : > { %v3892_v60 = vpop.eup %3891 }
 0x6ff   : > { %2021 = vperm.xlu1 %3716, %v2015_v59   ;;  %1590 = vperm.xlu0 %3715, %v3892_v60  }
 0x702   : > { %v3894_v32 = vpop.eup %3893 }
 0x703   : > { %1999 = vperm.xlu1 %3716, %v1985_v30   ;;  %1595 = vperm.xlu0 %3715, %v3894_v32   ;;  %v3905_v30 = vld [vmem:[%s5442_s3 + $0x30] sm:$0xff] }
 0x707   : > { %2031 = vperm.xlu1 %3716, %v2017_v26   ;;  %3721 = vset.pattern.permute.xlu0 %v3920_v33  ;;  %v3906_v26 = vld [vmem:[%s5442_s3 + $0x38] sm:$0xff] }
 0x708   : > { %2284 = vperm.xlu0 %3721, %v4294_v53  }
 0x70b   : > { %3717 = vset.pattern.permute.xlu1 %v3921_v6 }
 0x70c   : > { %2072 = vperm.xlu1 %3717, %v4294_v53   ;;  %2288 = vperm.xlu0 %3721, %v4379_v9  }
 0x710   : > { %2077 = vperm.xlu1 %3717, %v4379_v9   ;;  %3723 = vset.pattern.permute.xlu0 %v3922_v31 }
 0x711   : > { %2353 = vperm.xlu0 %3723, %v4294_v53  }
 0x714   : > { %3718 = vset.pattern.permute.xlu1 %v3923_v18 }
 0x715   : > { %2211 = vperm.xlu1 %3718, %v4294_v53   ;;  %3726 = vset.pattern.permute.xlu0 %v3924_v27 }
 0x716   : > { %2422 = vperm.xlu0 %3726, %v4294_v53  }
 0x719   : > { %3719 = vset.pattern.permute.xlu1 %v3921_v6 }
 0x71a   : > { %2082 = vperm.xlu1 %3719, %v4470_v41   ;;  %3729 = vset.pattern.permute.xlu0 %v3925_v28 }
 0x71b   : > { %2495 = vperm.xlu0 %3729, %v4294_v53  }
 0x71e   : > { %3720 = vset.pattern.permute.xlu1 %v3918_v16 }
 0x71f   : > { %2150 = vperm.xlu1 %3720, %v4470_v41   ;;  %3732 = vset.pattern.permute.xlu0 %v3926_v35 }
 0x720   : > { %2564 = vperm.xlu0 %3732, %v4294_v53  }
 0x723   : > { %3722 = vset.pattern.permute.xlu1 %v3923_v18 }
 0x724   : > { %2219 = vperm.xlu1 %3722, %v4470_v41   ;;  %3735 = vset.pattern.permute.xlu0 %v3927_v34 }
 0x725   : > { %2635 = vperm.xlu0 %3735, %v4294_v53  }
 0x728   : > { %3724 = vset.pattern.permute.xlu1 %v3922_v31 }
 0x729   : > { %2357 = vperm.xlu1 %3724, %v4379_v9   ;;  %2643 = vperm.xlu0 %3735, %v4470_v41  }
 0x72d   : > { %3725 = vset.pattern.permute.xlu1 %v3920_v33  ;;  %3738 = vset.pattern.permute.xlu0 %v3918_v16 }
 0x72e   : > { %2292 = vperm.xlu1 %3725, %v4470_v41   ;;  %1989 = vperm.xlu0 %3738, %v1983_v36  }
 0x732   : > { %3727 = vset.pattern.permute.xlu1 %v3924_v27  ;;  %1994 = vperm.xlu0 %3738, %v1984_v12  }
 0x733   : > { %2426 = vperm.xlu1 %3727, %v4379_v9  }
 0x736   : > { %2026 = vperm.xlu0 %3738, %v2016_v13  }
 0x737   : > { %3728 = vset.pattern.permute.xlu1 %v3922_v31 }
 0x738   : > { %2361 = vperm.xlu1 %3728, %v4470_v41  }
 0x73a   : > { %2004 = vperm.xlu0 %3738, %v1986_v10  }
 0x73c   : > { %3730 = vset.pattern.permute.xlu1 %v3925_v28 }
 0x73d   : > { %2499 = vperm.xlu1 %3730, %v4379_v9  }
 0x73e   : > { %2036 = vperm.xlu0 %3738, %v2018_v54  }
 0x741   : > { %3731 = vset.pattern.permute.xlu1 %v3924_v27 }
 0x742   : > { %2430 = vperm.xlu1 %3731, %v4470_v41   ;;  %2142 = vperm.xlu0 %3738, %v4294_v53   ;;  %v2668_v53 = vld [vmem:[%s5446_s7 + $0x10] sm:$0xff] }
 0x746   : > { %3733 = vset.pattern.permute.xlu1 %v3926_v35  ;;  %2146 = vperm.xlu0 %3738, %v4379_v9  }
 0x747   : > { %2568 = vperm.xlu1 %3733, %v4379_v9  }
 0x74a   : > { %2677 = vperm.xlu0 %3738, %v2667_v14  }
 0x74b   : > { %3734 = vset.pattern.permute.xlu1 %v3925_v28 }
 0x74c   : > { %2503 = vperm.xlu1 %3734, %v4470_v41  }
 0x74e   : > { %2704 = vperm.xlu0 %3738, %v2698_v43  }
 0x750   : > { %3736 = vset.pattern.permute.xlu1 %v3927_v34 }
 0x751   : > { %2639 = vperm.xlu1 %3736, %v4379_v9  }
 0x752   : > { %2682 = vperm.xlu0 %3738, %v2668_v53  }
 0x755   : > { %3737 = vset.pattern.permute.xlu1 %v3926_v35 }
 0x756   : > { %2572 = vperm.xlu1 %3737, %v4470_v41   ;;  %3740 = vset.pattern.permute.xlu0 %v3923_v18 }
 0x757   : > { %2215 = vperm.xlu0 %3740, %v4379_v9   ;;  %v3899_v9 = vld [vmem:[%s5442_s3] sm:$0xff] }
 0x75a   : > { %3739 = vset.pattern.permute.xlu1 %v3918_v16 }
 0x75b   : > { %2672 = vperm.xlu1 %3739, %v2666_v56  }
 0x75f   : > { %2709 = vperm.xlu1 %3739, %v2699_v58  }
 0x762   : > { %v1556_v61 = vpop.permute.xlu0 %1555 }
 0x763   : > { %3741 = vset.pattern.permute.xlu1 %v3921_v6  ;;  %v1598_v41 = vmul.f32 %v3899_v9, %v1556_v61 }
 0x766   : > { %v1561_v15 = vpop.permute.xlu0 %1560 }
 0x767   : > { %v1599_v50 = vmul.f32 %v3900_v62, %v1561_v15 }
 0x769   : > { %v3676_v63 = vpack.c.bf16 %v1599_v50, %v1598_v41 }
 0x76a   : > { %v1566_v0 = vpop.permute.xlu0 %1565 }
 0x76b   : > { %3677 = vmatpush3.bf16.msra.mxu0 %v3676_v63  ;;  %v1600_v20 = vmul.f32 %v3901_v19, %v1566_v0 }
 0x76c   : > { %3678 = vmatprep.subr.bf16.mxu0 %v3919_v24 }
 0x76e   : > { %v1571_v5 = vpop.permute.xlu0 %1570 }
 0x76f   : > { %v1601_v22 = vmul.f32 %v3902_v57, %v1571_v5 }
 0x771   : > { %v3679_v49 = vpack.c.bf16 %v1601_v22, %v1600_v20 }
 0x772   : > { %v1576_v52 = vpop.permute.xlu0 %1575 }
 0x773   : > { %3680 = vmatpush3.bf16.msra.mxu0 %v3679_v49  ;;  %v1602_v3 = vmul.f32 %v3903_v23, %v1576_v52 }
 0x774   : > { %3681 = vmatprep.subr.bf16.mxu0 %v3919_v24 }
 0x776   : > { %v1581_v17 = vpop.permute.xlu0 %1580 }
 0x777   : > { %v1603_v29 = vmul.f32 %v3904_v25, %v1581_v17 }
 0x779   : > { %v3682_v21 = vpack.c.bf16 %v1603_v29, %v1602_v3 }
 0x77a   : > { %v1586_v59 = vpop.permute.xlu1 %1585 }
 0x77b   : > { %3683 = vmatpush3.bf16.msra.mxu0 %v3682_v21  ;;  %v1604_v32 = vmul.f32 %v3905_v30, %v1586_v59 }
 0x77c   : > { %3684 = vmatprep.subr.bf16.mxu0 %v3919_v24  ;;  %v3907_v24 = vld [vmem:[%s5442_s3 + $0x40] sm:$0xff] }
 0x77e   : > { %v1591_v60 = vpop.permute.xlu0 %1590  ;;  %v2022_v56 = vpop.permute.xlu1 %2021 }
 0x77f   : > { %v1605_v6 = vmul.f32 %v3906_v26, %v1591_v60 }
 0x781   : > { %v3685_v18 = vpack.c.bf16 %v1605_v6, %v1604_v32 }
 0x782   : > { %v1596_v36 = vpop.permute.xlu0 %1595  ;;  %v4652_v50 = vpop.permute.xlu1 %1999 }
 0x783   : > { %3686 = vmatpush3.bf16.msra.mxu0 %v3685_v18  ;;  %v1606_v12 = vmul.f32 %v3907_v24, %v1596_v36 }
 0x784   : > { %3628 = vmatprep.subr.mxu0 %v5451_v4 }
 0x786   : > { %v4661_v19 = vpop.permute.xlu1 %2031 }
 0x787   : > { %3629 = vmatpush3.msra.mxu0 %v1606_v12 }
 0x788   : > { %3631 = vmatmul.mubr.msk.f32.vlgmr.msra.gmra.mrb[42].mxu0 %vm703_vm2, %v4232_v38  ;;  %1690 = vmatprep.subr.mxu0 %v4017_v2  ;;  %v4630_v38 = vpop.permute.xlu0 %2284 }
 0x789   : > { %3633 = vmatprep.mubr.msk.f32.mxu0 %vm3917_vm0, %v5451_v4  ;;  %1691 = vmatpush1.msra.mxu0 %v4015_v1 }
 0x78a   : > { %1764 = vmatprep.subr.mxu0 %v4168_v47 }
 0x78c   : > { %3634 = vmatmul.mubr.msk.f32.gmra.mrb[44].mxu0 %vm703_vm2, %v4237_v40  ;;  %v4632_v40 = vpop.permute.xlu0 %2288 }
 0x78d   : > { %3636 = vmatprep.mubr.msk.f32.mxu0 %vm3917_vm0, %v5451_v4 }
 0x790   : > { %3637 = vmatmul.mubr.msk.f32.gmra.mrb[46].mxu0 %vm703_vm2, %v4247_v42  ;;  %v4634_v42 = vpop.permute.xlu0 %2353 }
 0x791   : > { %1754 = vmatprep.mubr.f32.mxu0 %v5451_v4 }
 0x794   : > { %3287 = vmatmul.mubr.msk.f32.vlgmr.msra.gmra.mrb[48].mxu0 %vm457_vm1, %v4292_v48 }
 0x795   : > { %1765 = vmatpush1.msra.mxu0 %v4166_v46  ;;  %1828 = vmatprep.mubr.f32.mxu0 %v5451_v4  ;;  %v4636_v48 = vpop.permute.xlu0 %2422 }
 0x796   : > { %1838 = vmatprep.subr.mxu0 %v4310_v39 }
 0x798   : > { %3288 = vmatmul.mubr.msk.f32.vlgmr.msra.gmra.mrb[50].mxu0 %vm457_vm1, %v4377_v7 }
 0x799   : > { %1839 = vmatpush1.msra.mxu0 %v4308_v37  ;;  %1902 = vmatprep.mubr.f32.mxu0 %v5451_v4 }
 0x79a   : > { %1912 = vmatprep.subr.mxu0 %v4395_v45  ;;  %v4638_v7 = vpop.permute.xlu0 %2495 }
 0x79c   : > { %3289 = vmatmul.mubr.msk.f32.vlgmr.msra.gmra.mrb[52].mxu0 %vm457_vm1, %v4468_v11 }
 0x79d   : > { %1913 = vmatpush1.msra.mxu0 %v4393_v44  ;;  %1976 = vmatprep.mubr.f32.mxu0 %v5451_v4 }
 0x79f   : > { %v4640_v13 = vpop.permute.xlu0 %2564 }
 0x7a4   : > { %v4642_v10 = vpop.permute.xlu0 %2635 }
 0x7a8   : > { %v4646_v53 = vpop.permute.xlu0 %2643 }
 0x7a9   : > { %5494 = vst [vmem:[#allocation12_spill] sm:$0xff] %v4646_v53 }
 0x7ad   : > { %v1990_v15 = vpop.permute.xlu0 %1989 }
 0x7b1   : > { %v1995_v49 = vpop.permute.xlu0 %1994 }
 0x7b5   : > { %v2027_v17 = vpop.permute.xlu0 %2026 }
 0x7b9   : > { %v4757_v12 = vpop.permute.xlu0 %2004 }
 0x85b   : > { %v1673_v54 = vpop.f32.mrb[42].mxu0 }
 0x85c   : > { %3290 = vmatmul.mubr.msk.f32.vlgmr.msra.gmra.mrb[54].mxu0 %vm457_vm1, %v1673_v54  ;;  %v3632_v11 = vpop.f32.mrb[43].mxu0 }
 0x85d   : > { %2805 = vmatprep.mubr.f32.mxu0 %v5451_v4 }
 0x85f   : > { %v1678_v14 = vpop.f32.mrb[44].mxu0 }
 0x860   : > { %2223 = vperm.xlu0 %3740, %v1678_v14   ;;  %2087 = vperm.xlu1 %3741, %v1678_v14   ;;  %v3635_v43 = vpop.f32.mrb[45].mxu0 }
 0x863   : > { %v4648_v58 = vpop.f32.mrb[46].mxu0 }
 0x864   : > { %5495 = vst [vmem:[#allocation13_spill] sm:$0xff] %v4648_v58  ;;  %3743 = vset.pattern.permute.xlu0 %v3920_v33  ;;  %3742 = vset.pattern.permute.xlu1 %v3918_v16  ;;  %v3638_v61 = vpop.f32.mrb[47].mxu0 }
 0x865   : > { %2296 = vperm.xlu0 %3743, %v1678_v14   ;;  %2154 = vperm.xlu1 %3742, %v1678_v14  }
 0x867   : > { %v1756_v9 = vpop.f32.mrb[48].mxu0 }
 0x868   : > { %v2007_v41 = vmul.f32 %v1990_v15, %v1756_v9  ;;  %v1758_v62 = vpop.f32.mrb[49].mxu0 }
 0x869   : > { %3744 = vset.pattern.permute.xlu0 %v3922_v31  ;;  %3748 = vset.pattern.permute.xlu1 %v3927_v34  ;;  %v2008_v34 = vmul.f32 %v1990_v15, %v1758_v62 }
 0x86a   : > { %v2039_v63 = vadd.f32 %v2022_v56, %v2007_v41  ;;  %2365 = vperm.xlu0 %3744, %v1678_v14   ;;  %2647 = vperm.xlu1 %3748, %v1678_v14  }
 0x86b   : > { %v1830_v0 = vpop.f32.mrb[50].mxu0  ;;  %v2040_v22 = vadd.f32 %v2022_v56, %v2008_v34 }
 0x86c   : > { %v4656_v33 = vmax.f32 %v2039_v63, 0.0  ;;  %v1832_v5 = vpop.f32.mrb[51].mxu0  ;;  %v2009_v52 = vmul.f32 %v1995_v49, %v1830_v0 }
 0x86d   : > { %v2010_v29 = vmul.f32 %v1995_v49, %v1832_v5 }
 0x86e   : > { %3745 = vset.pattern.permute.xlu0 %v3924_v27  ;;  %2098 = vrot.lane.b32.xlu1 %v4656_v33, %s3928_s25  ;;  %v4669_v27 = vpop.permute.xlu1 %2072  ;;  %v2041_v23 = vadd.f32 %v2027_v17, %v2009_v52 }
 0x86f   : > { %2434 = vperm.xlu0 %3745, %v1678_v14   ;;  %v1904_v20 = vpop.f32.mrb[52].mxu0  ;;  %3749 = vset.pattern.permute.xlu1 %v3918_v16  ;;  %v2042_v59 = vadd.f32 %v2027_v17, %v2010_v29 }
 0x870   : > { %v4664_v31 = vpop.f32.mrb[53].mxu0  ;;  %v4701_v3 = vmax.f32 %v2041_v23, 0.0  ;;  %v2011_v6 = vmul.f32 %v4652_v50, %v1904_v20 }
 0x871   : > { %v4719_v60 = vmax.f32 %v2042_v59, 0.0  ;;  %v2012_v11 = vmul.f32 %v4652_v50, %v4664_v31 }
 0x872   : > { %2173 = vrot.lane.b32.xlu1 %v4656_v33, %s3929_s26  ;;  %v4676_v57 = vpop.permute.xlu1 %2077  ;;  %v2043_v36 = vadd.f32 %v4661_v19, %v2011_v6 }
 0x873   : > { %3746 = vset.pattern.permute.xlu0 %v3925_v28  ;;  %v4683_v28 = vmax.f32 %v2040_v22, 0.0  ;;  %v2044_v56 = vadd.f32 %v4661_v19, %v2012_v11  ;;  %v2055_v22 = vlaneseq }
 0x874   : > { %2507 = vperm.xlu0 %3746, %v1678_v14   ;;  %v4755_v24 = vmax.f32 %v2043_v36, 0.0 }
 0x875   : > { %v4780_v61 = vmax.f32 %v2044_v56, 0.0  ;;  %v4834_v17 = vand.u32 127, %v2055_v22 }
 0x876   : > { %2242 = vrot.lane.b32.xlu1 %v4656_v33, %s3930_s27  ;;  %5501 = vst [vmem:[#allocation19_spill] sm:$0xff] %v4755_v24 }
 0x877   : > { %5503 = vst [vmem:[#allocation21_spill] sm:$0xff] %v4780_v61  ;;  %v2057_v23 = vadd.s32 128, %v4834_v17  ;;  %v2058_v6 = vcvt.s32.f32 %v4834_v17  ;;  %vm2114_vm8 = vcmp.lt.s32.totalorder %v4834_v17, 17  ;;  %vm2189_vm12 = vcmp.lt.s32.totalorder %v4834_v17, 16 }
 0x878   : > { %3747 = vset.pattern.permute.xlu0 %v3926_v35  ;;  %v4685_v35 = vpop.permute.xlu1 %2211  ;;  %vm2258_vm14 = vcmp.lt.s32.totalorder %v4834_v17, 15 }
 0x879   : > { %2576 = vperm.xlu0 %3747, %v1678_v14   ;;  %v4771_v14 = vpop.permute.xlu0 %2036  ;;  %v2059_v36 = vcvt.s32.f32 %v2057_v23  ;;  %v2060_v4 = vadd.f32 0.5, %v2058_v6 }
 0x87a   : > { %2315 = vrot.lane.b32.xlu1 %v4656_v33, %s3931_s28 }
 0x87b   : > { %v2061_v45 = vadd.f32 0.5, %v2059_v36  ;;  %v2062_v22 = vmul.f32 0.0625, %v2060_v4 }
 0x87d   : > { %2595 = vrot.lane.b32.xlu0 %v4656_v33, %s3932_s29  ;;  %v4782_v15 = vpop.permute.xlu0 %2142  ;;  %v2063_v37 = vmul.f32 0.0625, %v2061_v45  ;;  %v4848_v46 = vfloor.f32 %v2062_v22 }
 0x87e   : > { %2384 = vrot.lane.b32.xlu1 %v4656_v33, %s3933_s30  ;;  %3750 = vset.pattern.permute.xlu0 %v3918_v16  ;;  %v4695_v16 = vpop.permute.xlu1 %2082 }
 0x87f   : > { %5496 = vst [vmem:[#allocation14_spill] sm:$0xff] %v4695_v16  ;;  %v4852_v1 = vfloor.f32 %v2063_v37  ;;  %v2066_v23 = vmul.f32 16.0, %v4848_v46  ;;  %vm2123_vm3 = vcmp.ge.f32.partialorder %v4848_v46, 1.0  ;;  %vm2478_vm0 = vcmp.lt.f32.partialorder %v4848_v46, 15.0 }
 0x881   : > { %2106 = vrot.lane.b32.xlu0 %v4683_v28, %s3928_s25  ;;  %v4794_v41 = vpop.permute.xlu0 %2146  ;;  %vm2124_vm5 = vcmp.ge.f32.partialorder %v4852_v1, 1.0  ;;  %vm2479_vm2 = vcmp.lt.f32.partialorder %v4852_v1, 15.0 }
 0x882   : > { %2453 = vrot.lane.b32.xlu1 %v4656_v33, %s3934_s12  ;;  %v4703_v25 = vpop.permute.xlu1 %2150 }
 0x883   : > { %5497 = vst [vmem:[#allocation15_spill] sm:$0xff] %v4703_v25 }
 0x885   : > { %2181 = vrot.lane.b32.xlu0 %v4683_v28, %s3929_s26  ;;  %v4802_v50 = vpop.permute.xlu0 %2677 }
 0x886   : > { %2526 = vrot.lane.b32.xlu1 %v4656_v33, %s3935_s13  ;;  %v4713_v21 = vpop.permute.xlu1 %2219  ;;  %5505 = vst [vmem:[#allocation23_spill] sm:$0xff] %v4802_v50 }
 0x887   : > { %5498 = vst [vmem:[#allocation16_spill] sm:$0xff] %v4713_v21 }
 0x889   : > { %2250 = vrot.lane.b32.xlu0 %v4683_v28, %s3930_s27  ;;  %v4814_v0 = vpop.permute.xlu0 %2704 }
 0x88a   : > { %2603 = vrot.lane.b32.xlu1 %v4683_v28, %s3932_s29  ;;  %v4721_v30 = vpop.permute.xlu1 %2357 }
 0x88d   : > { %2323 = vrot.lane.b32.xlu0 %v4683_v28, %s3931_s28  ;;  %v4822_v20 = vpop.permute.xlu0 %2682 }
 0x88e   : > { %2100 = vrot.lane.b32.xlu1 %v4701_v3, %s3928_s25  ;;  %v4731_v32 = vpop.permute.xlu1 %2292  ;;  %5507 = vst [vmem:[#allocation25_spill] sm:$0xff] %v4822_v20 }
 0x88f   : > { %5499 = vst [vmem:[#allocation17_spill] sm:$0xff] %v4731_v32 }
 0x891   : > { %2392 = vrot.lane.b32.xlu0 %v4683_v28, %s3933_s30  ;;  %v4828_v34 = vpop.permute.xlu0 %2215 }
 0x892   : > { %2175 = vrot.lane.b32.xlu1 %v4701_v3, %s3929_s26  ;;  %v4737_v26 = vpop.permute.xlu1 %2426 }
 0x895   : > { %2461 = vrot.lane.b32.xlu0 %v4683_v28, %s3934_s12 }
 0x896   : > { %2597 = vrot.lane.b32.xlu1 %v4701_v3, %s3932_s29  ;;  %v4748_v18 = vpop.permute.xlu1 %2361 }
 0x897   : > { %5500 = vst [vmem:[#allocation18_spill] sm:$0xff] %v4748_v18 }
 0x899   : > { %2534 = vrot.lane.b32.xlu0 %v4683_v28, %s3935_s13 }
 0x89a   : > { %2183 = vrot.lane.b32.xlu1 %v4719_v60, %s3929_s26  ;;  %v4759_v54 = vpop.permute.xlu1 %2499 }
 0x89d   : > { %2244 = vrot.lane.b32.xlu0 %v4701_v3, %s3930_s27 }
 0x89e   : > { %2252 = vrot.lane.b32.xlu1 %v4719_v60, %s3930_s27  ;;  %v4773_v43 = vpop.permute.xlu1 %2430 }
 0x89f   : > { %5502 = vst [vmem:[#allocation20_spill] sm:$0xff] %v4773_v43 }
 0x8a1   : > { %2317 = vrot.lane.b32.xlu0 %v4701_v3, %s3931_s28 }
 0x8a2   : > { %2325 = vrot.lane.b32.xlu1 %v4719_v60, %s3931_s28  ;;  %v4784_v9 = vpop.permute.xlu1 %2568 }
 0x8a5   : > { %2386 = vrot.lane.b32.xlu0 %v4701_v3, %s3933_s30 }
 0x8a6   : > { %2394 = vrot.lane.b32.xlu1 %v4719_v60, %s3933_s30  ;;  %v4796_v62 = vpop.permute.xlu1 %2503 }
 0x8a7   : > { %5504 = vst [vmem:[#allocation22_spill] sm:$0xff] %v4796_v62 }
 0x8a9   : > { %2455 = vrot.lane.b32.xlu0 %v4701_v3, %s3934_s12 }
 0x8aa   : > { %2463 = vrot.lane.b32.xlu1 %v4719_v60, %s3934_s12  ;;  %v4804_v63 = vpop.permute.xlu1 %2639 }
 0x8ad   : > { %2528 = vrot.lane.b32.xlu0 %v4701_v3, %s3935_s13 }
 0x8ae   : > { %2536 = vrot.lane.b32.xlu1 %v4719_v60, %s3935_s13  ;;  %v4816_v5 = vpop.permute.xlu1 %2572 }
 0x8af   : > { %5506 = vst [vmem:[#allocation24_spill] sm:$0xff] %v4816_v5 }
 0x8b1   : > { %2108 = vrot.lane.b32.xlu0 %v4719_v60, %s3928_s25 }
 0x8b2   : > { %2102 = vrot.lane.b32.xlu1 %v4755_v24, %s3928_s25  ;;  %v4820_v19 = vpop.permute.xlu1 %2672 }
 0x8b5   : > { %2605 = vrot.lane.b32.xlu0 %v4719_v60, %s3932_s29 }
 0x8b6   : > { %2177 = vrot.lane.b32.xlu1 %v4755_v24, %s3929_s26  ;;  %v4826_v31 = vpop.permute.xlu1 %2709 }
 0x8b7   : > { %5508 = vst [vmem:[#allocation26_spill] sm:$0xff] %v4826_v31 }
 0x8b9   : > { %2599 = vrot.lane.b32.xlu0 %v4755_v24, %s3932_s29 }
 0x8ba   : > { %2246 = vrot.lane.b32.xlu1 %v4755_v24, %s3930_s27 }
 0x8bd   : > { %2110 = vrot.lane.b32.xlu0 %v4780_v61, %s3928_s25 }
 0x8be   : > { %2319 = vrot.lane.b32.xlu1 %v4755_v24, %s3931_s28 }
 0x8c1   : > { %2185 = vrot.lane.b32.xlu0 %v4780_v61, %s3929_s26 }
 0x8c2   : > { %2388 = vrot.lane.b32.xlu1 %v4755_v24, %s3933_s30 }
 0x8c5   : > { %2254 = vrot.lane.b32.xlu0 %v4780_v61, %s3930_s27 }
 0x8c6   : > { %2457 = vrot.lane.b32.xlu1 %v4755_v24, %s3934_s12 }
 0x8c9   : > { %2327 = vrot.lane.b32.xlu0 %v4780_v61, %s3931_s28 }
 0x8ca   : > { %2530 = vrot.lane.b32.xlu1 %v4755_v24, %s3935_s13 }
 0x8cd   : > { %2396 = vrot.lane.b32.xlu0 %v4780_v61, %s3933_s30 }
 0x8ce   : > { %2465 = vrot.lane.b32.xlu1 %v4780_v61, %s3934_s12 }
 0x8d2   : > { %2538 = vrot.lane.b32.xlu1 %v4780_v61, %s3935_s13 }
 0x8d6   : > { %2607 = vrot.lane.b32.xlu1 %v4780_v61, %s3932_s29 }
 0x8df   : > { %v4830_v49 = vpop.permute.xlu1 %2087  ;;  %v4832_v52 = vpop.permute.xlu0 %2223 }
 0x8e0   : > { %5509 = vst [vmem:[#allocation27_spill] sm:$0xff] %v4830_v49  ;;  %5510 = vst [vmem:[#allocation28_spill] sm:$0xff] %v4832_v52  ;;  %v4858_v52 = vsub.f32 %v2058_v6, %v2066_v23 }
 0x8e2   : > { %vm2125_vm4 = vcmp.ge.f32.partialorder %v4858_v52, 1.0  ;;  %vm2267_vm10 = vcmp.lt.f32.partialorder %v4858_v52, 15.0 }
 0x8e3   : > { %vm2127_vm7 = vmand %vm2123_vm3, %vm2125_vm4 }
 0x8e4   : > { %v4837_v29 = vpop.permute.xlu1 %2154  ;;  %v4839_v59 = vpop.permute.xlu0 %2296  ;;  %vm2269_vm13 = vmand %vm2123_vm3, %vm2267_vm10 }
 0x8e5   : > { %5511 = vst [vmem:[#allocation29_spill] sm:$0xff] %v4837_v29  ;;  %5512 = vst [vmem:[#allocation30_spill] sm:$0xff] %v4839_v59 }
 0x8e9   : > { %v4842_v11 = vpop.permute.xlu1 %2647  ;;  %v4844_v56 = vpop.permute.xlu0 %2365 }
 0x8ea   : > { %5513 = vst [vmem:[#allocation31_spill] sm:$0xff] %v4842_v11  ;;  %5514 = vst [vmem:[#allocation32_spill] sm:$0xff] %v4844_v56  ;;  %v2067_v11 = vmul.f32 16.0, %v4852_v1 }
 0x8ed   : > { %v2099_v44 = vpop.permute.xlu1 %2098 }
 0x8ee   : > { %v4846_v39 = vpop.permute.xlu0 %2434 }
 0x8ef   : > { %5515 = vst [vmem:[#allocation33_spill] sm:$0xff] %v4846_v39  ;;  %v4860_v39 = vsub.f32 %v2059_v36, %v2067_v11  ;;  %v5518_v36 = vmov 0.0  }
 0x8f0   : > { %v4883_v11 = vsel %vm2127_vm7, 1.0, %v5518_v36  ;;  %v4899_v29 = vsel %vm2123_vm3, 1.0, %v5518_v36  ;;  %v4908_v8 = vsel %vm2124_vm5, 1.0, %v5518_v36  ;;  %v4924_v62 = vsel %vm2269_vm13, 1.0, %v5518_v36  ;;  %vm4937_vm3 = vmand %vm2478_vm0, %vm2267_vm10 }
 0x8f1   : > { %v2174_v47 = vpop.permute.xlu1 %2173  ;;  %vm2126_vm6 = vcmp.ge.f32.partialorder %v4860_v39, 1.0  ;;  %vm2268_vm11 = vcmp.lt.f32.partialorder %v4860_v39, 15.0  ;;  %v4976_v16 = vsel %vm4937_vm3, 1.0, %v5518_v36  ;;  %vm2400_vm13 = vcmp.lt.s32.totalorder %v4834_v17, 127 }
 0x8f2   : > { %vm2128_vm9 = vmand %vm2124_vm5, %vm2126_vm6 }
 0x8f3   : > { %v4850_v2 = vpop.permute.xlu0 %2507  ;;  %v4887_v23 = vsel %vm2128_vm9, 1.0, %v5518_v36  ;;  %vm2270_vm15 = vmand %vm2124_vm5, %vm2268_vm11  ;;  %vm2331_vm5 = vcmp.lt.s32.totalorder %v4834_v17, 1  ;;  %vm2611_vm9 = vcmp.lt.s32.totalorder %v4834_v17, 111 }
 0x8f4   : > { %5516 = vst [vmem:[#allocation34_spill] sm:$0xff] %v4850_v2  ;;  %v4927_v18 = vsel %vm2270_vm15, 1.0, %v5518_v36  ;;  %vm2621_vm7 = vmand %vm2479_vm2, %vm2268_vm11 }
 0x8f5   : > { %v2243_v58 = vpop.permute.xlu1 %2242  ;;  %v4979_v24 = vsel %vm2621_vm7, 1.0, %v5518_v36  ;;  %vm2480_vm15 = vmand %vm2478_vm0, %vm2125_vm4 }
 0x8f8   : > { %v4856_v56 = vpop.permute.xlu0 %2576 }
 0x8f9   : > { %5517 = vst [vmem:[#allocation35_spill] sm:$0xff] %v4856_v56  ;;  %v2316_v59 = vpop.permute.xlu1 %2315 }
 0x8fc   : > { %v4862_v4 = vpop.permute.xlu0 %2595 }
 0x8fd   : > { %v4864_v45 = vpop.permute.xlu1 %2384 }
 0x900   : > { %v2107_v37 = vpop.permute.xlu0 %2106 }
 0x901   : > { %v4874_v6 = vpop.permute.xlu1 %2453  ;;  %v2115_v56 = vsel %vm2114_vm8, %v2099_v44, %v2107_v37  ;;  %v2119_v2 = vsel %vm2114_vm8, %v2107_v37, %v2099_v44 }
 0x902   : > { %v2133_v44 = vmul.f32 %v4883_v11, %v2119_v2  ;;  %v2134_v37 = vmul.f32 %v4887_v23, %v2115_v56  ;;  %v2090_v56 = vmul.f32 %v4669_v27, %v4656_v33  ;;  %v4957_v33 = vsel %vm2125_vm4, 1.0, %v5518_v36 }
 0x903   : > { %vm2469_vm4 = vcmp.lt.s32.totalorder %v4834_v17, 113 }
 0x904   : > { %v2182_v22 = vpop.permute.xlu0 %2181  ;;  %v2158_v61 = vmul.f32 %v4782_v15, %v2134_v37 }
 0x905   : > { %v4894_v49 = vpop.permute.xlu1 %2526  ;;  %v2190_v20 = vsel %vm2189_vm12, %v2174_v47, %v2182_v22  ;;  %v2194_v53 = vsel %vm2189_vm12, %v2182_v22, %v2174_v47  ;;  %v2091_v22 = vmul.f32 %v4669_v27, %v4683_v28  ;;  %v4992_v47 = vsel %vm2268_vm11, 1.0, %v5518_v36 }
 0x906   : > { %v2202_v21 = vmul.f32 %v4899_v29, %v2194_v53  ;;  %v4962_v53 = vsel %vm2126_vm6, 1.0, %v5518_v36 }
 0x907   : > { %v2166_v25 = vadd.f32 %v2158_v61, %v2091_v22 }
 0x908   : > { %v2251_v5 = vpop.permute.xlu0 %2250 }
 0x909   : > { %v2604_v43 = vpop.permute.xlu1 %2603  ;;  %v2259_v32 = vsel %vm2258_vm14, %v2243_v58, %v2251_v5  ;;  %v2263_v2 = vsel %vm2258_vm14, %v2251_v5, %v2243_v58  ;;  %v2203_v58 = vmul.f32 %v4908_v8, %v2190_v20  ;;  %v2157_v5 = vmul.f32 %v4782_v15, %v2133_v44 }
 0x90a   : > { %v2275_v28 = vmul.f32 %v4924_v62, %v2263_v2  ;;  %v2276_v20 = vmul.f32 %v4927_v18, %v2259_v32  ;;  %v2226_v32 = vmul.f32 %v4685_v35, %v2202_v21 }
 0x90b   : > { %v2227_v2 = vmul.f32 %v4685_v35, %v2203_v58 }
 0x90c   : > { %v2324_v27 = vpop.permute.xlu0 %2323  ;;  %v2299_v51 = vmul.f32 %v4630_v38, %v2275_v28  ;;  %v2300_v31 = vmul.f32 %v4630_v38, %v2276_v20 }
 0x90d   : > { %v2332_v44 = vsel %vm2331_vm5, %v2316_v59, %v2324_v27  ;;  %v2336_v15 = vsel %vm2331_vm5, %v2324_v27, %v2316_v59  ;;  %v4970_v37 = vpop.permute.xlu1 %2100  ;;  %v4987_v59 = vsel %vm2267_vm10, 1.0, %v5518_v36  ;;  %v2165_v27 = vadd.f32 %v2157_v5, %v2090_v56  ;;  %vm2481_vm10 = vmand %vm2479_vm2, %vm2126_vm6 }
 0x90e   : > { %v2344_v21 = vmul.f32 %v4957_v33, %v2336_v15  ;;  %v2345_v35 = vmul.f32 %v4962_v53, %v2332_v44  ;;  %v5018_v5 = vsel %vm2480_vm15, 1.0, %v5518_v36  ;;  %v2235_v28 = vadd.f32 %v2227_v2, %v2166_v25 }
 0x90f   : > { %v2234_v38 = vadd.f32 %v2226_v32, %v2165_v27  ;;  %v5021_v20 = vsel %vm2481_vm10, 1.0, %v5518_v36  ;;  %vm2542_vm6 = vcmp.lt.s32.totalorder %v4834_v17, 112  ;;  %v2616_v44 = vsel %vm2611_vm9, %v2604_v43, %v4862_v4 }
 0x910   : > { %v2393_v58 = vpop.permute.xlu0 %2392  ;;  %v2368_v15 = vmul.f32 %v4634_v42, %v2344_v21  ;;  %v2308_v25 = vadd.f32 %v2300_v31, %v2235_v28  ;;  %v5052_v31 = vsel %vm2479_vm2, 1.0, %v5518_v36 }
 0x911   : > { %v2401_v52 = vsel %vm2400_vm13, %v4864_v45, %v2393_v58  ;;  %v2405_v61 = vsel %vm2400_vm13, %v2393_v58, %v4864_v45  ;;  %v5012_v56 = vpop.permute.xlu1 %2175  ;;  %v2612_v45 = vsel %vm2611_vm9, %v4862_v4, %v2604_v43  ;;  %v2369_v58 = vmul.f32 %v4634_v42, %v2345_v35 }
 0x912   : > { %v2413_v22 = vmul.f32 %v4987_v59, %v2401_v52  ;;  %v2414_v39 = vmul.f32 %v4992_v47, %v2405_v61  ;;  %v2307_v32 = vadd.f32 %v2299_v51, %v2234_v38  ;;  %v5047_v51 = vsel %vm2478_vm0, 1.0, %v5518_v36 }
 0x913   : > { %v2377_v21 = vadd.f32 %v2369_v58, %v2308_v25  ;;  %v2627_v38 = vmul.f32 %v4979_v24, %v2616_v44 }
 0x914   : > { %v2462_v52 = vpop.permute.xlu0 %2461  ;;  %v2437_v50 = vmul.f32 %v4636_v48, %v2413_v22  ;;  %v2438_v43 = vmul.f32 %v4636_v48, %v2414_v39  ;;  %v2626_v39 = vmul.f32 %v4976_v16, %v2612_v45 }
 0x915   : > { %v2470_v2 = vsel %vm2469_vm4, %v4874_v6, %v2462_v52  ;;  %v2474_v27 = vsel %vm2469_vm4, %v2462_v52, %v4874_v6  ;;  %v5038_v61 = vpop.permute.xlu1 %2597  ;;  %v2376_v6 = vadd.f32 %v2368_v15, %v2307_v32 }
 0x916   : > { %v2486_v4 = vmul.f32 %v5018_v5, %v2470_v2  ;;  %v2487_v42 = vmul.f32 %v5021_v20, %v2474_v27  ;;  %v2446_v58 = vadd.f32 %v2438_v43, %v2377_v21 }
 0x917   : > { %v2445_v15 = vadd.f32 %v2437_v50, %v2376_v6 }
 0x918   : > { %v2510_v35 = vmul.f32 %v4638_v7, %v2486_v4  ;;  %v2511_v48 = vmul.f32 %v4638_v7, %v2487_v42  ;;  %v2535_v22 = vpop.permute.xlu0 %2534  ;;  %v2650_v4 = vmul.f32 %v4642_v10, %v2626_v39  ;;  %v2651_v42 = vmul.f32 %v4642_v10, %v2627_v38 }
 0x919   : > { %v2543_v46 = vsel %vm2542_vm6, %v4894_v49, %v2535_v22  ;;  %v2547_v1 = vsel %vm2542_vm6, %v2535_v22, %v4894_v49  ;;  %v2184_v28 = vpop.permute.xlu1 %2183 }
 0x91a   : > { %v2555_v52 = vmul.f32 %v5047_v51, %v2543_v46  ;;  %v2556_v7 = vmul.f32 %v5052_v31, %v2547_v1  ;;  %v2518_v32 = vadd.f32 %v2510_v35, %v2445_v15  ;;  %v2519_v25 = vadd.f32 %v2511_v48, %v2446_v58 }
 0x91b   : > { %v2195_v10 = vsel %vm2189_vm12, %v2184_v28, %v5012_v56 }
 0x91c   : > { %v2579_v45 = vmul.f32 %v4640_v13, %v2555_v52  ;;  %v2580_v44 = vmul.f32 %v4640_v13, %v2556_v7  ;;  %v2245_v2 = vpop.permute.xlu0 %2244  ;;  %v2204_v7 = vmul.f32 %v4899_v29, %v2195_v10 }
 0x91d   : > { %v2253_v27 = vpop.permute.xlu1 %2252 }
 0x91e   : > { %v2587_v49 = vadd.f32 %v2579_v45, %v2518_v32  ;;  %v2588_v22 = vadd.f32 %v2580_v44, %v2519_v25  ;;  %v2093_v45 = vmul.f32 %v4676_v57, %v4719_v60 }
 0x920   : > { %v2658_v50 = vadd.f32 %v2650_v4, %v2587_v49  ;;  %v2318_v43 = vpop.permute.xlu0 %2317  ;;  %v2659_v6 = vadd.f32 %v2651_v42, %v2588_v22  ;;  %v2260_v4 = vsel %vm2258_vm14, %v2245_v2, %v2253_v27 }
 0x921   : > { %v2326_v21 = vpop.permute.xlu1 %2325 }
 0x922   : > { %v2691_v46 = vmul.f32 %v4820_v19, %v2659_v6  ;;  %v2690_v35 = vmul.f32 %v4820_v19, %v2658_v50  ;;  %v2264_v19 = vsel %vm2258_vm14, %v2253_v27, %v2245_v2 }
 0x923   : > { %v2277_v22 = vmul.f32 %v4924_v62, %v2264_v19 }
 0x924   : > { %v2387_v48 = vpop.permute.xlu0 %2386  ;;  %v2723_v1 = vadd.f32 %v4814_v0, %v2691_v46  ;;  %v2722_v13 = vadd.f32 %v4814_v0, %v2690_v35  ;;  %v2191_v0 = vsel %vm2189_vm12, %v5012_v56, %v2184_v28  ;;  %v2337_v56 = vsel %vm2331_vm5, %v2326_v21, %v2318_v43 }
 0x925   : > { %v2395_v52 = vpop.permute.xlu1 %2394  ;;  %v2205_v44 = vmul.f32 %v4908_v8, %v2191_v0  ;;  %v2278_v46 = vmul.f32 %v4927_v18, %v2260_v4 }
 0x926   : > { %v2731_v15 = vmax.f32 %v2723_v1, 0.0  ;;  %v2730_v58 = vmax.f32 %v2722_v13, 0.0  ;;  %v2406_v35 = vsel %vm2400_vm13, %v2395_v52, %v2387_v48 }
 0x928   : > { %v2456_v39 = vpop.permute.xlu0 %2455  ;;  %2741 = vmatprep.subr.mxu0 %v2731_v15 }
 0x929   : > { %2742 = vmatpush1.msra.mxu0 %v2730_v58  ;;  %v2464_v32 = vpop.permute.xlu1 %2463  ;;  %v2229_v58 = vmul.f32 %v4828_v34, %v2205_v44 }
 0x92a   : > { %3307 = vmatmul.mubr.msk.f32.vlgmr.msra.gmra.mrb[56].mxu0 %vm457_vm1, %v4296_v55  ;;  %v2092_v55 = vmul.f32 %v4676_v57, %v4701_v3  ;;  %v2333_v3 = vsel %vm2331_vm5, %v2318_v43, %v2326_v21  ;;  %v2346_v43 = vmul.f32 %v4957_v33, %v2337_v56  ;;  %v2402_v21 = vsel %vm2400_vm13, %v2387_v48, %v2395_v52 }
 0x92b   : > { %2953 = vmatprep.mubr.f32.mxu0 %v5518_v36  ;;  %v2347_v10 = vmul.f32 %v4962_v53, %v2333_v3  ;;  %v2471_v0 = vsel %vm2469_vm4, %v2456_v39, %v2464_v32  ;;  %v2475_v48 = vsel %vm2469_vm4, %v2464_v32, %v2456_v39 }
 0x92c   : > { %v2529_v38 = vpop.permute.xlu0 %2528  ;;  %v2370_v44 = vmul.f32 %v4721_v30, %v2346_v43  ;;  %v2488_v4 = vmul.f32 %v5018_v5, %v2471_v0  ;;  %v2489_v56 = vmul.f32 %v5021_v20, %v2475_v48 }
 0x92d   : > { %v2537_v52 = vpop.permute.xlu1 %2536 }
 0x92f   : > { %v1978_v25 = vpop.f32.mrb[54].mxu0 }
 0x930   : > { %v2013_v28 = vmul.f32 %v4757_v12, %v1978_v25  ;;  %v2109_v42 = vpop.permute.xlu0 %2108  ;;  %v1980_v49 = vpop.f32.mrb[55].mxu0 }
 0x931   : > { %v2116_v57 = vsel %vm2114_vm8, %v4970_v37, %v2109_v42  ;;  %v2120_v60 = vsel %vm2114_vm8, %v2109_v42, %v4970_v37  ;;  %v2014_v6 = vmul.f32 %v4757_v12, %v1980_v49  ;;  %v2228_v12 = vmul.f32 %v4828_v34, %v2204_v7 }
 0x932   : > { %v2045_v2 = vadd.f32 %v4771_v14, %v2013_v28  ;;  %v2135_v27 = vmul.f32 %v4883_v11, %v2120_v60  ;;  %v2136_v50 = vmul.f32 %v4887_v23, %v2116_v57  ;;  %v2415_v34 = vmul.f32 %v4987_v59, %v2402_v21 }
 0x933   : > { %v2046_v15 = vadd.f32 %v4771_v14, %v2014_v6  ;;  %v2301_v14 = vmul.f32 %v4632_v40, %v2277_v22  ;;  %v2416_v7 = vmul.f32 %v4992_v47, %v2406_v35  ;;  %v2544_v28 = vsel %vm2542_vm6, %v2529_v38, %v2537_v52 }
 0x934   : > { %v5115_v1 = vmax.f32 %v2045_v2, 0.0  ;;  %v2159_v37 = vmul.f32 %v4794_v41, %v2135_v27  ;;  %v2160_v13 = vmul.f32 %v4794_v41, %v2136_v50  ;;  %v2302_v41 = vmul.f32 %v4632_v40, %v2278_v46 }
 0x935   : > { %v2548_v40 = vsel %vm2542_vm6, %v2537_v52, %v2529_v38  ;;  %v2371_v42 = vmul.f32 %v4721_v30, %v2347_v10  ;;  %v2439_v3 = vmul.f32 %v4737_v26, %v2415_v34  ;;  %v2440_v57 = vmul.f32 %v4737_v26, %v2416_v7  ;;  %v5521_v52 = vld [vmem:[#allocation23_spill] sm:$0xff]  ;;  %v3034_v34 = vld [vmem:[%s5448_s9] sm:$0xff] }
 0x936   : > { %v2167_v19 = vadd.f32 %v2159_v37, %v2092_v55  ;;  %v2168_v25 = vadd.f32 %v2160_v13, %v2093_v45  ;;  %2390 = vrot.lane.b32.xlu0 %v5115_v1, %s3933_s30  ;;  %2104 = vrot.lane.b32.xlu1 %v5115_v1, %s3928_s25  ;;  %v5136_v55 = vmax.f32 %v2046_v15, 0.0  ;;  %v2606_v45 = vpop.permute.xlu0 %2605  ;;  %v2557_v38 = vmul.f32 %v5047_v51, %v2544_v28  ;;  %v3035_v28 = vld [vmem:[%s5448_s9 + $0x8] sm:$0xff] }
 0x937   : > { %v2613_v60 = vsel %vm2611_vm9, %v5038_v61, %v2606_v45  ;;  %v2617_v30 = vsel %vm2611_vm9, %v2606_v45, %v5038_v61  ;;  %v2558_v2 = vmul.f32 %v5052_v31, %v2548_v40  ;;  %v2512_v6 = vmul.f32 %v4759_v54, %v2488_v4  ;;  %v3037_v45 = vld [vmem:[%s5448_s9 + $0x18] sm:$0xff]  ;;  %v3068_v4 = vld [vmem:[%s5449_s10 + $0x10] sm:$0xff]  ;;  %v2103_v40 = vpop.permute.xlu1 %2102 }
 0x938   : > { %v2236_v39 = vadd.f32 %v2228_v12, %v2167_v19  ;;  %v2237_v32 = vadd.f32 %v2229_v58, %v2168_v25  ;;  %v2513_v46 = vmul.f32 %v4759_v54, %v2489_v56  ;;  %v2628_v21 = vmul.f32 %v4976_v16, %v2613_v60  ;;  %v2701_v56 = vld [vmem:[%s5447_s8 + $0x18] sm:$0xff] }
 0x939   : > { %v2629_v35 = vmul.f32 %v4979_v24, %v2617_v30  ;;  %v2581_v61 = vmul.f32 %v4784_v9, %v2557_v38  ;;  %v2582_v37 = vmul.f32 %v4784_v9, %v2558_v2  ;;  %v2700_v9 = vld [vmem:[%s5447_s8 + $0x10] sm:$0xff] }
 0x93a   : > { %v2309_v49 = vadd.f32 %v2301_v14, %v2236_v39  ;;  %v2310_v22 = vadd.f32 %v2302_v41, %v2237_v32  ;;  %2179 = vrot.lane.b32.xlu1 %v5115_v1, %s3929_s26  ;;  %2467 = vrot.lane.b32.xlu0 %v5136_v55, %s3934_s12  ;;  %v2652_v58 = vmul.f32 %v4804_v63, %v2628_v21  ;;  %v3036_v39 = vld [vmem:[%s5448_s9 + $0x10] sm:$0xff]  ;;  %v5231_v38 = vpop.permute.xlu0 %2599 }
 0x93b   : > { %v2653_v10 = vmul.f32 %v4804_v63, %v2629_v35  ;;  %v5522_v63 = vld [vmem:[#allocation26_spill] sm:$0xff]  ;;  %v5523_v32 = vld [vmem:[#allocation8_spill] sm:$0xff] }
 0x93c   : > { %v2378_v27 = vadd.f32 %v2370_v44, %v2309_v49  ;;  %v2379_v50 = vadd.f32 %v2371_v42, %v2310_v22  ;;  %v3066_v42 = vld [vmem:[%s5449_s10] sm:$0xff]  ;;  %v2178_v49 = vpop.permute.xlu1 %2177  ;;  %v3067_v22 = vld [vmem:[%s5449_s10 + $0x8] sm:$0xff] }
 0x93e   : > { %v2447_v43 = vadd.f32 %v2439_v3, %v2378_v27  ;;  %v2448_v26 = vadd.f32 %v2440_v57, %v2379_v50  ;;  %2248 = vrot.lane.b32.xlu1 %v5115_v1, %s3930_s27  ;;  %2540 = vrot.lane.b32.xlu0 %v5136_v55, %s3935_s13  ;;  %v3069_v3 = vld [vmem:[%s5449_s10 + $0x18] sm:$0xff]  ;;  %v2111_v27 = vpop.permute.xlu0 %2110 }
 0x93f   : > { %v2117_v21 = vsel %vm2114_vm8, %v2103_v40, %v2111_v27  ;;  %v2121_v35 = vsel %vm2114_vm8, %v2111_v27, %v2103_v40  ;;  %v5529_v27 = vld [vmem:[#allocation17_spill] sm:$0xff] }
 0x940   : > { %v2520_v13 = vadd.f32 %v2512_v6, %v2447_v43  ;;  %v2521_v15 = vadd.f32 %v2513_v46, %v2448_v26  ;;  %v2247_v57 = vpop.permute.xlu1 %2246 }
 0x942   : > { %v2589_v12 = vadd.f32 %v2581_v61, %v2520_v13  ;;  %v2590_v54 = vadd.f32 %v2582_v37, %v2521_v15  ;;  %2321 = vrot.lane.b32.xlu1 %v5115_v1, %s3931_s28  ;;  %2609 = vrot.lane.b32.xlu0 %v5136_v55, %s3932_s29  ;;  %v2186_v6 = vpop.permute.xlu0 %2185 }
 0x943   : > { %v2192_v37 = vsel %vm2189_vm12, %v2178_v49, %v2186_v6  ;;  %v2196_v13 = vsel %vm2189_vm12, %v2186_v6, %v2178_v49 }
 0x944   : > { %v2660_v0 = vadd.f32 %v2652_v58, %v2589_v12  ;;  %v2661_v48 = vadd.f32 %v2653_v10, %v2590_v54  ;;  %v2320_v60 = vpop.permute.xlu1 %2319  ;;  %v2137_v12 = vmul.f32 %v4883_v11, %v2121_v35  ;;  %v2138_v54 = vmul.f32 %v4887_v23, %v2117_v21 }
 0x945   : > { %v2206_v58 = vmul.f32 %v4899_v29, %v2196_v13  ;;  %v2207_v10 = vmul.f32 %v4908_v8, %v2192_v37  ;;  %v5530_v13 = vld [vmem:[#allocation18_spill] sm:$0xff] }
 0x946   : > { %v2692_v19 = vmul.f32 %v5521_v52, %v2660_v0  ;;  %2459 = vrot.lane.b32.xlu1 %v5115_v1, %s3934_s12  ;;  %v2693_v25 = vmul.f32 %v5521_v52, %v2661_v48  ;;  %2714 = vperm.xlu0 %3750, %v2700_v9   ;;  %v2255_v43 = vpop.permute.xlu0 %2254  ;;  %s5424_s12 = scalar_lea.vmem %s5450_s11, %s3317_s20 }
 0x947   : > { %v2261_v0 = vsel %vm2258_vm14, %v2247_v57, %v2255_v43  ;;  %v2265_v48 = vsel %vm2258_vm14, %v2255_v43, %v2247_v57 }
 0x948   : > { %v2725_v14 = vadd.f32 %v5522_v63, %v2693_v25  ;;  %v2724_v41 = vadd.f32 %v5522_v63, %v2692_v19  ;;  %v2389_v30 = vpop.permute.xlu1 %2388  ;;  %v5524_v19 = vld [vmem:[#allocation15_spill] sm:$0xff] }
 0x949   : > { %v2161_v25 = vmul.f32 %v5524_v19, %v2137_v12  ;;  %v2162_v63 = vmul.f32 %v5524_v19, %v2138_v54  ;;  %v5531_v19 = vld [vmem:[#allocation20_spill] sm:$0xff] }
 0x94a   : > { %2532 = vrot.lane.b32.xlu1 %v5115_v1, %s3935_s13  ;;  %v2733_v7 = vmax.f32 %v2725_v14, 0.0  ;;  %v2732_v44 = vmax.f32 %v2724_v41, 0.0  ;;  %3040 = vperm.xlu0 %3750, %v3034_v34   ;;  %v2328_v61 = vpop.permute.xlu0 %2327  ;;  %v5525_v34 = vld [vmem:[#allocation19_spill] sm:$0xff] }
 0x94b   : > { %v2334_v14 = vsel %vm2331_vm5, %v2320_v60, %v2328_v61  ;;  %v2338_v41 = vsel %vm2331_vm5, %v2328_v61, %v2320_v60 }
 0x94c   : > { %2815 = vmatprep.subr.mxu1 %v2733_v7  ;;  %v2458_v2 = vpop.permute.xlu1 %2457  ;;  %v5526_v7 = vld [vmem:[#allocation14_spill] sm:$0xff]  ;;  %v2348_v49 = vmul.f32 %v4957_v33, %v2338_v41 }
 0x94d   : > { %2816 = vmatpush1.msra.mxu1 %v2732_v44  ;;  %v2094_v44 = vmul.f32 %v5526_v7, %v5525_v34 }
 0x94e   : > { %3308 = vmatmul.mubr.msk.f32.vlgmr.msra.gmra.mrb[48].mxu1 %vm457_vm1, %v5523_v32  ;;  %2601 = vrot.lane.b32.xlu1 %v5115_v1, %s3932_s29  ;;  %v2397_v9 = vpop.permute.xlu0 %2396 }
 0x94f   : > { %3050 = vperm.xlu0 %3750, %v3036_v39   ;;  %3027 = vmatprep.mubr.f32.mxu1 %v5518_v36  ;;  %v2669_v36 = vld [vmem:[%s5446_s7 + $0x18] sm:$0xff]  ;;  %v2403_v40 = vsel %vm2400_vm13, %v2389_v30, %v2397_v9  ;;  %v2169_v57 = vadd.f32 %v2161_v25, %v2094_v44 }
 0x950   : > { %v2531_v50 = vpop.permute.xlu1 %2530  ;;  %v5527_v39 = vld [vmem:[#allocation21_spill] sm:$0xff]  ;;  %v2417_v21 = vmul.f32 %v4987_v59, %v2403_v40 }
 0x951   : > { %v2095_v32 = vmul.f32 %v5526_v7, %v5527_v39 }
 0x952   : > { %2112 = vrot.lane.b32.xlu1 %v5136_v55, %s3928_s25  ;;  %v2441_v25 = vmul.f32 %v5531_v19, %v2417_v21  ;;  %v5534_v21 = vld [vmem:[#allocation12_spill] sm:$0xff] }
 0x953   : > { %3055 = vperm.xlu0 %3750, %v3037_v45   ;;  %v2279_v45 = vmul.f32 %v4924_v62, %v2265_v48  ;;  %v2170_v60 = vadd.f32 %v2162_v63, %v2095_v32 }
 0x954   : > { %v2466_v46 = vpop.permute.xlu1 %2465 }
 0x955   : > { %v2303_v6 = vmul.f32 %v5529_v27, %v2279_v45  ;;  %v2472_v54 = vsel %vm2469_vm4, %v2458_v2, %v2466_v46 }
 0x956   : > { %2187 = vrot.lane.b32.xlu1 %v5136_v55, %s3929_s26 }
 0x957   : > { %3082 = vperm.xlu0 %3750, %v3068_v4   ;;  %v2280_v4 = vmul.f32 %v4927_v18, %v2261_v0 }
 0x958   : > { %v2539_v26 = vpop.permute.xlu1 %2538 }
 0x959   : > { %v2304_v43 = vmul.f32 %v5529_v27, %v2280_v4  ;;  %v2545_v44 = vsel %vm2542_vm6, %v2531_v50, %v2539_v26  ;;  %v5533_v27 = vld [vmem:[#allocation24_spill] sm:$0xff] }
 0x95a   : > { %2256 = vrot.lane.b32.xlu1 %v5136_v55, %s3930_s27 }
 0x95c   : > { %v2608_v15 = vpop.permute.xlu1 %2607 }
 0x95d   : > { %v2614_v45 = vsel %vm2611_vm9, %v5231_v38, %v2608_v15  ;;  %v2618_v4 = vsel %vm2611_vm9, %v2608_v15, %v5231_v38 }
 0x95e   : > { %2329 = vrot.lane.b32.xlu1 %v5136_v55, %s3931_s28 }
 0x962   : > { %2398 = vrot.lane.b32.xlu1 %v5136_v55, %s3933_s30 }
 0x966   : > { %2687 = vperm.xlu1 %3749, %v2669_v36   ;;  %v5528_v36 = vld [vmem:[#allocation16_spill] sm:$0xff] }
 0x96a   : > { %2719 = vperm.xlu1 %3749, %v2701_v56   ;;  %v2230_v56 = vmul.f32 %v5528_v36, %v2206_v58  ;;  %v2476_v58 = vsel %vm2469_vm4, %v2466_v46, %v2458_v2  ;;  %v2549_v2 = vsel %vm2542_vm6, %v2539_v26, %v2531_v50  ;;  %v2559_v50 = vmul.f32 %v5047_v51, %v2545_v44 }
 0x96b   : > { %v2491_v41 = vmul.f32 %v5021_v20, %v2476_v58  ;;  %v2560_v26 = vmul.f32 %v5052_v31, %v2549_v2 }
 0x96c   : > { %v2238_v61 = vadd.f32 %v2230_v56, %v2169_v57  ;;  %v5532_v56 = vld [vmem:[#allocation22_spill] sm:$0xff] }
 0x96d   : > { %v2515_v40 = vmul.f32 %v5532_v56, %v2491_v41  ;;  %v2584_v38 = vmul.f32 %v5533_v27, %v2560_v26 }
 0x96e   : > { %3045 = vperm.xlu1 %3749, %v3035_v28   ;;  %v2231_v28 = vmul.f32 %v5528_v36, %v2207_v10  ;;  %v2311_v48 = vadd.f32 %v2303_v6, %v2238_v61  ;;  %v2583_v6 = vmul.f32 %v5533_v27, %v2559_v50  ;;  %v5537_v50 = vld [vmem:[#allocation29_spill] sm:$0xff]  ;;  %v5539_v27 = vld [vmem:[#allocation28_spill] sm:$0xff] }
 0x970   : > { %v2239_v37 = vadd.f32 %v2231_v28, %v2170_v60 }
 0x972   : > { %3072 = vperm.xlu1 %3749, %v3066_v42   ;;  %v2407_v42 = vsel %vm2400_vm13, %v2397_v9, %v2389_v30  ;;  %v2372_v30 = vmul.f32 %v5530_v13, %v2348_v49  ;;  %v2312_v9 = vadd.f32 %v2304_v43, %v2239_v37  ;;  %v2630_v49 = vmul.f32 %v4976_v16, %v2614_v45 }
 0x973   : > { %v2418_v35 = vmul.f32 %v4992_v47, %v2407_v42 }
 0x974   : > { %v2380_v34 = vadd.f32 %v2372_v30, %v2311_v48 }
 0x975   : > { %v2442_v63 = vmul.f32 %v5531_v19, %v2418_v35  ;;  %v2654_v35 = vmul.f32 %v5534_v21, %v2630_v49 }
 0x976   : > { %3077 = vperm.xlu1 %3749, %v3067_v22   ;;  %v2349_v22 = vmul.f32 %v4962_v53, %v2334_v14  ;;  %v2490_v14 = vmul.f32 %v5018_v5, %v2472_v54  ;;  %v2449_v39 = vadd.f32 %v2441_v25, %v2380_v34 }
 0x978   : > { %v2373_v12 = vmul.f32 %v5530_v13, %v2349_v22  ;;  %v2514_v28 = vmul.f32 %v5532_v56, %v2490_v14  ;;  %v2631_v22 = vmul.f32 %v4979_v24, %v2618_v4 }
 0x97a   : > { %3087 = vperm.xlu1 %3749, %v3069_v3   ;;  %v2381_v7 = vadd.f32 %v2373_v12, %v2312_v9  ;;  %v2522_v57 = vadd.f32 %v2514_v28, %v2449_v39  ;;  %v2655_v61 = vmul.f32 %v5534_v21, %v2631_v22  ;;  %v5535_v9 = vld [vmem:[#allocation25_spill] sm:$0xff]  ;;  %v5538_v22 = vld [vmem:[#allocation27_spill] sm:$0xff] }
 0x97c   : > { %v2450_v32 = vadd.f32 %v2442_v63, %v2381_v7  ;;  %v2591_v37 = vadd.f32 %v2583_v6, %v2522_v57  ;;  %v2096_v57 = vmul.f32 %v5538_v22, %v5115_v1 }
 0x97e   : > { %v2523_v60 = vadd.f32 %v2515_v40, %v2450_v32  ;;  %v2662_v12 = vadd.f32 %v2654_v35, %v2591_v37  ;;  %v5536_v40 = vld [vmem:[#allocation11_spill] sm:$0xff] }
 0x980   : > { %v2592_v13 = vadd.f32 %v2584_v38, %v2523_v60  ;;  %v2694_v19 = vmul.f32 %v5535_v9, %v2662_v12  ;;  %v2097_v60 = vmul.f32 %v5538_v22, %v5136_v55 }
 0x982   : > { %v2663_v54 = vadd.f32 %v2655_v61, %v2592_v13 }
 0x984   : > { %v2695_v25 = vmul.f32 %v5535_v9, %v2663_v54 }
 0x9a8   : > { %v5249_v52 = vpop.permute.xlu1 %2104  ;;  %v5283_v10 = vpop.permute.xlu0 %2390 }
 0x9ac   : > { %v5271_v3 = vpop.permute.xlu1 %2179  ;;  %v5303_v36 = vpop.permute.xlu0 %2467 }
 0x9b0   : > { %v5285_v0 = vpop.permute.xlu1 %2248  ;;  %v5313_v15 = vpop.permute.xlu0 %2540 }
 0x9b4   : > { %v5295_v46 = vpop.permute.xlu1 %2321  ;;  %v5321_v58 = vpop.permute.xlu0 %2609 }
 0x9b8   : > { %v2460_v42 = vpop.permute.xlu1 %2459 }
 0x9b9   : > { %v2473_v12 = vsel %vm2469_vm4, %v2460_v42, %v5303_v36  ;;  %v2477_v54 = vsel %vm2469_vm4, %v5303_v36, %v2460_v42 }
 0x9ba   : > { %v2492_v42 = vmul.f32 %v5018_v5, %v2473_v12  ;;  %v5547_v12 = vld [vmem:[#allocation2_spill] sm:$0xff] }
 0x9bc   : > { %v5315_v43 = vpop.permute.xlu1 %2532 }
 0x9c0   : > { %v5319_v30 = vpop.permute.xlu1 %2601 }
 0x9c4   : > { %v2113_v48 = vpop.permute.xlu1 %2112 }
 0x9c5   : > { %v2715_v63 = vpop.permute.xlu0 %2714  ;;  %v2118_v14 = vsel %vm2114_vm8, %v5249_v52, %v2113_v48  ;;  %v2122_v41 = vsel %vm2114_vm8, %v2113_v48, %v5249_v52 }
 0x9c6   : > { %v2726_v34 = vadd.f32 %v2715_v63, %v2694_v19  ;;  %v2727_v7 = vadd.f32 %v2715_v63, %v2695_v25  ;;  %v2139_v32 = vmul.f32 %v4883_v11, %v2122_v41  ;;  %v2140_v45 = vmul.f32 %v4887_v23, %v2118_v14  ;;  %v5541_v19 = vld [vmem:[#allocation32_spill] sm:$0xff] }
 0x9c8   : > { %v2734_v44 = vmax.f32 %v2726_v34, 0.0  ;;  %v2735_v2 = vmax.f32 %v2727_v7, 0.0  ;;  %v2188_v39 = vpop.permute.xlu1 %2187  ;;  %v2163_v23 = vmul.f32 %v5537_v50, %v2139_v32  ;;  %v2164_v26 = vmul.f32 %v5537_v50, %v2140_v45  ;;  %v5544_v50 = vld [vmem:[#allocation35_spill] sm:$0xff] }
 0x9c9   : > { %v2193_v4 = vsel %vm2189_vm12, %v5271_v3, %v2188_v39  ;;  %v2197_v56 = vsel %vm2189_vm12, %v2188_v39, %v5271_v3  ;;  %v2493_v7 = vmul.f32 %v5021_v20, %v2477_v54  ;;  %v5542_v39 = vld [vmem:[#allocation33_spill] sm:$0xff] }
 0x9ca   : > { %2889 = vmatprep.subr.mxu0 %v2735_v2  ;;  %v2208_v52 = vmul.f32 %v4899_v29, %v2197_v56  ;;  %v2209_v28 = vmul.f32 %v4908_v8, %v2193_v4  ;;  %v2171_v35 = vadd.f32 %v2163_v23, %v2096_v57  ;;  %v2172_v61 = vadd.f32 %v2164_v26, %v2097_v60  ;;  %v5543_v4 = vld [vmem:[#allocation34_spill] sm:$0xff] }
 0x9cb   : > { %2890 = vmatpush1.msra.mxu0 %v2734_v44  ;;  %v2516_v20 = vmul.f32 %v5543_v4, %v2492_v42  ;;  %v2517_v56 = vmul.f32 %v5543_v4, %v2493_v7  ;;  %v5550_v42 = vld [vmem:[#allocation5_spill] sm:$0xff] }
 0x9cc   : > { %3309 = vmatmul.mubr.msk.f32.vlgmr.msra.gmra.mrb[58].mxu0 %vm457_vm1, %v5536_v40  ;;  %v2257_v11 = vpop.permute.xlu1 %2256  ;;  %v2232_v6 = vmul.f32 %v5539_v27, %v2208_v52  ;;  %v2233_v38 = vmul.f32 %v5539_v27, %v2209_v28  ;;  %v2615_v40 = vsel %vm2611_vm9, %v5319_v30, %v5321_v58 }
 0x9cd   : > { %v2262_v49 = vsel %vm2258_vm14, %v5285_v0, %v2257_v11  ;;  %v2266_v3 = vsel %vm2258_vm14, %v2257_v11, %v5285_v0 }
 0x9ce   : > { %v2281_v29 = vmul.f32 %v4924_v62, %v2266_v3  ;;  %v2282_v8 = vmul.f32 %v4927_v18, %v2262_v49  ;;  %v5540_v62 = vld [vmem:[#allocation30_spill] sm:$0xff]  ;;  %v2240_v48 = vadd.f32 %v2232_v6, %v2171_v35  ;;  %v2241_v9 = vadd.f32 %v2233_v38, %v2172_v61  ;;  %v3041_v61 = vpop.permute.xlu0 %3040 }
 0x9d0   : > { %v2330_v21 = vpop.permute.xlu1 %2329  ;;  %v2305_v1 = vmul.f32 %v5540_v62, %v2281_v29  ;;  %v2306_v37 = vmul.f32 %v5540_v62, %v2282_v8  ;;  %v5545_v29 = vld [vmem:[#allocation31_spill] sm:$0xff] }
 0x9d1   : > { %v2335_v0 = vsel %vm2331_vm5, %v5295_v46, %v2330_v21  ;;  %v2339_v18 = vsel %vm2331_vm5, %v2330_v21, %v5295_v46 }
 0x9d2   : > { %v2350_v55 = vmul.f32 %v4957_v33, %v2339_v18  ;;  %v2351_v13 = vmul.f32 %v4962_v53, %v2335_v0  ;;  %v2313_v14 = vadd.f32 %v2305_v1, %v2240_v48  ;;  %v2314_v41 = vadd.f32 %v2306_v37, %v2241_v9  ;;  %v5548_v48 = vld [vmem:[#allocation3_spill] sm:$0xff] }
 0x9d4   : > { %v2374_v46 = vmul.f32 %v5541_v19, %v2350_v55  ;;  %v2375_v25 = vmul.f32 %v5541_v19, %v2351_v13  ;;  %v2399_v63 = vpop.permute.xlu1 %2398 }
 0x9d5   : > { %v2404_v33 = vsel %vm2400_vm13, %v5283_v10, %v2399_v63  ;;  %v2408_v53 = vsel %vm2400_vm13, %v2399_v63, %v5283_v10  ;;  %v2546_v10 = vsel %vm2542_vm6, %v5315_v43, %v5313_v15 }
 0x9d6   : > { %v2419_v34 = vmul.f32 %v4987_v59, %v2404_v33  ;;  %v2420_v36 = vmul.f32 %v4992_v47, %v2408_v53  ;;  %v2382_v44 = vadd.f32 %v2374_v46, %v2313_v14  ;;  %v2383_v2 = vadd.f32 %v2375_v25, %v2314_v41 }
 0x9d7   : > { %v2550_v59 = vsel %vm2542_vm6, %v5313_v15, %v5315_v43  ;;  %v2561_v52 = vmul.f32 %v5047_v51, %v2546_v10  ;;  %v2619_v15 = vsel %vm2611_vm9, %v5321_v58, %v5319_v30  ;;  %v2632_v51 = vmul.f32 %v4976_v16, %v2615_v40  ;;  %v5546_v16 = vld [vmem:[#allocation13_spill] sm:$0xff] }
 0x9d8   : > { %v2443_v32 = vmul.f32 %v5542_v39, %v2419_v34  ;;  %v2444_v45 = vmul.f32 %v5542_v39, %v2420_v36  ;;  %v2562_v28 = vmul.f32 %v5052_v31, %v2550_v59  ;;  %v2633_v31 = vmul.f32 %v4979_v24, %v2619_v15  ;;  %v5549_v34 = vld [vmem:[#allocation4_spill] sm:$0xff] }
 0x9d9   : > { %v2585_v23 = vmul.f32 %v5544_v50, %v2561_v52  ;;  %v2656_v8 = vmul.f32 %v5545_v29, %v2632_v51  ;;  %v5552_v52 = vld [vmem:[#allocation7_spill] sm:$0xff] }
 0x9da   : > { %v2451_v47 = vadd.f32 %v2443_v32, %v2382_v44  ;;  %v2452_v5 = vadd.f32 %v2444_v45, %v2383_v2  ;;  %v2586_v26 = vmul.f32 %v5544_v50, %v2562_v28  ;;  %v2657_v22 = vmul.f32 %v5545_v29, %v2633_v31  ;;  %v3051_v2 = vpop.permute.xlu0 %3050  ;;  %v5553_v31 = vld [vmem:[#allocation9_spill] sm:$0xff] }
 0x9dc   : > { %v2524_v43 = vadd.f32 %v2516_v20, %v2451_v47  ;;  %v2525_v11 = vadd.f32 %v2517_v56, %v2452_v5  ;;  %v5551_v20 = vld [vmem:[#allocation6_spill] sm:$0xff] }
 0x9de   : > { %v2593_v49 = vadd.f32 %v2585_v23, %v2524_v43  ;;  %v2594_v3 = vadd.f32 %v2586_v26, %v2525_v11  ;;  %v3056_v39 = vpop.permute.xlu0 %3055 }
 0x9e0   : > { %v2664_v60 = vadd.f32 %v2656_v8, %v2593_v49  ;;  %v2665_v17 = vadd.f32 %v2657_v22, %v2594_v3  ;;  %v5554_v3 = vld [vmem:[#allocation10_spill] sm:$0xff] }
 0x9e2   : > { %v3083_v59 = vpop.permute.xlu0 %3082 }
 0x9e5   : > { %v2688_v57 = vpop.permute.xlu1 %2687 }
 0x9e6   : > { %v2696_v30 = vmul.f32 %v2688_v57, %v2664_v60  ;;  %v2697_v58 = vmul.f32 %v2688_v57, %v2665_v17 }
 0x9e9   : > { %v2720_v27 = vpop.permute.xlu1 %2719 }
 0x9ea   : > { %v2728_v6 = vadd.f32 %v2720_v27, %v2696_v30  ;;  %v2729_v38 = vadd.f32 %v2720_v27, %v2697_v58 }
 0x9ec   : > { %v2736_v21 = vmax.f32 %v2728_v6, 0.0  ;;  %v2737_v35 = vmax.f32 %v2729_v38, 0.0 }
 0x9ed   : > { %v3046_v24 = vpop.permute.xlu1 %3045 }
 0x9ee   : > { %2963 = vmatprep.subr.mxu1 %v2737_v35 }
 0x9ef   : > { %2964 = vmatpush1.msra.mxu1 %v2736_v21 }
 0x9f0   : > { %3310 = vmatmul.mubr.msk.f32.vlgmr.msra.gmra.mrb[50].mxu1 %vm457_vm1, %v5546_v16 }
 0x9f1   : > { %v3073_v1 = vpop.permute.xlu1 %3072 }
 0x9f5   : > { %v3078_v33 = vpop.permute.xlu1 %3077 }
 0x9f9   : > { %v3088_v50 = vpop.permute.xlu1 %3087 }
 0x9fd   : > { %v2807_v0 = vpop.f32.mrb[56].mxu0 }
 0x9fe   : > { %v3058_v18 = vmul.f32 %v3041_v61, %v2807_v0  ;;  %v2809_v62 = vpop.f32.mrb[57].mxu0 }
 0x9ff   : > { %v3059_v37 = vmul.f32 %v3041_v61, %v2809_v62 }
 0xa00   : > { %v3090_v55 = vadd.f32 %v3073_v1, %v3058_v18 }
 0xa01   : > { %v3091_v13 = vadd.f32 %v3073_v1, %v3059_v37 }
 0xa02   : > { %v3098_v54 = vadd.f32 %v3090_v55, %v5547_v12 }
 0xa03   : > { %v3099_v9 = vadd.f32 %v3091_v13, %v5548_v48 }
 0xa05   : > { %v3319_v19 = vpack.c.bf16 %v3099_v9, %v3098_v54 }
 0xa07   : > { %3130 = vst [vmem:[%s5424_s12] sm:$0xff] %v3319_v19 }
 0xa21   : > { %v2881_v46 = vpop.f32.mrb[48].mxu1 }
 0xa22   : > { %v3060_v25 = vmul.f32 %v3046_v24, %v2881_v46  ;;  %v2883_v63 = vpop.f32.mrb[49].mxu1 }
 0xa23   : > { %v3061_v53 = vmul.f32 %v3046_v24, %v2883_v63 }
 0xa24   : > { %v3092_v14 = vadd.f32 %v3078_v33, %v3060_v25 }
 0xa25   : > { %v3093_v41 = vadd.f32 %v3078_v33, %v3061_v53 }
 0xa26   : > { %v3100_v36 = vadd.f32 %v3092_v14, %v5549_v34 }
 0xa27   : > { %v3101_v7 = vadd.f32 %v3093_v41, %v5550_v42 }
 0xa29   : > { %v3320_v44 = vpack.c.bf16 %v3101_v7, %v3100_v36 }
 0xa2b   : > { %3131 = vst [vmem:[%s5424_s12 + $0x8] sm:$0xff] %v3320_v44 }
 0xa9f   : > { %v2955_v32 = vpop.f32.mrb[58].mxu0 }
 0xaa0   : > { %v3062_v45 = vmul.f32 %v3051_v2, %v2955_v32  ;;  %v2957_v10 = vpop.f32.mrb[59].mxu0 }
 0xaa1   : > { %v3063_v47 = vmul.f32 %v3051_v2, %v2957_v10 }
 0xaa2   : > { %v3094_v5 = vadd.f32 %v3083_v59, %v3062_v45 }
 0xaa3   : > { %v3095_v4 = vadd.f32 %v3083_v59, %v3063_v47 }
 0xaa4   : > { %v3102_v56 = vadd.f32 %v3094_v5, %v5551_v20 }
 0xaa5   : > { %v3103_v28 = vadd.f32 %v3095_v4, %v5552_v52 }
 0xaa7   : > { %v3321_v40 = vpack.c.bf16 %v3103_v28, %v3102_v56 }
 0xaa9   : > { %3132 = vst [vmem:[%s5424_s12 + $0x10] sm:$0xff] %v3321_v40 }
 0xac3   : > { %v3029_v15 = vpop.f32.mrb[50].mxu1 }
 0xac4   : > { %v3064_v43 = vmul.f32 %v3056_v39, %v3029_v15  ;;  %v3031_v11 = vpop.f32.mrb[51].mxu1 }
 0xac5   : > { %v3065_v23 = vmul.f32 %v3056_v39, %v3031_v11 }
 0xac6   : > { %v3096_v26 = vadd.f32 %v3088_v50, %v3064_v43 }
 0xac7   : > { %v3097_v51 = vadd.f32 %v3088_v50, %v3065_v23 }
 0xac8   : > { %v3104_v49 = vadd.f32 %v3096_v26, %v5553_v31 }
 0xac9   : > { %v3105_v29 = vadd.f32 %v3097_v51, %v5554_v3 }
 0xacb   : > { %v3322_v8 = vpack.c.bf16 %v3105_v29, %v3104_v49 }
 0xacd   : > { %3133 = vst [vmem:[%s5424_s12 + $0x18] sm:$0xff] %v3322_v8 }
 0xace PF: > { %s21_s17 = sadd.s32 1, %s3914_s17  }
 0xacf   : > { %p18_p4 = scmp.ge.s32.totalorder %s21_s17, 4  }
 0xad1   :  { %20 = sbr.rel (!%p18_p4) target bundleno = 1 (0x1), region = 94 }

</bundles_post_ra>
